<compile_context>
chip_gen: v7x
topology: tpu7x:2x2x1
jax: 0.10.0
libtpu: 0.0.40
codegen_flags: <defaults>
</compile_context>

<pallas_src>
import functools

import numpy as np
import jax
import jax.numpy as jnp
from jax import lax
from jax.experimental import pallas as pl
from jax.experimental.pallas import tpu as pltpu

# ----------------------------- configuration --------------------------------
B         = 2                     # batch
L         = 8                     # max_seq_length
KMER      = 3                     # tokens per position (3rd dim of rna_data)
D_MODEL   = 32                    # dim_embedding_token == dim_embedding_tissue
D_STATE   = 16                    # Mamba d_state
D_CONV    = 4                     # Mamba d_conv
EXPAND    = 2
D_INNER   = EXPAND * D_MODEL      # 64
DT_RANK   = max(1, D_MODEL // 16) # 2
N_LAYERS  = 2
N_TISSUES = 5
N_TOKENS  = 19 + 2                # len(TOKENS) + 2
OUT_DIM   = D_MODEL * L           # output_dim (frequency_features=False)
PRED_OUT  = 1                     # Predictor output width (class not provided)
P_PAD     = 128                   # lane-dense padded predictor width
EPS       = 1e-5

BL  = B * L                       # rows of the (batch*time, feature) slab
LBN = L * B * D_STATE             # rows of the flattened scan tensors


# --------------------------- stable activations ------------------------------
def _sigmoid(v):
    # stable logistic: exp() only of non-positive arguments
    ev = jnp.exp(-jnp.abs(v))
    s = 1.0 / (1.0 + ev)
    return jnp.where(v >= 0, s, 1.0 - s)


def _silu(v):
    return v * _sigmoid(v)


def _softplus(v):
    # stable softplus: max(v,0) + log(1 + exp(-|v|))
    return jnp.maximum(v, 0.0) + jnp.log(1.0 + jnp.exp(-jnp.abs(v)))


# ------------------------------- fused kernel --------------------------------
def ptrnet_fused_kernel(
        rna_ref, tis_ref, len_ref, trow_ref,
        tok_tab_ref, tis_tab_ref,
        s_stack_ref, rep_bt_ref, rep_bt_t_ref, sel_n_ref, sel_n_t_ref, sel_head_ref,
        ln_g_ref, ln_b_ref, w_in_x_ref, w_in_z_ref, conv_w_ref, conv_b_ref,
        w_dt_ref, b_dt_ref, w_b_ref, w_c_ref, a_tile_ref, d_ref, w_out_ref,
        ln_f_g_ref, ln_f_b_ref, pred_w_ref, pred_b_ref,
        out_ref,
        da_s, dbx_s, hh_s,
        *, n_layers, apply_ln, nb, nl, ne, ns, nk, n_tokens, n_tissues, p_pad):
    f32 = jnp.float32
    nbl = nb * nl                     # batch*time rows
    bn = nb * ns                      # batch*state rows of the scan state

    # ---- token / tissue embeddings as one-hot / count matmuls (MXU) --------
    # TODO(synk): nn.Embedding max_norm renormalization not applied (init norms small).
    ids = rna_ref[...]                                              # (BL, K) int32
    tok_iota = lax.broadcasted_iota(jnp.int32, (nbl, n_tokens), 1)
    counts = jnp.zeros((nbl, n_tokens), f32)
    for k in range(ids.shape[1]):                                   # sum over k-mer axis
        counts = counts + jnp.where(ids[:, k:k + 1] == tok_iota, 1.0, 0.0)
    x = jnp.dot(counts, tok_tab_ref[...], preferred_element_type=f32)   # (BL, D)

    tis_iota = lax.broadcasted_iota(jnp.int32, (nbl, n_tissues), 1)
    tis_oh = jnp.where(tis_ref[...] == tis_iota, 1.0, 0.0)
    x = x + jnp.dot(tis_oh, tis_tab_ref[...], preferred_element_type=f32)

    # padding mask: zero positions t >= seq_length
    x = jnp.where(trow_ref[...] < len_ref[...], x, 0.0)

    # ---- Mamba layers (fused pre-LN, no residual: matches PTRnetPure) ------
    for layer in range(n_layers):
        if apply_ln:
            mu = jnp.mean(x, axis=-1, keepdims=True)
            var = jnp.mean((x - mu) ** 2, axis=-1, keepdims=True)
            xn = (x - mu) * lax.rsqrt(var + EPS)
            xn = xn * ln_g_ref[layer] + ln_b_ref[layer]
        else:
            xn = x

        # in_proj split host-side -> two lane-aligned dots (no column slicing)
        x_in = jnp.dot(xn, w_in_x_ref[layer], preferred_element_type=f32)   # (BL, E)
        z = jnp.dot(xn, w_in_z_ref[layer], preferred_element_type=f32)      # (BL, E)

        # depthwise causal conv1d as banded shift-matrix matmul (block-diag / batch)
        shifted = jnp.dot(s_stack_ref[...], x_in,
                          preferred_element_type=f32)                       # (K*BL, E)
        acc = jnp.zeros((nbl, ne), f32) + conv_b_ref[layer]
        for k in range(nk):
            acc = acc + conv_w_ref[layer * nk + k] * shifted[k * nbl:(k + 1) * nbl, :]
        x_act = _silu(acc)                                                  # (BL, E)

        # projections; dt low-rank chain pre-folded into w_dt_eff on the host
        dt = _softplus(jnp.dot(x_act, w_dt_ref[layer], preferred_element_type=f32)
                       + b_dt_ref[layer])                                   # (BL, E)
        b_mat = jnp.dot(x_act, w_b_ref[layer], preferred_element_type=f32)  # (BL, N)
        c_mat = jnp.dot(x_act, w_c_ref[layer], preferred_element_type=f32)  # (BL, N)

        # vectorized scan pre-compute in (L*B*N, E) rows, rho = (t*B+b)*N + n
        rep = rep_bt_ref[...]                                               # (LBN, BL)
        dt_rep = jnp.dot(rep, dt, preferred_element_type=f32)               # (LBN, E)
        u_rep = jnp.dot(rep, dt * x_act, preferred_element_type=f32)        # (LBN, E)
        b_rows = jnp.dot(rep, b_mat, preferred_element_type=f32)            # (LBN, N)
        b_sel = jnp.sum(b_rows * sel_n_ref[...], axis=1, keepdims=True)     # (LBN, 1)
        da_s[...] = jnp.exp(dt_rep * a_tile_ref[layer])                     # exp(dt*A)
        dbx_s[...] = b_sel * u_rep                                          # dt*B*x

        # serial recurrence: only h <- dA*h + dBx stays on the chain
        h = jnp.zeros((bn, ne), f32)
        for t in range(nl):
            r0 = t * bn
            h = da_s[pl.ds(r0, bn), :] * h + dbx_s[pl.ds(r0, bn), :]
            hh_s[pl.ds(r0, bn), :] = h

        # y[bt,e] = sum_n C[bt,n] * h_t[b,n,e]   as one masked matmul
        c_tiled = jnp.dot(c_mat, sel_n_t_ref[...],
                          preferred_element_type=f32)                       # (BL, LBN)
        y = jnp.dot(c_tiled * rep_bt_t_ref[...], hh_s[...],
                    preferred_element_type=f32)                             # (BL, E)
        y = y + d_ref[layer] * x_act                                        # D skip
        y = y * _silu(z)                                                    # gate
        x = jnp.dot(y, w_out_ref[layer], preferred_element_type=f32)        # (BL, D)

    # ---- final LayerNorm (only when num_layers > 1, as in the reference) ---
    if apply_ln:
        mu = jnp.mean(x, axis=-1, keepdims=True)
        var = jnp.mean((x - mu) ** 2, axis=-1, keepdims=True)
        x = (x - mu) * lax.rsqrt(var + EPS)
        x = x * ln_f_g_ref[...] + ln_f_b_ref[...]

    # ---- predictor head: flatten(x) @ W  ==  sum_l (sel_l @ x) @ W_l --------
    acc = jnp.zeros((nb, p_pad), f32) + pred_b_ref[...]
    for li in range(nl):
        rows_l = jnp.dot(sel_head_ref[li], x, preferred_element_type=f32)   # (B, D)
        acc = acc + jnp.dot(rows_l, pred_w_ref[li], preferred_element_type=f32)
    out_ref[...] = acc                                                      # (B, 128)


# ------------------------------ pallas glue ----------------------------------
def _zero_map(n):
    return lambda i: (0,) * n


# --------------------------- host-side constants ------------------------------
def _build_constants():
    # conv shift matrices (block-diagonal per batch), stacked over the K taps
    s_stack = np.zeros((D_CONV * BL, BL), np.float32)
    for k in range(D_CONV):
        s = D_CONV - 1 - k
        for b in range(B):
            for t in range(L):
                src = t - s
                if src >= 0:
                    s_stack[k * BL + b * L + t, b * L + src] = 1.0

    # scan helpers: row rho = (t*B + b)*N + n  <->  bt = b*L + t
    rep_bt = np.zeros((LBN, BL), np.float32)
    sel_n = np.zeros((LBN, D_STATE), np.float32)
    for t in range(L):
        for b in range(B):
            for n in range(D_STATE):
                rho = (t * B + b) * D_STATE + n
                rep_bt[rho, b * L + t] = 1.0
                sel_n[rho, n] = 1.0

    # head row selection: sel_head[l, b, r] = 1 iff r == b*L + l
    sel_head = np.zeros((L, B, BL), np.float32)
    for l in range(L):
        for b in range(B):
            sel_head[l, b, b * L + l] = 1.0

    return dict(
        s_stack=jnp.asarray(s_stack),
        rep_bt=jnp.asarray(rep_bt),
        rep_bt_t=jnp.asarray(np.ascontiguousarray(rep_bt.T)),
        sel_n=jnp.asarray(sel_n),
        sel_n_t=jnp.asarray(np.ascontiguousarray(sel_n.T)),
        sel_head=jnp.asarray(sel_head),
    )


# ------------------------------ parameters -----------------------------------
def init_params(key):
    ks = jax.random.split(key, 8)
    scale = 0.02
    token_table = scale * jax.random.normal(ks[0], (N_TOKENS, D_MODEL), jnp.float32)
    token_table = token_table.at[0].set(0.0)                      # padding_idx = 0
    tissue_table = scale * jax.random.normal(ks[1], (N_TISSUES, D_MODEL), jnp.float32)

    mamba = []
    layer_keys = jax.random.split(ks[2], N_LAYERS)
    for lk in layer_keys:
        k = jax.random.split(lk, 5)
        mamba.append(dict(
            ln_g=jnp.ones((1, D_MODEL), jnp.float32),
            ln_b=jnp.zeros((1, D_MODEL), jnp.float32),
            w_in=scale * jax.random.normal(k[0], (D_MODEL, 2 * D_INNER), jnp.float32),
            conv_w=scale * jax.random.normal(k[1], (D_INNER, D_CONV), jnp.float32),
            conv_b=jnp.zeros((1, D_INNER), jnp.float32),
            w_xproj=scale * jax.random.normal(
                k[2], (D_INNER, DT_RANK + 2 * D_STATE), jnp.float32),
            w_dt=scale * jax.random.normal(k[3], (DT_RANK, D_INNER), jnp.float32),
            b_dt=jnp.full((1, D_INNER), -4.0, jnp.float32),
            a_log=jnp.log(jnp.tile(
                jnp.arange(1, D_STATE + 1, dtype=jnp.float32)[None, :],
                (D_INNER, 1))),
            d=jnp.ones((1, D_INNER), jnp.float32),
            w_out=scale * jax.random.normal(k[4], (D_INNER, D_MODEL), jnp.float32),
        ))

    return dict(
        token_table=token_table,
        tissue_table=tissue_table,
        mamba=mamba,
        ln_f_g=jnp.ones((1, D_MODEL), jnp.float32),
        ln_f_b=jnp.zeros((1, D_MODEL), jnp.float32),
        # TODO(synk): Predictor class definition not provided; modeled as a single Linear.
        pred_w=scale * jax.random.normal(ks[3], (OUT_DIM, PRED_OUT), jnp.float32),
        pred_b=jnp.zeros((1, PRED_OUT), jnp.float32),
    )


def pack_params(params):
    """Host-side folding / splitting / stacking into kernel operands."""
    const = _build_constants()
    m = params['mamba']

    def st(f):
        return jnp.stack([f(p) for p in m], axis=0)

    packed = dict(
        token_table=params['token_table'],
        tissue_table=params['tissue_table'],
        ln_g=st(lambda p: p['ln_g']),
        ln_b=st(lambda p: p['ln_b']),
        w_in_x=st(lambda p: p['w_in'][:, :D_INNER]),
        w_in_z=st(lambda p: p['w_in'][:, D_INNER:]),
        conv_w=jnp.concatenate(
            [p['conv_w'].T.reshape(D_CONV, 1, D_INNER) for p in m], axis=0),
        conv_b=st(lambda p: p['conv_b']),
        w_dt_eff=st(lambda p: p['w_xproj'][:, :DT_RANK] @ p['w_dt']),
        b_dt=st(lambda p: p['b_dt']),
        w_B=st(lambda p: p['w_xproj'][:, DT_RANK:DT_RANK + D_STATE]),
        w_C=st(lambda p: p['w_xproj'][:, DT_RANK + D_STATE:]),
        a_tile=st(lambda p: jnp.tile(-jnp.exp(p['a_log']).T, (B * L, 1))),
        d=st(lambda p: p['d']),
        w_out=st(lambda p: p['w_out']),
        ln_f_g=params['ln_f_g'],
        ln_f_b=params['ln_f_b'],
        pred_w3=jnp.pad(params['pred_w'],
                        ((0, 0), (0, P_PAD - PRED_OUT))).reshape(L, D_MODEL, P_PAD),
        pred_b_pad=jnp.pad(params['pred_b'], ((0, 0), (0, P_PAD - PRED_OUT))),
    )
    packed.update(const)
    return packed


# ------------------------------- forward -------------------------------------
@jax.jit
def ptrnet_forward(packed, rna_data, tissue_id, seq_lengths, codon_freqs):
    del codon_freqs  # frequency_features=False -> unused

    rna_rows = rna_data.reshape(B * L, KMER).astype(jnp.int32)
    tis_rows = jnp.repeat(tissue_id.astype(jnp.int32), L).reshape(B * L, 1)
    len_rows = jnp.repeat(seq_lengths.astype(jnp.int32), L).reshape(B * L, 1)
    t_rows = jnp.tile(jnp.arange(L, dtype=jnp.int32), B).reshape(B * L, 1)

    operands = [
        rna_rows, tis_rows, len_rows, t_rows,
        packed['token_table'], packed['tissue_table'],
        packed['s_stack'], packed['rep_bt'], packed['rep_bt_t'],
        packed['sel_n'], packed['sel_n_t'], packed['sel_head'],
        packed['ln_g'], packed['ln_b'], packed['w_in_x'], packed['w_in_z'],
        packed['conv_w'], packed['conv_b'], packed['w_dt_eff'], packed['b_dt'],
        packed['w_B'], packed['w_C'], packed['a_tile'], packed['d'],
        packed['w_out'], packed['ln_f_g'], packed['ln_f_b'],
        packed['pred_w3'], packed['pred_b_pad'],
    ]

    kern = functools.partial(
        ptrnet_fused_kernel,
        n_layers=N_LAYERS, apply_ln=(N_LAYERS > 1),
        nb=B, nl=L, ne=D_INNER, ns=D_STATE, nk=D_CONV,
        n_tokens=N_TOKENS, n_tissues=N_TISSUES, p_pad=P_PAD)

    y_pad = pl.pallas_call(
        kern,
        out_shape=jax.ShapeDtypeStruct((B, P_PAD), jnp.float32),
        grid=(1,),
        in_specs=[pl.BlockSpec(x.shape, _zero_map(x.ndim)) for x in operands],
        out_specs=pl.BlockSpec((B, P_PAD), _zero_map(2)),
        scratch_shapes=[
            pltpu.VMEM((LBN, D_INNER), jnp.float32),   # dA
            pltpu.VMEM((LBN, D_INNER), jnp.float32),   # dB*x
            pltpu.VMEM((LBN, D_INNER), jnp.float32),   # stacked scan states
        ],
        compiler_params=pltpu.CompilerParams(dimension_semantics=("arbitrary",)),
    )(*operands)

    # pretrain=False head: x_last already has size L*D == output_dim (no extra pad)
    return y_pad[:, :PRED_OUT]


# --------------------------------- main ---------------------------------------
if __name__ == "__main__":
    key = jax.random.PRNGKey(0)
    kp, kd, kt = jax.random.split(key, 3)
    params = init_params(kp)
    packed = pack_params(params)

    rna_data = jax.random.randint(kd, (B, L, KMER), 1, N_TOKENS, dtype=jnp.int32)
    tissue_id = jax.random.randint(kt, (B,), 0, N_TISSUES, dtype=jnp.int32)
    seq_lengths = jnp.array([L, L - 3], dtype=jnp.int32)
    codon_freqs = jnp.zeros((B, 64), jnp.float32)                  # unused

    y = ptrnet_forward(packed, rna_data, tissue_id, seq_lengths, codon_freqs)
    jax.block_until_ready(y)
    print("KERNEL_OK")
</pallas_src>

<mosaic_0001>
module attributes {stable_mosaic.version = 11 : i64} {
  func.func @ptrnet_fused_kernel(%arg0: i32, %arg1: memref<16x3xi32, #tpu.memory_space<vmem>>, %arg2: memref<16x1xi32, #tpu.memory_space<vmem>>, %arg3: memref<16x1xi32, #tpu.memory_space<vmem>>, %arg4: memref<16x1xi32, #tpu.memory_space<vmem>>, %arg5: memref<21x32xf32, #tpu.memory_space<vmem>>, %arg6: memref<5x32xf32, #tpu.memory_space<vmem>>, %arg7: memref<64x16xf32, #tpu.memory_space<vmem>>, %arg8: memref<256x16xf32, #tpu.memory_space<vmem>>, %arg9: memref<16x256xf32, #tpu.memory_space<vmem>>, %arg10: memref<256x16xf32, #tpu.memory_space<vmem>>, %arg11: memref<16x256xf32, #tpu.memory_space<vmem>>, %arg12: memref<8x2x16xf32, #tpu.memory_space<vmem>>, %arg13: memref<2x1x32xf32, #tpu.memory_space<vmem>>, %arg14: memref<2x1x32xf32, #tpu.memory_space<vmem>>, %arg15: memref<2x32x64xf32, #tpu.memory_space<vmem>>, %arg16: memref<2x32x64xf32, #tpu.memory_space<vmem>>, %arg17: memref<8x1x64xf32, #tpu.memory_space<vmem>>, %arg18: memref<2x1x64xf32, #tpu.memory_space<vmem>>, %arg19: memref<2x64x64xf32, #tpu.memory_space<vmem>>, %arg20: memref<2x1x64xf32, #tpu.memory_space<vmem>>, %arg21: memref<2x64x16xf32, #tpu.memory_space<vmem>>, %arg22: memref<2x64x16xf32, #tpu.memory_space<vmem>>, %arg23: memref<2x256x64xf32, #tpu.memory_space<vmem>>, %arg24: memref<2x1x64xf32, #tpu.memory_space<vmem>>, %arg25: memref<2x64x32xf32, #tpu.memory_space<vmem>>, %arg26: memref<1x32xf32, #tpu.memory_space<vmem>>, %arg27: memref<1x32xf32, #tpu.memory_space<vmem>>, %arg28: memref<8x32x128xf32, #tpu.memory_space<vmem>>, %arg29: memref<1x128xf32, #tpu.memory_space<vmem>>, %arg30: memref<2x128xf32, #tpu.memory_space<vmem>>, %arg31: memref<256x64xf32, #tpu.memory_space<vmem>>, %arg32: memref<256x64xf32, #tpu.memory_space<vmem>>, %arg33: memref<256x64xf32, #tpu.memory_space<vmem>>) attributes {dimension_semantics = [#tpu.dimension_semantics<arbitrary>], iteration_bounds = array<i64: 1>, scalar_prefetch = 0 : i64, scratch_operands = 3 : i64, tpu.core_type = #tpu.core_type<tc>, window_params = [{pipeline_mode = #tpu.pipeline_mode<synchronous>, transform_indices = @transform_0, window_bounds = array<i64: 16, 3>}, {pipeline_mode = #tpu.pipeline_mode<synchronous>, transform_indices = @transform_1, window_bounds = array<i64: 16, 1>}, {pipeline_mode = #tpu.pipeline_mode<synchronous>, transform_indices = @transform_2, window_bounds = array<i64: 16, 1>}, {pipeline_mode = #tpu.pipeline_mode<synchronous>, transform_indices = @transform_3, window_bounds = array<i64: 16, 1>}, {pipeline_mode = #tpu.pipeline_mode<synchronous>, transform_indices = @transform_4, window_bounds = array<i64: 21, 32>}, {pipeline_mode = #tpu.pipeline_mode<synchronous>, transform_indices = @transform_5, window_bounds = array<i64: 5, 32>}, {pipeline_mode = #tpu.pipeline_mode<synchronous>, transform_indices = @transform_6, window_bounds = array<i64: 64, 16>}, {pipeline_mode = #tpu.pipeline_mode<synchronous>, transform_indices = @transform_7, window_bounds = array<i64: 256, 16>}, {pipeline_mode = #tpu.pipeline_mode<synchronous>, transform_indices = @transform_8, window_bounds = array<i64: 16, 256>}, {pipeline_mode = #tpu.pipeline_mode<synchronous>, transform_indices = @transform_9, window_bounds = array<i64: 256, 16>}, {pipeline_mode = #tpu.pipeline_mode<synchronous>, transform_indices = @transform_10, window_bounds = array<i64: 16, 256>}, {pipeline_mode = #tpu.pipeline_mode<synchronous>, transform_indices = @transform_11, window_bounds = array<i64: 8, 2, 16>}, {pipeline_mode = #tpu.pipeline_mode<synchronous>, transform_indices = @transform_12, window_bounds = array<i64: 2, 1, 32>}, {pipeline_mode = #tpu.pipeline_mode<synchronous>, transform_indices = @transform_13, window_bounds = array<i64: 2, 1, 32>}, {pipeline_mode = #tpu.pipeline_mode<synchronous>, transform_indices = @transform_14, window_bounds = array<i64: 2, 32, 64>}, {pipeline_mode = #tpu.pipeline_mode<synchronous>, transform_indices = @transform_15, window_bounds = array<i64: 2, 32, 64>}, {pipeline_mode = #tpu.pipeline_mode<synchronous>, transform_indices = @transform_16, window_bounds = array<i64: 8, 1, 64>}, {pipeline_mode = #tpu.pipeline_mode<synchronous>, transform_indices = @transform_17, window_bounds = array<i64: 2, 1, 64>}, {pipeline_mode = #tpu.pipeline_mode<synchronous>, transform_indices = @transform_18, window_bounds = array<i64: 2, 64, 64>}, {pipeline_mode = #tpu.pipeline_mode<synchronous>, transform_indices = @transform_19, window_bounds = array<i64: 2, 1, 64>}, {pipeline_mode = #tpu.pipeline_mode<synchronous>, transform_indices = @transform_20, window_bounds = array<i64: 2, 64, 16>}, {pipeline_mode = #tpu.pipeline_mode<synchronous>, transform_indices = @transform_21, window_bounds = array<i64: 2, 64, 16>}, {pipeline_mode = #tpu.pipeline_mode<synchronous>, transform_indices = @transform_22, window_bounds = array<i64: 2, 256, 64>}, {pipeline_mode = #tpu.pipeline_mode<synchronous>, transform_indices = @transform_23, window_bounds = array<i64: 2, 1, 64>}, {pipeline_mode = #tpu.pipeline_mode<synchronous>, transform_indices = @transform_24, window_bounds = array<i64: 2, 64, 32>}, {pipeline_mode = #tpu.pipeline_mode<synchronous>, transform_indices = @transform_25, window_bounds = array<i64: 1, 32>}, {pipeline_mode = #tpu.pipeline_mode<synchronous>, transform_indices = @transform_26, window_bounds = array<i64: 1, 32>}, {pipeline_mode = #tpu.pipeline_mode<synchronous>, transform_indices = @transform_27, window_bounds = array<i64: 8, 32, 128>}, {pipeline_mode = #tpu.pipeline_mode<synchronous>, transform_indices = @transform_28, window_bounds = array<i64: 1, 128>}, {pipeline_mode = #tpu.pipeline_mode<synchronous>, transform_indices = @transform_29, window_bounds = array<i64: 2, 128>}]} {
    %c0 = arith.constant 0 : index
    %c0_0 = arith.constant 0 : index
    %0 = vector.load %arg1[%c0, %c0_0] : memref<16x3xi32, #tpu.memory_space<vmem>>, vector<16x3xi32>
    %1 = tpu.iota {dimensions = array<i32: 1>} : vector<16x21xi32>
    %cst = arith.constant 0.000000e+00 : f32
    %2 = vector.broadcast %cst : f32 to vector<16x21xf32>
    %3 = vector.extract_strided_slice %0 {offsets = [0, 0], sizes = [16, 1], strides = [1, 1]} : vector<16x3xi32> to vector<16x1xi32>
    %4 = vector.broadcast %3 : vector<16x1xi32> to vector<16x21xi32>
    %5 = arith.cmpi eq, %4, %1 : vector<16x21xi32>
    %cst_1 = arith.constant 1.000000e+00 : f32
    %cst_2 = arith.constant 0.000000e+00 : f32
    %6 = vector.broadcast %cst_1 : f32 to vector<16x21xf32>
    %7 = vector.broadcast %cst_2 : f32 to vector<16x21xf32>
    %8 = arith.select %5, %6, %7 : vector<16x21xi1>, vector<16x21xf32>
    %9 = arith.addf %2, %8 : vector<16x21xf32>
    %10 = vector.extract_strided_slice %0 {offsets = [0, 1], sizes = [16, 1], strides = [1, 1]} : vector<16x3xi32> to vector<16x1xi32>
    %11 = vector.broadcast %10 : vector<16x1xi32> to vector<16x21xi32>
    %12 = arith.cmpi eq, %11, %1 : vector<16x21xi32>
    %cst_3 = arith.constant 1.000000e+00 : f32
    %cst_4 = arith.constant 0.000000e+00 : f32
    %13 = vector.broadcast %cst_3 : f32 to vector<16x21xf32>
    %14 = vector.broadcast %cst_4 : f32 to vector<16x21xf32>
    %15 = arith.select %12, %13, %14 : vector<16x21xi1>, vector<16x21xf32>
    %16 = arith.addf %9, %15 : vector<16x21xf32>
    %17 = vector.extract_strided_slice %0 {offsets = [0, 2], sizes = [16, 1], strides = [1, 1]} : vector<16x3xi32> to vector<16x1xi32>
    %18 = vector.broadcast %17 : vector<16x1xi32> to vector<16x21xi32>
    %19 = arith.cmpi eq, %18, %1 : vector<16x21xi32>
    %cst_5 = arith.constant 1.000000e+00 : f32
    %cst_6 = arith.constant 0.000000e+00 : f32
    %20 = vector.broadcast %cst_5 : f32 to vector<16x21xf32>
    %21 = vector.broadcast %cst_6 : f32 to vector<16x21xf32>
    %22 = arith.select %19, %20, %21 : vector<16x21xi1>, vector<16x21xf32>
    %23 = arith.addf %16, %22 : vector<16x21xf32>
    %c0_7 = arith.constant 0 : index
    %c0_8 = arith.constant 0 : index
    %24 = vector.load %arg5[%c0_7, %c0_8] : memref<21x32xf32, #tpu.memory_space<vmem>>, vector<21x32xf32>
    %cst_9 = arith.constant dense<0.000000e+00> : vector<16x32xf32>
    %25 = tpu.matmul %23, %24, %cst_9 {dimension_numbers = #tpu.dot_dimension_numbers<[1], [0], [0], [1], [0, 0, 1, 1], [], []>} : vector<16x21xf32>, vector<21x32xf32>, vector<16x32xf32> -> vector<16x32xf32>
    %26 = tpu.iota {dimensions = array<i32: 1>} : vector<16x5xi32>
    %c0_10 = arith.constant 0 : index
    %c0_11 = arith.constant 0 : index
    %27 = vector.load %arg2[%c0_10, %c0_11] : memref<16x1xi32, #tpu.memory_space<vmem>>, vector<16x1xi32>
    %28 = vector.broadcast %27 : vector<16x1xi32> to vector<16x5xi32>
    %29 = arith.cmpi eq, %28, %26 : vector<16x5xi32>
    %cst_12 = arith.constant 1.000000e+00 : f32
    %cst_13 = arith.constant 0.000000e+00 : f32
    %30 = vector.broadcast %cst_12 : f32 to vector<16x5xf32>
    %31 = vector.broadcast %cst_13 : f32 to vector<16x5xf32>
    %32 = arith.select %29, %30, %31 : vector<16x5xi1>, vector<16x5xf32>
    %c0_14 = arith.constant 0 : index
    %c0_15 = arith.constant 0 : index
    %33 = vector.load %arg6[%c0_14, %c0_15] : memref<5x32xf32, #tpu.memory_space<vmem>>, vector<5x32xf32>
    %cst_16 = arith.constant dense<0.000000e+00> : vector<16x32xf32>
    %34 = tpu.matmul %32, %33, %cst_16 {dimension_numbers = #tpu.dot_dimension_numbers<[1], [0], [0], [1], [0, 0, 1, 1], [], []>} : vector<16x5xf32>, vector<5x32xf32>, vector<16x32xf32> -> vector<16x32xf32>
    %35 = arith.addf %25, %34 : vector<16x32xf32>
    %c0_17 = arith.constant 0 : index
    %c0_18 = arith.constant 0 : index
    %36 = vector.load %arg4[%c0_17, %c0_18] : memref<16x1xi32, #tpu.memory_space<vmem>>, vector<16x1xi32>
    %c0_19 = arith.constant 0 : index
    %c0_20 = arith.constant 0 : index
    %37 = vector.load %arg3[%c0_19, %c0_20] : memref<16x1xi32, #tpu.memory_space<vmem>>, vector<16x1xi32>
    %38 = arith.cmpi slt, %36, %37 : vector<16x1xi32>
    %cst_21 = arith.constant 0.000000e+00 : f32
    %39 = vector.shape_cast %38 : vector<16x1xi1> to vector<16x1xi1>
    %40 = vector.broadcast %39 : vector<16x1xi1> to vector<16x32xi1>
    %41 = vector.broadcast %cst_21 : f32 to vector<16x32xf32>
    %42 = arith.select %40, %35, %41 : vector<16x32xi1>, vector<16x32xf32>
    %cst_22 = arith.constant dense<0.000000e+00> : vector<16xf32>
    %43 = vector.multi_reduction <add>, %42, %cst_22 [1] : vector<16x32xf32> to vector<16xf32>
    %44 = vector.shape_cast %43 : vector<16xf32> to vector<16x1xf32>
    %cst_23 = arith.constant 3.200000e+01 : f32
    %45 = vector.broadcast %cst_23 : f32 to vector<16x1xf32>
    %46 = arith.divf %44, %45 : vector<16x1xf32>
    %47 = vector.broadcast %46 : vector<16x1xf32> to vector<16x32xf32>
    %48 = arith.subf %42, %47 : vector<16x32xf32>
    %49 = arith.mulf %48, %48 : vector<16x32xf32>
    %cst_24 = arith.constant dense<0.000000e+00> : vector<16xf32>
    %50 = vector.multi_reduction <add>, %49, %cst_24 [1] : vector<16x32xf32> to vector<16xf32>
    %51 = vector.shape_cast %50 : vector<16xf32> to vector<16x1xf32>
    %cst_25 = arith.constant 3.200000e+01 : f32
    %52 = vector.broadcast %cst_25 : f32 to vector<16x1xf32>
    %53 = arith.divf %51, %52 : vector<16x1xf32>
    %54 = vector.broadcast %46 : vector<16x1xf32> to vector<16x32xf32>
    %55 = arith.subf %42, %54 : vector<16x32xf32>
    %cst_26 = arith.constant 9.99999974E-6 : f32
    %56 = vector.broadcast %cst_26 : f32 to vector<16x1xf32>
    %57 = arith.addf %53, %56 : vector<16x1xf32>
    %58 = math.rsqrt %57 : vector<16x1xf32>
    %59 = vector.broadcast %58 : vector<16x1xf32> to vector<16x32xf32>
    %60 = arith.mulf %55, %59 : vector<16x32xf32>
    %c0_27 = arith.constant 0 : index
    %c0_28 = arith.constant 0 : index
    %c0_29 = arith.constant 0 : index
    %61 = vector.load %arg13[%c0_27, %c0_28, %c0_29] : memref<2x1x32xf32, #tpu.memory_space<vmem>>, vector<1x1x32xf32>
    %62 = vector.shape_cast %61 : vector<1x1x32xf32> to vector<1x32xf32>
    %63 = vector.broadcast %62 : vector<1x32xf32> to vector<16x32xf32>
    %64 = arith.mulf %60, %63 : vector<16x32xf32>
    %c0_30 = arith.constant 0 : index
    %c0_31 = arith.constant 0 : index
    %c0_32 = arith.constant 0 : index
    %65 = vector.load %arg14[%c0_30, %c0_31, %c0_32] : memref<2x1x32xf32, #tpu.memory_space<vmem>>, vector<1x1x32xf32>
    %66 = vector.shape_cast %65 : vector<1x1x32xf32> to vector<1x32xf32>
    %67 = vector.broadcast %66 : vector<1x32xf32> to vector<16x32xf32>
    %68 = arith.addf %64, %67 : vector<16x32xf32>
    %c0_33 = arith.constant 0 : index
    %c0_34 = arith.constant 0 : index
    %c0_35 = arith.constant 0 : index
    %69 = vector.load %arg15[%c0_33, %c0_34, %c0_35] : memref<2x32x64xf32, #tpu.memory_space<vmem>>, vector<1x32x64xf32>
    %70 = vector.shape_cast %69 : vector<1x32x64xf32> to vector<32x64xf32>
    %cst_36 = arith.constant dense<0.000000e+00> : vector<16x64xf32>
    %71 = tpu.matmul %68, %70, %cst_36 {dimension_numbers = #tpu.dot_dimension_numbers<[1], [0], [0], [1], [0, 0, 1, 1], [], []>} : vector<16x32xf32>, vector<32x64xf32>, vector<16x64xf32> -> vector<16x64xf32>
    %c0_37 = arith.constant 0 : index
    %c0_38 = arith.constant 0 : index
    %c0_39 = arith.constant 0 : index
    %72 = vector.load %arg16[%c0_37, %c0_38, %c0_39] : memref<2x32x64xf32, #tpu.memory_space<vmem>>, vector<1x32x64xf32>
    %73 = vector.shape_cast %72 : vector<1x32x64xf32> to vector<32x64xf32>
    %cst_40 = arith.constant dense<0.000000e+00> : vector<16x64xf32>
    %74 = tpu.matmul %68, %73, %cst_40 {dimension_numbers = #tpu.dot_dimension_numbers<[1], [0], [0], [1], [0, 0, 1, 1], [], []>} : vector<16x32xf32>, vector<32x64xf32>, vector<16x64xf32> -> vector<16x64xf32>
    %c0_41 = arith.constant 0 : index
    %c0_42 = arith.constant 0 : index
    %75 = vector.load %arg7[%c0_41, %c0_42] : memref<64x16xf32, #tpu.memory_space<vmem>>, vector<64x16xf32>
    %cst_43 = arith.constant dense<0.000000e+00> : vector<64x64xf32>
    %76 = tpu.matmul %75, %71, %cst_43 {dimension_numbers = #tpu.dot_dimension_numbers<[1], [0], [0], [1], [0, 0, 1, 1], [], []>} : vector<64x16xf32>, vector<16x64xf32>, vector<64x64xf32> -> vector<64x64xf32>
    %cst_44 = arith.constant 0.000000e+00 : f32
    %77 = vector.broadcast %cst_44 : f32 to vector<16x64xf32>
    %c0_45 = arith.constant 0 : index
    %c0_46 = arith.constant 0 : index
    %c0_47 = arith.constant 0 : index
    %78 = vector.load %arg18[%c0_45, %c0_46, %c0_47] : memref<2x1x64xf32, #tpu.memory_space<vmem>>, vector<1x1x64xf32>
    %79 = vector.shape_cast %78 : vector<1x1x64xf32> to vector<1x64xf32>
    %80 = vector.broadcast %79 : vector<1x64xf32> to vector<16x64xf32>
    %81 = arith.addf %77, %80 : vector<16x64xf32>
    %c0_48 = arith.constant 0 : index
    %c0_49 = arith.constant 0 : index
    %c0_50 = arith.constant 0 : index
    %82 = vector.load %arg17[%c0_48, %c0_49, %c0_50] : memref<8x1x64xf32, #tpu.memory_space<vmem>>, vector<1x1x64xf32>
    %83 = vector.shape_cast %82 : vector<1x1x64xf32> to vector<1x64xf32>
    %84 = vector.extract_strided_slice %76 {offsets = [0, 0], sizes = [16, 64], strides = [1, 1]} : vector<64x64xf32> to vector<16x64xf32>
    %85 = vector.broadcast %83 : vector<1x64xf32> to vector<16x64xf32>
    %86 = arith.mulf %85, %84 : vector<16x64xf32>
    %87 = arith.addf %81, %86 : vector<16x64xf32>
    %c1 = arith.constant 1 : index
    %c0_51 = arith.constant 0 : index
    %c0_52 = arith.constant 0 : index
    %88 = vector.load %arg17[%c1, %c0_51, %c0_52] : memref<8x1x64xf32, #tpu.memory_space<vmem>>, vector<1x1x64xf32>
    %89 = vector.shape_cast %88 : vector<1x1x64xf32> to vector<1x64xf32>
    %90 = vector.extract_strided_slice %76 {offsets = [16, 0], sizes = [16, 64], strides = [1, 1]} : vector<64x64xf32> to vector<16x64xf32>
    %91 = vector.broadcast %89 : vector<1x64xf32> to vector<16x64xf32>
    %92 = arith.mulf %91, %90 : vector<16x64xf32>
    %93 = arith.addf %87, %92 : vector<16x64xf32>
    %c2 = arith.constant 2 : index
    %c0_53 = arith.constant 0 : index
    %c0_54 = arith.constant 0 : index
    %94 = vector.load %arg17[%c2, %c0_53, %c0_54] : memref<8x1x64xf32, #tpu.memory_space<vmem>>, vector<1x1x64xf32>
    %95 = vector.shape_cast %94 : vector<1x1x64xf32> to vector<1x64xf32>
    %96 = vector.extract_strided_slice %76 {offsets = [32, 0], sizes = [16, 64], strides = [1, 1]} : vector<64x64xf32> to vector<16x64xf32>
    %97 = vector.broadcast %95 : vector<1x64xf32> to vector<16x64xf32>
    %98 = arith.mulf %97, %96 : vector<16x64xf32>
    %99 = arith.addf %93, %98 : vector<16x64xf32>
    %c3 = arith.constant 3 : index
    %c0_55 = arith.constant 0 : index
    %c0_56 = arith.constant 0 : index
    %100 = vector.load %arg17[%c3, %c0_55, %c0_56] : memref<8x1x64xf32, #tpu.memory_space<vmem>>, vector<1x1x64xf32>
    %101 = vector.shape_cast %100 : vector<1x1x64xf32> to vector<1x64xf32>
    %102 = vector.extract_strided_slice %76 {offsets = [48, 0], sizes = [16, 64], strides = [1, 1]} : vector<64x64xf32> to vector<16x64xf32>
    %103 = vector.broadcast %101 : vector<1x64xf32> to vector<16x64xf32>
    %104 = arith.mulf %103, %102 : vector<16x64xf32>
    %105 = arith.addf %99, %104 : vector<16x64xf32>
    %106 = math.absf %105 : vector<16x64xf32>
    %cst_57 = arith.constant 0.000000e+00 : f32
    %107 = vector.broadcast %cst_57 : f32 to vector<16x64xf32>
    %108 = arith.subf %107, %106 : vector<16x64xf32>
    %109 = math.exp %108 : vector<16x64xf32>
    %cst_58 = arith.constant 1.000000e+00 : f32
    %110 = vector.broadcast %cst_58 : f32 to vector<16x64xf32>
    %111 = arith.addf %110, %109 : vector<16x64xf32>
    %cst_59 = arith.constant 1.000000e+00 : f32
    %112 = vector.broadcast %cst_59 : f32 to vector<16x64xf32>
    %113 = arith.divf %112, %111 : vector<16x64xf32>
    %cst_60 = arith.constant 0.000000e+00 : f32
    %114 = vector.broadcast %cst_60 : f32 to vector<16x64xf32>
    %115 = arith.cmpf oge, %105, %114 : vector<16x64xf32>
    %cst_61 = arith.constant 1.000000e+00 : f32
    %116 = vector.broadcast %cst_61 : f32 to vector<16x64xf32>
    %117 = arith.subf %116, %113 : vector<16x64xf32>
    %118 = arith.select %115, %113, %117 : vector<16x64xi1>, vector<16x64xf32>
    %119 = arith.mulf %105, %118 : vector<16x64xf32>
    %c0_62 = arith.constant 0 : index
    %c0_63 = arith.constant 0 : index
    %c0_64 = arith.constant 0 : index
    %120 = vector.load %arg19[%c0_62, %c0_63, %c0_64] : memref<2x64x64xf32, #tpu.memory_space<vmem>>, vector<1x64x64xf32>
    %121 = vector.shape_cast %120 : vector<1x64x64xf32> to vector<64x64xf32>
    %cst_65 = arith.constant dense<0.000000e+00> : vector<16x64xf32>
    %122 = tpu.matmul %119, %121, %cst_65 {dimension_numbers = #tpu.dot_dimension_numbers<[1], [0], [0], [1], [0, 0, 1, 1], [], []>} : vector<16x64xf32>, vector<64x64xf32>, vector<16x64xf32> -> vector<16x64xf32>
    %c0_66 = arith.constant 0 : index
    %c0_67 = arith.constant 0 : index
    %c0_68 = arith.constant 0 : index
    %123 = vector.load %arg20[%c0_66, %c0_67, %c0_68] : memref<2x1x64xf32, #tpu.memory_space<vmem>>, vector<1x1x64xf32>
    %124 = vector.shape_cast %123 : vector<1x1x64xf32> to vector<1x64xf32>
    %125 = vector.broadcast %124 : vector<1x64xf32> to vector<16x64xf32>
    %126 = arith.addf %122, %125 : vector<16x64xf32>
    %cst_69 = arith.constant 0.000000e+00 : f32
    %127 = vector.broadcast %cst_69 : f32 to vector<16x64xf32>
    %128 = arith.maximumf %126, %127 : vector<16x64xf32>
    %129 = math.absf %126 : vector<16x64xf32>
    %cst_70 = arith.constant 0.000000e+00 : f32
    %130 = vector.broadcast %cst_70 : f32 to vector<16x64xf32>
    %131 = arith.subf %130, %129 : vector<16x64xf32>
    %132 = math.exp %131 : vector<16x64xf32>
    %cst_71 = arith.constant 1.000000e+00 : f32
    %133 = vector.broadcast %cst_71 : f32 to vector<16x64xf32>
    %134 = arith.addf %133, %132 : vector<16x64xf32>
    %135 = math.log %134 : vector<16x64xf32>
    %136 = arith.addf %128, %135 : vector<16x64xf32>
    %c0_72 = arith.constant 0 : index
    %c0_73 = arith.constant 0 : index
    %c0_74 = arith.constant 0 : index
    %137 = vector.load %arg21[%c0_72, %c0_73, %c0_74] : memref<2x64x16xf32, #tpu.memory_space<vmem>>, vector<1x64x16xf32>
    %138 = vector.shape_cast %137 : vector<1x64x16xf32> to vector<64x16xf32>
    %cst_75 = arith.constant dense<0.000000e+00> : vector<16x16xf32>
    %139 = tpu.matmul %119, %138, %cst_75 {dimension_numbers = #tpu.dot_dimension_numbers<[1], [0], [0], [1], [0, 0, 1, 1], [], []>} : vector<16x64xf32>, vector<64x16xf32>, vector<16x16xf32> -> vector<16x16xf32>
    %c0_76 = arith.constant 0 : index
    %c0_77 = arith.constant 0 : index
    %c0_78 = arith.constant 0 : index
    %140 = vector.load %arg22[%c0_76, %c0_77, %c0_78] : memref<2x64x16xf32, #tpu.memory_space<vmem>>, vector<1x64x16xf32>
    %141 = vector.shape_cast %140 : vector<1x64x16xf32> to vector<64x16xf32>
    %cst_79 = arith.constant dense<0.000000e+00> : vector<16x16xf32>
    %142 = tpu.matmul %119, %141, %cst_79 {dimension_numbers = #tpu.dot_dimension_numbers<[1], [0], [0], [1], [0, 0, 1, 1], [], []>} : vector<16x64xf32>, vector<64x16xf32>, vector<16x16xf32> -> vector<16x16xf32>
    %c0_80 = arith.constant 0 : index
    %c0_81 = arith.constant 0 : index
    %143 = vector.load %arg8[%c0_80, %c0_81] : memref<256x16xf32, #tpu.memory_space<vmem>>, vector<256x16xf32>
    %cst_82 = arith.constant dense<0.000000e+00> : vector<256x64xf32>
    %144 = tpu.matmul %143, %136, %cst_82 {dimension_numbers = #tpu.dot_dimension_numbers<[1], [0], [0], [1], [0, 0, 1, 1], [], []>} : vector<256x16xf32>, vector<16x64xf32>, vector<256x64xf32> -> vector<256x64xf32>
    %145 = arith.mulf %136, %119 : vector<16x64xf32>
    %cst_83 = arith.constant dense<0.000000e+00> : vector<256x64xf32>
    %146 = tpu.matmul %143, %145, %cst_83 {dimension_numbers = #tpu.dot_dimension_numbers<[1], [0], [0], [1], [0, 0, 1, 1], [], []>} : vector<256x16xf32>, vector<16x64xf32>, vector<256x64xf32> -> vector<256x64xf32>
    %cst_84 = arith.constant dense<0.000000e+00> : vector<256x16xf32>
    %147 = tpu.matmul %143, %139, %cst_84 {dimension_numbers = #tpu.dot_dimension_numbers<[1], [0], [0], [1], [0, 0, 1, 1], [], []>} : vector<256x16xf32>, vector<16x16xf32>, vector<256x16xf32> -> vector<256x16xf32>
    %c0_85 = arith.constant 0 : index
    %c0_86 = arith.constant 0 : index
    %148 = vector.load %arg10[%c0_85, %c0_86] : memref<256x16xf32, #tpu.memory_space<vmem>>, vector<256x16xf32>
    %149 = arith.mulf %147, %148 : vector<256x16xf32>
    %cst_87 = arith.constant dense<0.000000e+00> : vector<256xf32>
    %150 = vector.multi_reduction <add>, %149, %cst_87 [1] : vector<256x16xf32> to vector<256xf32>
    %151 = vector.shape_cast %150 : vector<256xf32> to vector<256x1xf32>
    %c0_88 = arith.constant 0 : index
    %c0_89 = arith.constant 0 : index
    %c0_90 = arith.constant 0 : index
    %152 = vector.load %arg23[%c0_88, %c0_89, %c0_90] : memref<2x256x64xf32, #tpu.memory_space<vmem>>, vector<1x256x64xf32>
    %153 = vector.shape_cast %152 : vector<1x256x64xf32> to vector<256x64xf32>
    %154 = arith.mulf %144, %153 : vector<256x64xf32>
    %155 = math.exp %154 : vector<256x64xf32>
    %c0_91 = arith.constant 0 : index
    %c0_92 = arith.constant 0 : index
    %156 = vector.load %arg31[%c0_91, %c0_92] : memref<256x64xf32, #tpu.memory_space<vmem>>, vector<256x64xf32>
    tpu.vector_store %arg31[%c0_91, %c0_92], %155 {strides = array<i32>} : memref<256x64xf32, #tpu.memory_space<vmem>>, vector<256x64xf32>,
    %157 = vector.broadcast %151 : vector<256x1xf32> to vector<256x64xf32>
    %158 = arith.mulf %157, %146 : vector<256x64xf32>
    %c0_93 = arith.constant 0 : index
    %c0_94 = arith.constant 0 : index
    %159 = vector.load %arg32[%c0_93, %c0_94] : memref<256x64xf32, #tpu.memory_space<vmem>>, vector<256x64xf32>
    tpu.vector_store %arg32[%c0_93, %c0_94], %158 {strides = array<i32>} : memref<256x64xf32, #tpu.memory_space<vmem>>, vector<256x64xf32>,
    %cst_95 = arith.constant 0.000000e+00 : f32
    %160 = vector.broadcast %cst_95 : f32 to vector<32x64xf32>
    %c0_96 = arith.constant 0 : index
    %c0_97 = arith.constant 0 : index
    %161 = vector.load %arg31[%c0_96, %c0_97] : memref<256x64xf32, #tpu.memory_space<vmem>>, vector<32x64xf32>
    %162 = arith.mulf %161, %160 : vector<32x64xf32>
    %c0_98 = arith.constant 0 : index
    %c0_99 = arith.constant 0 : index
    %163 = vector.load %arg32[%c0_98, %c0_99] : memref<256x64xf32, #tpu.memory_space<vmem>>, vector<32x64xf32>
    %164 = arith.addf %162, %163 : vector<32x64xf32>
    %c0_100 = arith.constant 0 : index
    %c0_101 = arith.constant 0 : index
    %165 = vector.load %arg33[%c0_100, %c0_101] : memref<256x64xf32, #tpu.memory_space<vmem>>, vector<32x64xf32>
    tpu.vector_store %arg33[%c0_100, %c0_101], %164 {strides = array<i32>} : memref<256x64xf32, #tpu.memory_space<vmem>>, vector<32x64xf32>,
    %c32 = arith.constant 32 : index
    %c0_102 = arith.constant 0 : index
    %166 = vector.load %arg31[%c32, %c0_102] : memref<256x64xf32, #tpu.memory_space<vmem>>, vector<32x64xf32>
    %167 = arith.mulf %166, %164 : vector<32x64xf32>
    %c32_103 = arith.constant 32 : index
    %c0_104 = arith.constant 0 : index
    %168 = vector.load %arg32[%c32_103, %c0_104] : memref<256x64xf32, #tpu.memory_space<vmem>>, vector<32x64xf32>
    %169 = arith.addf %167, %168 : vector<32x64xf32>
    %c32_105 = arith.constant 32 : index
    %c0_106 = arith.constant 0 : index
    %170 = vector.load %arg33[%c32_105, %c0_106] : memref<256x64xf32, #tpu.memory_space<vmem>>, vector<32x64xf32>
    tpu.vector_store %arg33[%c32_105, %c0_106], %169 {strides = array<i32>} : memref<256x64xf32, #tpu.memory_space<vmem>>, vector<32x64xf32>,
    %c64 = arith.constant 64 : index
    %c0_107 = arith.constant 0 : index
    %171 = vector.load %arg31[%c64, %c0_107] : memref<256x64xf32, #tpu.memory_space<vmem>>, vector<32x64xf32>
    %172 = arith.mulf %171, %169 : vector<32x64xf32>
    %c64_108 = arith.constant 64 : index
    %c0_109 = arith.constant 0 : index
    %173 = vector.load %arg32[%c64_108, %c0_109] : memref<256x64xf32, #tpu.memory_space<vmem>>, vector<32x64xf32>
    %174 = arith.addf %172, %173 : vector<32x64xf32>
    %c64_110 = arith.constant 64 : index
    %c0_111 = arith.constant 0 : index
    %175 = vector.load %arg33[%c64_110, %c0_111] : memref<256x64xf32, #tpu.memory_space<vmem>>, vector<32x64xf32>
    tpu.vector_store %arg33[%c64_110, %c0_111], %174 {strides = array<i32>} : memref<256x64xf32, #tpu.memory_space<vmem>>, vector<32x64xf32>,
    %c96 = arith.constant 96 : index
    %c0_112 = arith.constant 0 : index
    %176 = vector.load %arg31[%c96, %c0_112] : memref<256x64xf32, #tpu.memory_space<vmem>>, vector<32x64xf32>
    %177 = arith.mulf %176, %174 : vector<32x64xf32>
    %c96_113 = arith.constant 96 : index
    %c0_114 = arith.constant 0 : index
    %178 = vector.load %arg32[%c96_113, %c0_114] : memref<256x64xf32, #tpu.memory_space<vmem>>, vector<32x64xf32>
    %179 = arith.addf %177, %178 : vector<32x64xf32>
    %c96_115 = arith.constant 96 : index
    %c0_116 = arith.constant 0 : index
    %180 = vector.load %arg33[%c96_115, %c0_116] : memref<256x64xf32, #tpu.memory_space<vmem>>, vector<32x64xf32>
    tpu.vector_store %arg33[%c96_115, %c0_116], %179 {strides = array<i32>} : memref<256x64xf32, #tpu.memory_space<vmem>>, vector<32x64xf32>,
    %c128 = arith.constant 128 : index
    %c0_117 = arith.constant 0 : index
    %181 = vector.load %arg31[%c128, %c0_117] : memref<256x64xf32, #tpu.memory_space<vmem>>, vector<32x64xf32>
    %182 = arith.mulf %181, %179 : vector<32x64xf32>
    %c128_118 = arith.constant 128 : index
    %c0_119 = arith.constant 0 : index
    %183 = vector.load %arg32[%c128_118, %c0_119] : memref<256x64xf32, #tpu.memory_space<vmem>>, vector<32x64xf32>
    %184 = arith.addf %182, %183 : vector<32x64xf32>
    %c128_120 = arith.constant 128 : index
    %c0_121 = arith.constant 0 : index
    %185 = vector.load %arg33[%c128_120, %c0_121] : memref<256x64xf32, #tpu.memory_space<vmem>>, vector<32x64xf32>
    tpu.vector_store %arg33[%c128_120, %c0_121], %184 {strides = array<i32>} : memref<256x64xf32, #tpu.memory_space<vmem>>, vector<32x64xf32>,
    %c160 = arith.constant 160 : index
    %c0_122 = arith.constant 0 : index
    %186 = vector.load %arg31[%c160, %c0_122] : memref<256x64xf32, #tpu.memory_space<vmem>>, vector<32x64xf32>
    %187 = arith.mulf %186, %184 : vector<32x64xf32>
    %c160_123 = arith.constant 160 : index
    %c0_124 = arith.constant 0 : index
    %188 = vector.load %arg32[%c160_123, %c0_124] : memref<256x64xf32, #tpu.memory_space<vmem>>, vector<32x64xf32>
    %189 = arith.addf %187, %188 : vector<32x64xf32>
    %c160_125 = arith.constant 160 : index
    %c0_126 = arith.constant 0 : index
    %190 = vector.load %arg33[%c160_125, %c0_126] : memref<256x64xf32, #tpu.memory_space<vmem>>, vector<32x64xf32>
    tpu.vector_store %arg33[%c160_125, %c0_126], %189 {strides = array<i32>} : memref<256x64xf32, #tpu.memory_space<vmem>>, vector<32x64xf32>,
    %c192 = arith.constant 192 : index
    %c0_127 = arith.constant 0 : index
    %191 = vector.load %arg31[%c192, %c0_127] : memref<256x64xf32, #tpu.memory_space<vmem>>, vector<32x64xf32>
    %192 = arith.mulf %191, %189 : vector<32x64xf32>
    %c192_128 = arith.constant 192 : index
    %c0_129 = arith.constant 0 : index
    %193 = vector.load %arg32[%c192_128, %c0_129] : memref<256x64xf32, #tpu.memory_space<vmem>>, vector<32x64xf32>
    %194 = arith.addf %192, %193 : vector<32x64xf32>
    %c192_130 = arith.constant 192 : index
    %c0_131 = arith.constant 0 : index
    %195 = vector.load %arg33[%c192_130, %c0_131] : memref<256x64xf32, #tpu.memory_space<vmem>>, vector<32x64xf32>
    tpu.vector_store %arg33[%c192_130, %c0_131], %194 {strides = array<i32>} : memref<256x64xf32, #tpu.memory_space<vmem>>, vector<32x64xf32>,
    %c224 = arith.constant 224 : index
    %c0_132 = arith.constant 0 : index
    %196 = vector.load %arg31[%c224, %c0_132] : memref<256x64xf32, #tpu.memory_space<vmem>>, vector<32x64xf32>
    %197 = arith.mulf %196, %194 : vector<32x64xf32>
    %c224_133 = arith.constant 224 : index
    %c0_134 = arith.constant 0 : index
    %198 = vector.load %arg32[%c224_133, %c0_134] : memref<256x64xf32, #tpu.memory_space<vmem>>, vector<32x64xf32>
    %199 = arith.addf %197, %198 : vector<32x64xf32>
    %c224_135 = arith.constant 224 : index
    %c0_136 = arith.constant 0 : index
    %200 = vector.load %arg33[%c224_135, %c0_136] : memref<256x64xf32, #tpu.memory_space<vmem>>, vector<32x64xf32>
    tpu.vector_store %arg33[%c224_135, %c0_136], %199 {strides = array<i32>} : memref<256x64xf32, #tpu.memory_space<vmem>>, vector<32x64xf32>,
    %c0_137 = arith.constant 0 : index
    %c0_138 = arith.constant 0 : index
    %201 = vector.load %arg11[%c0_137, %c0_138] : memref<16x256xf32, #tpu.memory_space<vmem>>, vector<16x256xf32>
    %cst_139 = arith.constant dense<0.000000e+00> : vector<16x256xf32>
    %202 = tpu.matmul %142, %201, %cst_139 {dimension_numbers = #tpu.dot_dimension_numbers<[1], [0], [0], [1], [0, 0, 1, 1], [], []>} : vector<16x16xf32>, vector<16x256xf32>, vector<16x256xf32> -> vector<16x256xf32>
    %c0_140 = arith.constant 0 : index
    %c0_141 = arith.constant 0 : index
    %203 = vector.load %arg9[%c0_140, %c0_141] : memref<16x256xf32, #tpu.memory_space<vmem>>, vector<16x256xf32>
    %204 = arith.mulf %202, %203 : vector<16x256xf32>
    %c0_142 = arith.constant 0 : index
    %c0_143 = arith.constant 0 : index
    %205 = vector.load %arg33[%c0_142, %c0_143] : memref<256x64xf32, #tpu.memory_space<vmem>>, vector<256x64xf32>
    %cst_144 = arith.constant dense<0.000000e+00> : vector<16x64xf32>
    %206 = tpu.matmul %204, %205, %cst_144 {dimension_numbers = #tpu.dot_dimension_numbers<[1], [0], [0], [1], [0, 0, 1, 1], [], []>} : vector<16x256xf32>, vector<256x64xf32>, vector<16x64xf32> -> vector<16x64xf32>
    %c0_145 = arith.constant 0 : index
    %c0_146 = arith.constant 0 : index
    %c0_147 = arith.constant 0 : index
    %207 = vector.load %arg24[%c0_145, %c0_146, %c0_147] : memref<2x1x64xf32, #tpu.memory_space<vmem>>, vector<1x1x64xf32>
    %208 = vector.shape_cast %207 : vector<1x1x64xf32> to vector<1x64xf32>
    %209 = vector.broadcast %208 : vector<1x64xf32> to vector<16x64xf32>
    %210 = arith.mulf %209, %119 : vector<16x64xf32>
    %211 = arith.addf %206, %210 : vector<16x64xf32>
    %212 = math.absf %74 : vector<16x64xf32>
    %cst_148 = arith.constant 0.000000e+00 : f32
    %213 = vector.broadcast %cst_148 : f32 to vector<16x64xf32>
    %214 = arith.subf %213, %212 : vector<16x64xf32>
    %215 = math.exp %214 : vector<16x64xf32>
    %cst_149 = arith.constant 1.000000e+00 : f32
    %216 = vector.broadcast %cst_149 : f32 to vector<16x64xf32>
    %217 = arith.addf %216, %215 : vector<16x64xf32>
    %cst_150 = arith.constant 1.000000e+00 : f32
    %218 = vector.broadcast %cst_150 : f32 to vector<16x64xf32>
    %219 = arith.divf %218, %217 : vector<16x64xf32>
    %cst_151 = arith.constant 0.000000e+00 : f32
    %220 = vector.broadcast %cst_151 : f32 to vector<16x64xf32>
    %221 = arith.cmpf oge, %74, %220 : vector<16x64xf32>
    %cst_152 = arith.constant 1.000000e+00 : f32
    %222 = vector.broadcast %cst_152 : f32 to vector<16x64xf32>
    %223 = arith.subf %222, %219 : vector<16x64xf32>
    %224 = arith.select %221, %219, %223 : vector<16x64xi1>, vector<16x64xf32>
    %225 = arith.mulf %74, %224 : vector<16x64xf32>
    %226 = arith.mulf %211, %225 : vector<16x64xf32>
    %c0_153 = arith.constant 0 : index
    %c0_154 = arith.constant 0 : index
    %c0_155 = arith.constant 0 : index
    %227 = vector.load %arg25[%c0_153, %c0_154, %c0_155] : memref<2x64x32xf32, #tpu.memory_space<vmem>>, vector<1x64x32xf32>
    %228 = vector.shape_cast %227 : vector<1x64x32xf32> to vector<64x32xf32>
    %cst_156 = arith.constant dense<0.000000e+00> : vector<16x32xf32>
    %229 = tpu.matmul %226, %228, %cst_156 {dimension_numbers = #tpu.dot_dimension_numbers<[1], [0], [0], [1], [0, 0, 1, 1], [], []>} : vector<16x64xf32>, vector<64x32xf32>, vector<16x32xf32> -> vector<16x32xf32>
    %cst_157 = arith.constant dense<0.000000e+00> : vector<16xf32>
    %230 = vector.multi_reduction <add>, %229, %cst_157 [1] : vector<16x32xf32> to vector<16xf32>
    %231 = vector.shape_cast %230 : vector<16xf32> to vector<16x1xf32>
    %cst_158 = arith.constant 3.200000e+01 : f32
    %232 = vector.broadcast %cst_158 : f32 to vector<16x1xf32>
    %233 = arith.divf %231, %232 : vector<16x1xf32>
    %234 = vector.broadcast %233 : vector<16x1xf32> to vector<16x32xf32>
    %235 = arith.subf %229, %234 : vector<16x32xf32>
    %236 = arith.mulf %235, %235 : vector<16x32xf32>
    %cst_159 = arith.constant dense<0.000000e+00> : vector<16xf32>
    %237 = vector.multi_reduction <add>, %236, %cst_159 [1] : vector<16x32xf32> to vector<16xf32>
    %238 = vector.shape_cast %237 : vector<16xf32> to vector<16x1xf32>
    %cst_160 = arith.constant 3.200000e+01 : f32
    %239 = vector.broadcast %cst_160 : f32 to vector<16x1xf32>
    %240 = arith.divf %238, %239 : vector<16x1xf32>
    %241 = vector.broadcast %233 : vector<16x1xf32> to vector<16x32xf32>
    %242 = arith.subf %229, %241 : vector<16x32xf32>
    %cst_161 = arith.constant 9.99999974E-6 : f32
    %243 = vector.broadcast %cst_161 : f32 to vector<16x1xf32>
    %244 = arith.addf %240, %243 : vector<16x1xf32>
    %245 = math.rsqrt %244 : vector<16x1xf32>
    %246 = vector.broadcast %245 : vector<16x1xf32> to vector<16x32xf32>
    %247 = arith.mulf %242, %246 : vector<16x32xf32>
    %c1_162 = arith.constant 1 : index
    %c0_163 = arith.constant 0 : index
    %c0_164 = arith.constant 0 : index
    %248 = vector.load %arg13[%c1_162, %c0_163, %c0_164] : memref<2x1x32xf32, #tpu.memory_space<vmem>>, vector<1x1x32xf32>
    %249 = vector.shape_cast %248 : vector<1x1x32xf32> to vector<1x32xf32>
    %250 = vector.broadcast %249 : vector<1x32xf32> to vector<16x32xf32>
    %251 = arith.mulf %247, %250 : vector<16x32xf32>
    %c1_165 = arith.constant 1 : index
    %c0_166 = arith.constant 0 : index
    %c0_167 = arith.constant 0 : index
    %252 = vector.load %arg14[%c1_165, %c0_166, %c0_167] : memref<2x1x32xf32, #tpu.memory_space<vmem>>, vector<1x1x32xf32>
    %253 = vector.shape_cast %252 : vector<1x1x32xf32> to vector<1x32xf32>
    %254 = vector.broadcast %253 : vector<1x32xf32> to vector<16x32xf32>
    %255 = arith.addf %251, %254 : vector<16x32xf32>
    %c1_168 = arith.constant 1 : index
    %c0_169 = arith.constant 0 : index
    %c0_170 = arith.constant 0 : index
    %256 = vector.load %arg15[%c1_168, %c0_169, %c0_170] : memref<2x32x64xf32, #tpu.memory_space<vmem>>, vector<1x32x64xf32>
    %257 = vector.shape_cast %256 : vector<1x32x64xf32> to vector<32x64xf32>
    %cst_171 = arith.constant dense<0.000000e+00> : vector<16x64xf32>
    %258 = tpu.matmul %255, %257, %cst_171 {dimension_numbers = #tpu.dot_dimension_numbers<[1], [0], [0], [1], [0, 0, 1, 1], [], []>} : vector<16x32xf32>, vector<32x64xf32>, vector<16x64xf32> -> vector<16x64xf32>
    %c1_172 = arith.constant 1 : index
    %c0_173 = arith.constant 0 : index
    %c0_174 = arith.constant 0 : index
    %259 = vector.load %arg16[%c1_172, %c0_173, %c0_174] : memref<2x32x64xf32, #tpu.memory_space<vmem>>, vector<1x32x64xf32>
    %260 = vector.shape_cast %259 : vector<1x32x64xf32> to vector<32x64xf32>
    %cst_175 = arith.constant dense<0.000000e+00> : vector<16x64xf32>
    %261 = tpu.matmul %255, %260, %cst_175 {dimension_numbers = #tpu.dot_dimension_numbers<[1], [0], [0], [1], [0, 0, 1, 1], [], []>} : vector<16x32xf32>, vector<32x64xf32>, vector<16x64xf32> -> vector<16x64xf32>
    %c0_176 = arith.constant 0 : index
    %c0_177 = arith.constant 0 : index
    %262 = vector.load %arg7[%c0_176, %c0_177] : memref<64x16xf32, #tpu.memory_space<vmem>>, vector<64x16xf32>
    %cst_178 = arith.constant dense<0.000000e+00> : vector<64x64xf32>
    %263 = tpu.matmul %262, %258, %cst_178 {dimension_numbers = #tpu.dot_dimension_numbers<[1], [0], [0], [1], [0, 0, 1, 1], [], []>} : vector<64x16xf32>, vector<16x64xf32>, vector<64x64xf32> -> vector<64x64xf32>
    %cst_179 = arith.constant 0.000000e+00 : f32
    %264 = vector.broadcast %cst_179 : f32 to vector<16x64xf32>
    %c1_180 = arith.constant 1 : index
    %c0_181 = arith.constant 0 : index
    %c0_182 = arith.constant 0 : index
    %265 = vector.load %arg18[%c1_180, %c0_181, %c0_182] : memref<2x1x64xf32, #tpu.memory_space<vmem>>, vector<1x1x64xf32>
    %266 = vector.shape_cast %265 : vector<1x1x64xf32> to vector<1x64xf32>
    %267 = vector.broadcast %266 : vector<1x64xf32> to vector<16x64xf32>
    %268 = arith.addf %264, %267 : vector<16x64xf32>
    %c4 = arith.constant 4 : index
    %c0_183 = arith.constant 0 : index
    %c0_184 = arith.constant 0 : index
    %269 = vector.load %arg17[%c4, %c0_183, %c0_184] : memref<8x1x64xf32, #tpu.memory_space<vmem>>, vector<1x1x64xf32>
    %270 = vector.shape_cast %269 : vector<1x1x64xf32> to vector<1x64xf32>
    %271 = vector.extract_strided_slice %263 {offsets = [0, 0], sizes = [16, 64], strides = [1, 1]} : vector<64x64xf32> to vector<16x64xf32>
    %272 = vector.broadcast %270 : vector<1x64xf32> to vector<16x64xf32>
    %273 = arith.mulf %272, %271 : vector<16x64xf32>
    %274 = arith.addf %268, %273 : vector<16x64xf32>
    %c5 = arith.constant 5 : index
    %c0_185 = arith.constant 0 : index
    %c0_186 = arith.constant 0 : index
    %275 = vector.load %arg17[%c5, %c0_185, %c0_186] : memref<8x1x64xf32, #tpu.memory_space<vmem>>, vector<1x1x64xf32>
    %276 = vector.shape_cast %275 : vector<1x1x64xf32> to vector<1x64xf32>
    %277 = vector.extract_strided_slice %263 {offsets = [16, 0], sizes = [16, 64], strides = [1, 1]} : vector<64x64xf32> to vector<16x64xf32>
    %278 = vector.broadcast %276 : vector<1x64xf32> to vector<16x64xf32>
    %279 = arith.mulf %278, %277 : vector<16x64xf32>
    %280 = arith.addf %274, %279 : vector<16x64xf32>
    %c6 = arith.constant 6 : index
    %c0_187 = arith.constant 0 : index
    %c0_188 = arith.constant 0 : index
    %281 = vector.load %arg17[%c6, %c0_187, %c0_188] : memref<8x1x64xf32, #tpu.memory_space<vmem>>, vector<1x1x64xf32>
    %282 = vector.shape_cast %281 : vector<1x1x64xf32> to vector<1x64xf32>
    %283 = vector.extract_strided_slice %263 {offsets = [32, 0], sizes = [16, 64], strides = [1, 1]} : vector<64x64xf32> to vector<16x64xf32>
    %284 = vector.broadcast %282 : vector<1x64xf32> to vector<16x64xf32>
    %285 = arith.mulf %284, %283 : vector<16x64xf32>
    %286 = arith.addf %280, %285 : vector<16x64xf32>
    %c7 = arith.constant 7 : index
    %c0_189 = arith.constant 0 : index
    %c0_190 = arith.constant 0 : index
    %287 = vector.load %arg17[%c7, %c0_189, %c0_190] : memref<8x1x64xf32, #tpu.memory_space<vmem>>, vector<1x1x64xf32>
    %288 = vector.shape_cast %287 : vector<1x1x64xf32> to vector<1x64xf32>
    %289 = vector.extract_strided_slice %263 {offsets = [48, 0], sizes = [16, 64], strides = [1, 1]} : vector<64x64xf32> to vector<16x64xf32>
    %290 = vector.broadcast %288 : vector<1x64xf32> to vector<16x64xf32>
    %291 = arith.mulf %290, %289 : vector<16x64xf32>
    %292 = arith.addf %286, %291 : vector<16x64xf32>
    %293 = math.absf %292 : vector<16x64xf32>
    %cst_191 = arith.constant 0.000000e+00 : f32
    %294 = vector.broadcast %cst_191 : f32 to vector<16x64xf32>
    %295 = arith.subf %294, %293 : vector<16x64xf32>
    %296 = math.exp %295 : vector<16x64xf32>
    %cst_192 = arith.constant 1.000000e+00 : f32
    %297 = vector.broadcast %cst_192 : f32 to vector<16x64xf32>
    %298 = arith.addf %297, %296 : vector<16x64xf32>
    %cst_193 = arith.constant 1.000000e+00 : f32
    %299 = vector.broadcast %cst_193 : f32 to vector<16x64xf32>
    %300 = arith.divf %299, %298 : vector<16x64xf32>
    %cst_194 = arith.constant 0.000000e+00 : f32
    %301 = vector.broadcast %cst_194 : f32 to vector<16x64xf32>
    %302 = arith.cmpf oge, %292, %301 : vector<16x64xf32>
    %cst_195 = arith.constant 1.000000e+00 : f32
    %303 = vector.broadcast %cst_195 : f32 to vector<16x64xf32>
    %304 = arith.subf %303, %300 : vector<16x64xf32>
    %305 = arith.select %302, %300, %304 : vector<16x64xi1>, vector<16x64xf32>
    %306 = arith.mulf %292, %305 : vector<16x64xf32>
    %c1_196 = arith.constant 1 : index
    %c0_197 = arith.constant 0 : index
    %c0_198 = arith.constant 0 : index
    %307 = vector.load %arg19[%c1_196, %c0_197, %c0_198] : memref<2x64x64xf32, #tpu.memory_space<vmem>>, vector<1x64x64xf32>
    %308 = vector.shape_cast %307 : vector<1x64x64xf32> to vector<64x64xf32>
    %cst_199 = arith.constant dense<0.000000e+00> : vector<16x64xf32>
    %309 = tpu.matmul %306, %308, %cst_199 {dimension_numbers = #tpu.dot_dimension_numbers<[1], [0], [0], [1], [0, 0, 1, 1], [], []>} : vector<16x64xf32>, vector<64x64xf32>, vector<16x64xf32> -> vector<16x64xf32>
    %c1_200 = arith.constant 1 : index
    %c0_201 = arith.constant 0 : index
    %c0_202 = arith.constant 0 : index
    %310 = vector.load %arg20[%c1_200, %c0_201, %c0_202] : memref<2x1x64xf32, #tpu.memory_space<vmem>>, vector<1x1x64xf32>
    %311 = vector.shape_cast %310 : vector<1x1x64xf32> to vector<1x64xf32>
    %312 = vector.broadcast %311 : vector<1x64xf32> to vector<16x64xf32>
    %313 = arith.addf %309, %312 : vector<16x64xf32>
    %cst_203 = arith.constant 0.000000e+00 : f32
    %314 = vector.broadcast %cst_203 : f32 to vector<16x64xf32>
    %315 = arith.maximumf %313, %314 : vector<16x64xf32>
    %316 = math.absf %313 : vector<16x64xf32>
    %cst_204 = arith.constant 0.000000e+00 : f32
    %317 = vector.broadcast %cst_204 : f32 to vector<16x64xf32>
    %318 = arith.subf %317, %316 : vector<16x64xf32>
    %319 = math.exp %318 : vector<16x64xf32>
    %cst_205 = arith.constant 1.000000e+00 : f32
    %320 = vector.broadcast %cst_205 : f32 to vector<16x64xf32>
    %321 = arith.addf %320, %319 : vector<16x64xf32>
    %322 = math.log %321 : vector<16x64xf32>
    %323 = arith.addf %315, %322 : vector<16x64xf32>
    %c1_206 = arith.constant 1 : index
    %c0_207 = arith.constant 0 : index
    %c0_208 = arith.constant 0 : index
    %324 = vector.load %arg21[%c1_206, %c0_207, %c0_208] : memref<2x64x16xf32, #tpu.memory_space<vmem>>, vector<1x64x16xf32>
    %325 = vector.shape_cast %324 : vector<1x64x16xf32> to vector<64x16xf32>
    %cst_209 = arith.constant dense<0.000000e+00> : vector<16x16xf32>
    %326 = tpu.matmul %306, %325, %cst_209 {dimension_numbers = #tpu.dot_dimension_numbers<[1], [0], [0], [1], [0, 0, 1, 1], [], []>} : vector<16x64xf32>, vector<64x16xf32>, vector<16x16xf32> -> vector<16x16xf32>
    %c1_210 = arith.constant 1 : index
    %c0_211 = arith.constant 0 : index
    %c0_212 = arith.constant 0 : index
    %327 = vector.load %arg22[%c1_210, %c0_211, %c0_212] : memref<2x64x16xf32, #tpu.memory_space<vmem>>, vector<1x64x16xf32>
    %328 = vector.shape_cast %327 : vector<1x64x16xf32> to vector<64x16xf32>
    %cst_213 = arith.constant dense<0.000000e+00> : vector<16x16xf32>
    %329 = tpu.matmul %306, %328, %cst_213 {dimension_numbers = #tpu.dot_dimension_numbers<[1], [0], [0], [1], [0, 0, 1, 1], [], []>} : vector<16x64xf32>, vector<64x16xf32>, vector<16x16xf32> -> vector<16x16xf32>
    %c0_214 = arith.constant 0 : index
    %c0_215 = arith.constant 0 : index
    %330 = vector.load %arg8[%c0_214, %c0_215] : memref<256x16xf32, #tpu.memory_space<vmem>>, vector<256x16xf32>
    %cst_216 = arith.constant dense<0.000000e+00> : vector<256x64xf32>
    %331 = tpu.matmul %330, %323, %cst_216 {dimension_numbers = #tpu.dot_dimension_numbers<[1], [0], [0], [1], [0, 0, 1, 1], [], []>} : vector<256x16xf32>, vector<16x64xf32>, vector<256x64xf32> -> vector<256x64xf32>
    %332 = arith.mulf %323, %306 : vector<16x64xf32>
    %cst_217 = arith.constant dense<0.000000e+00> : vector<256x64xf32>
    %333 = tpu.matmul %330, %332, %cst_217 {dimension_numbers = #tpu.dot_dimension_numbers<[1], [0], [0], [1], [0, 0, 1, 1], [], []>} : vector<256x16xf32>, vector<16x64xf32>, vector<256x64xf32> -> vector<256x64xf32>
    %cst_218 = arith.constant dense<0.000000e+00> : vector<256x16xf32>
    %334 = tpu.matmul %330, %326, %cst_218 {dimension_numbers = #tpu.dot_dimension_numbers<[1], [0], [0], [1], [0, 0, 1, 1], [], []>} : vector<256x16xf32>, vector<16x16xf32>, vector<256x16xf32> -> vector<256x16xf32>
    %c0_219 = arith.constant 0 : index
    %c0_220 = arith.constant 0 : index
    %335 = vector.load %arg10[%c0_219, %c0_220] : memref<256x16xf32, #tpu.memory_space<vmem>>, vector<256x16xf32>
    %336 = arith.mulf %334, %335 : vector<256x16xf32>
    %cst_221 = arith.constant dense<0.000000e+00> : vector<256xf32>
    %337 = vector.multi_reduction <add>, %336, %cst_221 [1] : vector<256x16xf32> to vector<256xf32>
    %338 = vector.shape_cast %337 : vector<256xf32> to vector<256x1xf32>
    %c1_222 = arith.constant 1 : index
    %c0_223 = arith.constant 0 : index
    %c0_224 = arith.constant 0 : index
    %339 = vector.load %arg23[%c1_222, %c0_223, %c0_224] : memref<2x256x64xf32, #tpu.memory_space<vmem>>, vector<1x256x64xf32>
    %340 = vector.shape_cast %339 : vector<1x256x64xf32> to vector<256x64xf32>
    %341 = arith.mulf %331, %340 : vector<256x64xf32>
    %342 = math.exp %341 : vector<256x64xf32>
    %c0_225 = arith.constant 0 : index
    %c0_226 = arith.constant 0 : index
    %343 = vector.load %arg31[%c0_225, %c0_226] : memref<256x64xf32, #tpu.memory_space<vmem>>, vector<256x64xf32>
    tpu.vector_store %arg31[%c0_225, %c0_226], %342 {strides = array<i32>} : memref<256x64xf32, #tpu.memory_space<vmem>>, vector<256x64xf32>,
    %344 = vector.broadcast %338 : vector<256x1xf32> to vector<256x64xf32>
    %345 = arith.mulf %344, %333 : vector<256x64xf32>
    %c0_227 = arith.constant 0 : index
    %c0_228 = arith.constant 0 : index
    %346 = vector.load %arg32[%c0_227, %c0_228] : memref<256x64xf32, #tpu.memory_space<vmem>>, vector<256x64xf32>
    tpu.vector_store %arg32[%c0_227, %c0_228], %345 {strides = array<i32>} : memref<256x64xf32, #tpu.memory_space<vmem>>, vector<256x64xf32>,
    %cst_229 = arith.constant 0.000000e+00 : f32
    %347 = vector.broadcast %cst_229 : f32 to vector<32x64xf32>
    %c0_230 = arith.constant 0 : index
    %c0_231 = arith.constant 0 : index
    %348 = vector.load %arg31[%c0_230, %c0_231] : memref<256x64xf32, #tpu.memory_space<vmem>>, vector<32x64xf32>
    %349 = arith.mulf %348, %347 : vector<32x64xf32>
    %c0_232 = arith.constant 0 : index
    %c0_233 = arith.constant 0 : index
    %350 = vector.load %arg32[%c0_232, %c0_233] : memref<256x64xf32, #tpu.memory_space<vmem>>, vector<32x64xf32>
    %351 = arith.addf %349, %350 : vector<32x64xf32>
    %c0_234 = arith.constant 0 : index
    %c0_235 = arith.constant 0 : index
    %352 = vector.load %arg33[%c0_234, %c0_235] : memref<256x64xf32, #tpu.memory_space<vmem>>, vector<32x64xf32>
    tpu.vector_store %arg33[%c0_234, %c0_235], %351 {strides = array<i32>} : memref<256x64xf32, #tpu.memory_space<vmem>>, vector<32x64xf32>,
    %c32_236 = arith.constant 32 : index
    %c0_237 = arith.constant 0 : index
    %353 = vector.load %arg31[%c32_236, %c0_237] : memref<256x64xf32, #tpu.memory_space<vmem>>, vector<32x64xf32>
    %354 = arith.mulf %353, %351 : vector<32x64xf32>
    %c32_238 = arith.constant 32 : index
    %c0_239 = arith.constant 0 : index
    %355 = vector.load %arg32[%c32_238, %c0_239] : memref<256x64xf32, #tpu.memory_space<vmem>>, vector<32x64xf32>
    %356 = arith.addf %354, %355 : vector<32x64xf32>
    %c32_240 = arith.constant 32 : index
    %c0_241 = arith.constant 0 : index
    %357 = vector.load %arg33[%c32_240, %c0_241] : memref<256x64xf32, #tpu.memory_space<vmem>>, vector<32x64xf32>
    tpu.vector_store %arg33[%c32_240, %c0_241], %356 {strides = array<i32>} : memref<256x64xf32, #tpu.memory_space<vmem>>, vector<32x64xf32>,
    %c64_242 = arith.constant 64 : index
    %c0_243 = arith.constant 0 : index
    %358 = vector.load %arg31[%c64_242, %c0_243] : memref<256x64xf32, #tpu.memory_space<vmem>>, vector<32x64xf32>
    %359 = arith.mulf %358, %356 : vector<32x64xf32>
    %c64_244 = arith.constant 64 : index
    %c0_245 = arith.constant 0 : index
    %360 = vector.load %arg32[%c64_244, %c0_245] : memref<256x64xf32, #tpu.memory_space<vmem>>, vector<32x64xf32>
    %361 = arith.addf %359, %360 : vector<32x64xf32>
    %c64_246 = arith.constant 64 : index
    %c0_247 = arith.constant 0 : index
    %362 = vector.load %arg33[%c64_246, %c0_247] : memref<256x64xf32, #tpu.memory_space<vmem>>, vector<32x64xf32>
    tpu.vector_store %arg33[%c64_246, %c0_247], %361 {strides = array<i32>} : memref<256x64xf32, #tpu.memory_space<vmem>>, vector<32x64xf32>,
    %c96_248 = arith.constant 96 : index
    %c0_249 = arith.constant 0 : index
    %363 = vector.load %arg31[%c96_248, %c0_249] : memref<256x64xf32, #tpu.memory_space<vmem>>, vector<32x64xf32>
    %364 = arith.mulf %363, %361 : vector<32x64xf32>
    %c96_250 = arith.constant 96 : index
    %c0_251 = arith.constant 0 : index
    %365 = vector.load %arg32[%c96_250, %c0_251] : memref<256x64xf32, #tpu.memory_space<vmem>>, vector<32x64xf32>
    %366 = arith.addf %364, %365 : vector<32x64xf32>
    %c96_252 = arith.constant 96 : index
    %c0_253 = arith.constant 0 : index
    %367 = vector.load %arg33[%c96_252, %c0_253] : memref<256x64xf32, #tpu.memory_space<vmem>>, vector<32x64xf32>
    tpu.vector_store %arg33[%c96_252, %c0_253], %366 {strides = array<i32>} : memref<256x64xf32, #tpu.memory_space<vmem>>, vector<32x64xf32>,
    %c128_254 = arith.constant 128 : index
    %c0_255 = arith.constant 0 : index
    %368 = vector.load %arg31[%c128_254, %c0_255] : memref<256x64xf32, #tpu.memory_space<vmem>>, vector<32x64xf32>
    %369 = arith.mulf %368, %366 : vector<32x64xf32>
    %c128_256 = arith.constant 128 : index
    %c0_257 = arith.constant 0 : index
    %370 = vector.load %arg32[%c128_256, %c0_257] : memref<256x64xf32, #tpu.memory_space<vmem>>, vector<32x64xf32>
    %371 = arith.addf %369, %370 : vector<32x64xf32>
    %c128_258 = arith.constant 128 : index
    %c0_259 = arith.constant 0 : index
    %372 = vector.load %arg33[%c128_258, %c0_259] : memref<256x64xf32, #tpu.memory_space<vmem>>, vector<32x64xf32>
    tpu.vector_store %arg33[%c128_258, %c0_259], %371 {strides = array<i32>} : memref<256x64xf32, #tpu.memory_space<vmem>>, vector<32x64xf32>,
    %c160_260 = arith.constant 160 : index
    %c0_261 = arith.constant 0 : index
    %373 = vector.load %arg31[%c160_260, %c0_261] : memref<256x64xf32, #tpu.memory_space<vmem>>, vector<32x64xf32>
    %374 = arith.mulf %373, %371 : vector<32x64xf32>
    %c160_262 = arith.constant 160 : index
    %c0_263 = arith.constant 0 : index
    %375 = vector.load %arg32[%c160_262, %c0_263] : memref<256x64xf32, #tpu.memory_space<vmem>>, vector<32x64xf32>
    %376 = arith.addf %374, %375 : vector<32x64xf32>
    %c160_264 = arith.constant 160 : index
    %c0_265 = arith.constant 0 : index
    %377 = vector.load %arg33[%c160_264, %c0_265] : memref<256x64xf32, #tpu.memory_space<vmem>>, vector<32x64xf32>
    tpu.vector_store %arg33[%c160_264, %c0_265], %376 {strides = array<i32>} : memref<256x64xf32, #tpu.memory_space<vmem>>, vector<32x64xf32>,
    %c192_266 = arith.constant 192 : index
    %c0_267 = arith.constant 0 : index
    %378 = vector.load %arg31[%c192_266, %c0_267] : memref<256x64xf32, #tpu.memory_space<vmem>>, vector<32x64xf32>
    %379 = arith.mulf %378, %376 : vector<32x64xf32>
    %c192_268 = arith.constant 192 : index
    %c0_269 = arith.constant 0 : index
    %380 = vector.load %arg32[%c192_268, %c0_269] : memref<256x64xf32, #tpu.memory_space<vmem>>, vector<32x64xf32>
    %381 = arith.addf %379, %380 : vector<32x64xf32>
    %c192_270 = arith.constant 192 : index
    %c0_271 = arith.constant 0 : index
    %382 = vector.load %arg33[%c192_270, %c0_271] : memref<256x64xf32, #tpu.memory_space<vmem>>, vector<32x64xf32>
    tpu.vector_store %arg33[%c192_270, %c0_271], %381 {strides = array<i32>} : memref<256x64xf32, #tpu.memory_space<vmem>>, vector<32x64xf32>,
    %c224_272 = arith.constant 224 : index
    %c0_273 = arith.constant 0 : index
    %383 = vector.load %arg31[%c224_272, %c0_273] : memref<256x64xf32, #tpu.memory_space<vmem>>, vector<32x64xf32>
    %384 = arith.mulf %383, %381 : vector<32x64xf32>
    %c224_274 = arith.constant 224 : index
    %c0_275 = arith.constant 0 : index
    %385 = vector.load %arg32[%c224_274, %c0_275] : memref<256x64xf32, #tpu.memory_space<vmem>>, vector<32x64xf32>
    %386 = arith.addf %384, %385 : vector<32x64xf32>
    %c224_276 = arith.constant 224 : index
    %c0_277 = arith.constant 0 : index
    %387 = vector.load %arg33[%c224_276, %c0_277] : memref<256x64xf32, #tpu.memory_space<vmem>>, vector<32x64xf32>
    tpu.vector_store %arg33[%c224_276, %c0_277], %386 {strides = array<i32>} : memref<256x64xf32, #tpu.memory_space<vmem>>, vector<32x64xf32>,
    %c0_278 = arith.constant 0 : index
    %c0_279 = arith.constant 0 : index
    %388 = vector.load %arg11[%c0_278, %c0_279] : memref<16x256xf32, #tpu.memory_space<vmem>>, vector<16x256xf32>
    %cst_280 = arith.constant dense<0.000000e+00> : vector<16x256xf32>
    %389 = tpu.matmul %329, %388, %cst_280 {dimension_numbers = #tpu.dot_dimension_numbers<[1], [0], [0], [1], [0, 0, 1, 1], [], []>} : vector<16x16xf32>, vector<16x256xf32>, vector<16x256xf32> -> vector<16x256xf32>
    %c0_281 = arith.constant 0 : index
    %c0_282 = arith.constant 0 : index
    %390 = vector.load %arg9[%c0_281, %c0_282] : memref<16x256xf32, #tpu.memory_space<vmem>>, vector<16x256xf32>
    %391 = arith.mulf %389, %390 : vector<16x256xf32>
    %c0_283 = arith.constant 0 : index
    %c0_284 = arith.constant 0 : index
    %392 = vector.load %arg33[%c0_283, %c0_284] : memref<256x64xf32, #tpu.memory_space<vmem>>, vector<256x64xf32>
    %cst_285 = arith.constant dense<0.000000e+00> : vector<16x64xf32>
    %393 = tpu.matmul %391, %392, %cst_285 {dimension_numbers = #tpu.dot_dimension_numbers<[1], [0], [0], [1], [0, 0, 1, 1], [], []>} : vector<16x256xf32>, vector<256x64xf32>, vector<16x64xf32> -> vector<16x64xf32>
    %c1_286 = arith.constant 1 : index
    %c0_287 = arith.constant 0 : index
    %c0_288 = arith.constant 0 : index
    %394 = vector.load %arg24[%c1_286, %c0_287, %c0_288] : memref<2x1x64xf32, #tpu.memory_space<vmem>>, vector<1x1x64xf32>
    %395 = vector.shape_cast %394 : vector<1x1x64xf32> to vector<1x64xf32>
    %396 = vector.broadcast %395 : vector<1x64xf32> to vector<16x64xf32>
    %397 = arith.mulf %396, %306 : vector<16x64xf32>
    %398 = arith.addf %393, %397 : vector<16x64xf32>
    %399 = math.absf %261 : vector<16x64xf32>
    %cst_289 = arith.constant 0.000000e+00 : f32
    %400 = vector.broadcast %cst_289 : f32 to vector<16x64xf32>
    %401 = arith.subf %400, %399 : vector<16x64xf32>
    %402 = math.exp %401 : vector<16x64xf32>
    %cst_290 = arith.constant 1.000000e+00 : f32
    %403 = vector.broadcast %cst_290 : f32 to vector<16x64xf32>
    %404 = arith.addf %403, %402 : vector<16x64xf32>
    %cst_291 = arith.constant 1.000000e+00 : f32
    %405 = vector.broadcast %cst_291 : f32 to vector<16x64xf32>
    %406 = arith.divf %405, %404 : vector<16x64xf32>
    %cst_292 = arith.constant 0.000000e+00 : f32
    %407 = vector.broadcast %cst_292 : f32 to vector<16x64xf32>
    %408 = arith.cmpf oge, %261, %407 : vector<16x64xf32>
    %cst_293 = arith.constant 1.000000e+00 : f32
    %409 = vector.broadcast %cst_293 : f32 to vector<16x64xf32>
    %410 = arith.subf %409, %406 : vector<16x64xf32>
    %411 = arith.select %408, %406, %410 : vector<16x64xi1>, vector<16x64xf32>
    %412 = arith.mulf %261, %411 : vector<16x64xf32>
    %413 = arith.mulf %398, %412 : vector<16x64xf32>
    %c1_294 = arith.constant 1 : index
    %c0_295 = arith.constant 0 : index
    %c0_296 = arith.constant 0 : index
    %414 = vector.load %arg25[%c1_294, %c0_295, %c0_296] : memref<2x64x32xf32, #tpu.memory_space<vmem>>, vector<1x64x32xf32>
    %415 = vector.shape_cast %414 : vector<1x64x32xf32> to vector<64x32xf32>
    %cst_297 = arith.constant dense<0.000000e+00> : vector<16x32xf32>
    %416 = tpu.matmul %413, %415, %cst_297 {dimension_numbers = #tpu.dot_dimension_numbers<[1], [0], [0], [1], [0, 0, 1, 1], [], []>} : vector<16x64xf32>, vector<64x32xf32>, vector<16x32xf32> -> vector<16x32xf32>
    %cst_298 = arith.constant dense<0.000000e+00> : vector<16xf32>
    %417 = vector.multi_reduction <add>, %416, %cst_298 [1] : vector<16x32xf32> to vector<16xf32>
    %418 = vector.shape_cast %417 : vector<16xf32> to vector<16x1xf32>
    %cst_299 = arith.constant 3.200000e+01 : f32
    %419 = vector.broadcast %cst_299 : f32 to vector<16x1xf32>
    %420 = arith.divf %418, %419 : vector<16x1xf32>
    %421 = vector.broadcast %420 : vector<16x1xf32> to vector<16x32xf32>
    %422 = arith.subf %416, %421 : vector<16x32xf32>
    %423 = arith.mulf %422, %422 : vector<16x32xf32>
    %cst_300 = arith.constant dense<0.000000e+00> : vector<16xf32>
    %424 = vector.multi_reduction <add>, %423, %cst_300 [1] : vector<16x32xf32> to vector<16xf32>
    %425 = vector.shape_cast %424 : vector<16xf32> to vector<16x1xf32>
    %cst_301 = arith.constant 3.200000e+01 : f32
    %426 = vector.broadcast %cst_301 : f32 to vector<16x1xf32>
    %427 = arith.divf %425, %426 : vector<16x1xf32>
    %428 = vector.broadcast %420 : vector<16x1xf32> to vector<16x32xf32>
    %429 = arith.subf %416, %428 : vector<16x32xf32>
    %cst_302 = arith.constant 9.99999974E-6 : f32
    %430 = vector.broadcast %cst_302 : f32 to vector<16x1xf32>
    %431 = arith.addf %427, %430 : vector<16x1xf32>
    %432 = math.rsqrt %431 : vector<16x1xf32>
    %433 = vector.broadcast %432 : vector<16x1xf32> to vector<16x32xf32>
    %434 = arith.mulf %429, %433 : vector<16x32xf32>
    %c0_303 = arith.constant 0 : index
    %c0_304 = arith.constant 0 : index
    %435 = vector.load %arg26[%c0_303, %c0_304] : memref<1x32xf32, #tpu.memory_space<vmem>>, vector<1x32xf32>
    %436 = vector.broadcast %435 : vector<1x32xf32> to vector<16x32xf32>
    %437 = arith.mulf %434, %436 : vector<16x32xf32>
    %c0_305 = arith.constant 0 : index
    %c0_306 = arith.constant 0 : index
    %438 = vector.load %arg27[%c0_305, %c0_306] : memref<1x32xf32, #tpu.memory_space<vmem>>, vector<1x32xf32>
    %439 = vector.broadcast %438 : vector<1x32xf32> to vector<16x32xf32>
    %440 = arith.addf %437, %439 : vector<16x32xf32>
    %cst_307 = arith.constant 0.000000e+00 : f32
    %441 = vector.broadcast %cst_307 : f32 to vector<2x128xf32>
    %c0_308 = arith.constant 0 : index
    %c0_309 = arith.constant 0 : index
    %442 = vector.load %arg29[%c0_308, %c0_309] : memref<1x128xf32, #tpu.memory_space<vmem>>, vector<1x128xf32>
    %443 = vector.broadcast %442 : vector<1x128xf32> to vector<2x128xf32>
    %444 = arith.addf %441, %443 : vector<2x128xf32>
    %c0_310 = arith.constant 0 : index
    %c0_311 = arith.constant 0 : index
    %c0_312 = arith.constant 0 : index
    %445 = vector.load %arg12[%c0_310, %c0_311, %c0_312] : memref<8x2x16xf32, #tpu.memory_space<vmem>>, vector<1x2x16xf32>
    %446 = vector.shape_cast %445 : vector<1x2x16xf32> to vector<2x16xf32>
    %cst_313 = arith.constant dense<0.000000e+00> : vector<2x32xf32>
    %447 = tpu.matmul %446, %440, %cst_313 {dimension_numbers = #tpu.dot_dimension_numbers<[1], [0], [0], [1], [0, 0, 1, 1], [], []>} : vector<2x16xf32>, vector<16x32xf32>, vector<2x32xf32> -> vector<2x32xf32>
    %c0_314 = arith.constant 0 : index
    %c0_315 = arith.constant 0 : index
    %c0_316 = arith.constant 0 : index
    %448 = vector.load %arg28[%c0_314, %c0_315, %c0_316] : memref<8x32x128xf32, #tpu.memory_space<vmem>>, vector<1x32x128xf32>
    %449 = vector.shape_cast %448 : vector<1x32x128xf32> to vector<32x128xf32>
    %cst_317 = arith.constant dense<0.000000e+00> : vector<2x128xf32>
    %450 = tpu.matmul %447, %449, %cst_317 {dimension_numbers = #tpu.dot_dimension_numbers<[1], [0], [0], [1], [0, 0, 1, 1], [], []>} : vector<2x32xf32>, vector<32x128xf32>, vector<2x128xf32> -> vector<2x128xf32>
    %451 = arith.addf %444, %450 : vector<2x128xf32>
    %c1_318 = arith.constant 1 : index
    %c0_319 = arith.constant 0 : index
    %c0_320 = arith.constant 0 : index
    %452 = vector.load %arg12[%c1_318, %c0_319, %c0_320] : memref<8x2x16xf32, #tpu.memory_space<vmem>>, vector<1x2x16xf32>
    %453 = vector.shape_cast %452 : vector<1x2x16xf32> to vector<2x16xf32>
    %cst_321 = arith.constant dense<0.000000e+00> : vector<2x32xf32>
    %454 = tpu.matmul %453, %440, %cst_321 {dimension_numbers = #tpu.dot_dimension_numbers<[1], [0], [0], [1], [0, 0, 1, 1], [], []>} : vector<2x16xf32>, vector<16x32xf32>, vector<2x32xf32> -> vector<2x32xf32>
    %c1_322 = arith.constant 1 : index
    %c0_323 = arith.constant 0 : index
    %c0_324 = arith.constant 0 : index
    %455 = vector.load %arg28[%c1_322, %c0_323, %c0_324] : memref<8x32x128xf32, #tpu.memory_space<vmem>>, vector<1x32x128xf32>
    %456 = vector.shape_cast %455 : vector<1x32x128xf32> to vector<32x128xf32>
    %cst_325 = arith.constant dense<0.000000e+00> : vector<2x128xf32>
    %457 = tpu.matmul %454, %456, %cst_325 {dimension_numbers = #tpu.dot_dimension_numbers<[1], [0], [0], [1], [0, 0, 1, 1], [], []>} : vector<2x32xf32>, vector<32x128xf32>, vector<2x128xf32> -> vector<2x128xf32>
    %458 = arith.addf %451, %457 : vector<2x128xf32>
    %c2_326 = arith.constant 2 : index
    %c0_327 = arith.constant 0 : index
    %c0_328 = arith.constant 0 : index
    %459 = vector.load %arg12[%c2_326, %c0_327, %c0_328] : memref<8x2x16xf32, #tpu.memory_space<vmem>>, vector<1x2x16xf32>
    %460 = vector.shape_cast %459 : vector<1x2x16xf32> to vector<2x16xf32>
    %cst_329 = arith.constant dense<0.000000e+00> : vector<2x32xf32>
    %461 = tpu.matmul %460, %440, %cst_329 {dimension_numbers = #tpu.dot_dimension_numbers<[1], [0], [0], [1], [0, 0, 1, 1], [], []>} : vector<2x16xf32>, vector<16x32xf32>, vector<2x32xf32> -> vector<2x32xf32>
    %c2_330 = arith.constant 2 : index
    %c0_331 = arith.constant 0 : index
    %c0_332 = arith.constant 0 : index
    %462 = vector.load %arg28[%c2_330, %c0_331, %c0_332] : memref<8x32x128xf32, #tpu.memory_space<vmem>>, vector<1x32x128xf32>
    %463 = vector.shape_cast %462 : vector<1x32x128xf32> to vector<32x128xf32>
    %cst_333 = arith.constant dense<0.000000e+00> : vector<2x128xf32>
    %464 = tpu.matmul %461, %463, %cst_333 {dimension_numbers = #tpu.dot_dimension_numbers<[1], [0], [0], [1], [0, 0, 1, 1], [], []>} : vector<2x32xf32>, vector<32x128xf32>, vector<2x128xf32> -> vector<2x128xf32>
    %465 = arith.addf %458, %464 : vector<2x128xf32>
    %c3_334 = arith.constant 3 : index
    %c0_335 = arith.constant 0 : index
    %c0_336 = arith.constant 0 : index
    %466 = vector.load %arg12[%c3_334, %c0_335, %c0_336] : memref<8x2x16xf32, #tpu.memory_space<vmem>>, vector<1x2x16xf32>
    %467 = vector.shape_cast %466 : vector<1x2x16xf32> to vector<2x16xf32>
    %cst_337 = arith.constant dense<0.000000e+00> : vector<2x32xf32>
    %468 = tpu.matmul %467, %440, %cst_337 {dimension_numbers = #tpu.dot_dimension_numbers<[1], [0], [0], [1], [0, 0, 1, 1], [], []>} : vector<2x16xf32>, vector<16x32xf32>, vector<2x32xf32> -> vector<2x32xf32>
    %c3_338 = arith.constant 3 : index
    %c0_339 = arith.constant 0 : index
    %c0_340 = arith.constant 0 : index
    %469 = vector.load %arg28[%c3_338, %c0_339, %c0_340] : memref<8x32x128xf32, #tpu.memory_space<vmem>>, vector<1x32x128xf32>
    %470 = vector.shape_cast %469 : vector<1x32x128xf32> to vector<32x128xf32>
    %cst_341 = arith.constant dense<0.000000e+00> : vector<2x128xf32>
    %471 = tpu.matmul %468, %470, %cst_341 {dimension_numbers = #tpu.dot_dimension_numbers<[1], [0], [0], [1], [0, 0, 1, 1], [], []>} : vector<2x32xf32>, vector<32x128xf32>, vector<2x128xf32> -> vector<2x128xf32>
    %472 = arith.addf %465, %471 : vector<2x128xf32>
    %c4_342 = arith.constant 4 : index
    %c0_343 = arith.constant 0 : index
    %c0_344 = arith.constant 0 : index
    %473 = vector.load %arg12[%c4_342, %c0_343, %c0_344] : memref<8x2x16xf32, #tpu.memory_space<vmem>>, vector<1x2x16xf32>
    %474 = vector.shape_cast %473 : vector<1x2x16xf32> to vector<2x16xf32>
    %cst_345 = arith.constant dense<0.000000e+00> : vector<2x32xf32>
    %475 = tpu.matmul %474, %440, %cst_345 {dimension_numbers = #tpu.dot_dimension_numbers<[1], [0], [0], [1], [0, 0, 1, 1], [], []>} : vector<2x16xf32>, vector<16x32xf32>, vector<2x32xf32> -> vector<2x32xf32>
    %c4_346 = arith.constant 4 : index
    %c0_347 = arith.constant 0 : index
    %c0_348 = arith.constant 0 : index
    %476 = vector.load %arg28[%c4_346, %c0_347, %c0_348] : memref<8x32x128xf32, #tpu.memory_space<vmem>>, vector<1x32x128xf32>
    %477 = vector.shape_cast %476 : vector<1x32x128xf32> to vector<32x128xf32>
    %cst_349 = arith.constant dense<0.000000e+00> : vector<2x128xf32>
    %478 = tpu.matmul %475, %477, %cst_349 {dimension_numbers = #tpu.dot_dimension_numbers<[1], [0], [0], [1], [0, 0, 1, 1], [], []>} : vector<2x32xf32>, vector<32x128xf32>, vector<2x128xf32> -> vector<2x128xf32>
    %479 = arith.addf %472, %478 : vector<2x128xf32>
    %c5_350 = arith.constant 5 : index
    %c0_351 = arith.constant 0 : index
    %c0_352 = arith.constant 0 : index
    %480 = vector.load %arg12[%c5_350, %c0_351, %c0_352] : memref<8x2x16xf32, #tpu.memory_space<vmem>>, vector<1x2x16xf32>
    %481 = vector.shape_cast %480 : vector<1x2x16xf32> to vector<2x16xf32>
    %cst_353 = arith.constant dense<0.000000e+00> : vector<2x32xf32>
    %482 = tpu.matmul %481, %440, %cst_353 {dimension_numbers = #tpu.dot_dimension_numbers<[1], [0], [0], [1], [0, 0, 1, 1], [], []>} : vector<2x16xf32>, vector<16x32xf32>, vector<2x32xf32> -> vector<2x32xf32>
    %c5_354 = arith.constant 5 : index
    %c0_355 = arith.constant 0 : index
    %c0_356 = arith.constant 0 : index
    %483 = vector.load %arg28[%c5_354, %c0_355, %c0_356] : memref<8x32x128xf32, #tpu.memory_space<vmem>>, vector<1x32x128xf32>
    %484 = vector.shape_cast %483 : vector<1x32x128xf32> to vector<32x128xf32>
    %cst_357 = arith.constant dense<0.000000e+00> : vector<2x128xf32>
    %485 = tpu.matmul %482, %484, %cst_357 {dimension_numbers = #tpu.dot_dimension_numbers<[1], [0], [0], [1], [0, 0, 1, 1], [], []>} : vector<2x32xf32>, vector<32x128xf32>, vector<2x128xf32> -> vector<2x128xf32>
    %486 = arith.addf %479, %485 : vector<2x128xf32>
    %c6_358 = arith.constant 6 : index
    %c0_359 = arith.constant 0 : index
    %c0_360 = arith.constant 0 : index
    %487 = vector.load %arg12[%c6_358, %c0_359, %c0_360] : memref<8x2x16xf32, #tpu.memory_space<vmem>>, vector<1x2x16xf32>
    %488 = vector.shape_cast %487 : vector<1x2x16xf32> to vector<2x16xf32>
    %cst_361 = arith.constant dense<0.000000e+00> : vector<2x32xf32>
    %489 = tpu.matmul %488, %440, %cst_361 {dimension_numbers = #tpu.dot_dimension_numbers<[1], [0], [0], [1], [0, 0, 1, 1], [], []>} : vector<2x16xf32>, vector<16x32xf32>, vector<2x32xf32> -> vector<2x32xf32>
    %c6_362 = arith.constant 6 : index
    %c0_363 = arith.constant 0 : index
    %c0_364 = arith.constant 0 : index
    %490 = vector.load %arg28[%c6_362, %c0_363, %c0_364] : memref<8x32x128xf32, #tpu.memory_space<vmem>>, vector<1x32x128xf32>
    %491 = vector.shape_cast %490 : vector<1x32x128xf32> to vector<32x128xf32>
    %cst_365 = arith.constant dense<0.000000e+00> : vector<2x128xf32>
    %492 = tpu.matmul %489, %491, %cst_365 {dimension_numbers = #tpu.dot_dimension_numbers<[1], [0], [0], [1], [0, 0, 1, 1], [], []>} : vector<2x32xf32>, vector<32x128xf32>, vector<2x128xf32> -> vector<2x128xf32>
    %493 = arith.addf %486, %492 : vector<2x128xf32>
    %c7_366 = arith.constant 7 : index
    %c0_367 = arith.constant 0 : index
    %c0_368 = arith.constant 0 : index
    %494 = vector.load %arg12[%c7_366, %c0_367, %c0_368] : memref<8x2x16xf32, #tpu.memory_space<vmem>>, vector<1x2x16xf32>
    %495 = vector.shape_cast %494 : vector<1x2x16xf32> to vector<2x16xf32>
    %cst_369 = arith.constant dense<0.000000e+00> : vector<2x32xf32>
    %496 = tpu.matmul %495, %440, %cst_369 {dimension_numbers = #tpu.dot_dimension_numbers<[1], [0], [0], [1], [0, 0, 1, 1], [], []>} : vector<2x16xf32>, vector<16x32xf32>, vector<2x32xf32> -> vector<2x32xf32>
    %c7_370 = arith.constant 7 : index
    %c0_371 = arith.constant 0 : index
    %c0_372 = arith.constant 0 : index
    %497 = vector.load %arg28[%c7_370, %c0_371, %c0_372] : memref<8x32x128xf32, #tpu.memory_space<vmem>>, vector<1x32x128xf32>
    %498 = vector.shape_cast %497 : vector<1x32x128xf32> to vector<32x128xf32>
    %cst_373 = arith.constant dense<0.000000e+00> : vector<2x128xf32>
    %499 = tpu.matmul %496, %498, %cst_373 {dimension_numbers = #tpu.dot_dimension_numbers<[1], [0], [0], [1], [0, 0, 1, 1], [], []>} : vector<2x32xf32>, vector<32x128xf32>, vector<2x128xf32> -> vector<2x128xf32>
    %500 = arith.addf %493, %499 : vector<2x128xf32>
    %c0_374 = arith.constant 0 : index
    %c0_375 = arith.constant 0 : index
    %501 = vector.load %arg30[%c0_374, %c0_375] : memref<2x128xf32, #tpu.memory_space<vmem>>, vector<2x128xf32>
    tpu.vector_store %arg30[%c0_374, %c0_375], %500 {strides = array<i32>} : memref<2x128xf32, #tpu.memory_space<vmem>>, vector<2x128xf32>,
    return
  }
  func.func @transform_0(%arg0: i32) -> (i32, i32) {
    %c0_i32 = arith.constant 0 : i32
    %c0_i32_0 = arith.constant 0 : i32
    %c0_i32_1 = arith.constant 0 : i32
    return %c0_i32, %c0_i32_0 : i32, i32
  }
  func.func @transform_1(%arg0: i32) -> (i32, i32) {
    %c0_i32 = arith.constant 0 : i32
    %c0_i32_0 = arith.constant 0 : i32
    %c0_i32_1 = arith.constant 0 : i32
    return %c0_i32, %c0_i32_0 : i32, i32
  }
  func.func @transform_2(%arg0: i32) -> (i32, i32) {
    %c0_i32 = arith.constant 0 : i32
    %c0_i32_0 = arith.constant 0 : i32
    %c0_i32_1 = arith.constant 0 : i32
    return %c0_i32, %c0_i32_0 : i32, i32
  }
  func.func @transform_3(%arg0: i32) -> (i32, i32) {
    %c0_i32 = arith.constant 0 : i32
    %c0_i32_0 = arith.constant 0 : i32
    %c0_i32_1 = arith.constant 0 : i32
    return %c0_i32, %c0_i32_0 : i32, i32
  }
  func.func @transform_4(%arg0: i32) -> (i32, i32) {
    %c0_i32 = arith.constant 0 : i32
    %c0_i32_0 = arith.constant 0 : i32
    %c0_i32_1 = arith.constant 0 : i32
    return %c0_i32, %c0_i32_0 : i32, i32
  }
  func.func @transform_5(%arg0: i32) -> (i32, i32) {
    %c0_i32 = arith.constant 0 : i32
    %c0_i32_0 = arith.constant 0 : i32
    %c0_i32_1 = arith.constant 0 : i32
    return %c0_i32, %c0_i32_0 : i32, i32
  }
  func.func @transform_6(%arg0: i32) -> (i32, i32) {
    %c0_i32 = arith.constant 0 : i32
    %c0_i32_0 = arith.constant 0 : i32
    %c0_i32_1 = arith.constant 0 : i32
    return %c0_i32, %c0_i32_0 : i32, i32
  }
  func.func @transform_7(%arg0: i32) -> (i32, i32) {
    %c0_i32 = arith.constant 0 : i32
    %c0_i32_0 = arith.constant 0 : i32
    %c0_i32_1 = arith.constant 0 : i32
    return %c0_i32, %c0_i32_0 : i32, i32
  }
  func.func @transform_8(%arg0: i32) -> (i32, i32) {
    %c0_i32 = arith.constant 0 : i32
    %c0_i32_0 = arith.constant 0 : i32
    %c0_i32_1 = arith.constant 0 : i32
    return %c0_i32, %c0_i32_0 : i32, i32
  }
  func.func @transform_9(%arg0: i32) -> (i32, i32) {
    %c0_i32 = arith.constant 0 : i32
    %c0_i32_0 = arith.constant 0 : i32
    %c0_i32_1 = arith.constant 0 : i32
    return %c0_i32, %c0_i32_0 : i32, i32
  }
  func.func @transform_10(%arg0: i32) -> (i32, i32) {
    %c0_i32 = arith.constant 0 : i32
    %c0_i32_0 = arith.constant 0 : i32
    %c0_i32_1 = arith.constant 0 : i32
    return %c0_i32, %c0_i32_0 : i32, i32
  }
  func.func @transform_11(%arg0: i32) -> (i32, i32, i32) {
    %c0_i32 = arith.constant 0 : i32
    %c0_i32_0 = arith.constant 0 : i32
    %c0_i32_1 = arith.constant 0 : i32
    %c0_i32_2 = arith.constant 0 : i32
    return %c0_i32, %c0_i32_0, %c0_i32_1 : i32, i32, i32
  }
  func.func @transform_12(%arg0: i32) -> (i32, i32, i32) {
    %c0_i32 = arith.constant 0 : i32
    %c0_i32_0 = arith.constant 0 : i32
    %c0_i32_1 = arith.constant 0 : i32
    %c0_i32_2 = arith.constant 0 : i32
    return %c0_i32, %c0_i32_0, %c0_i32_1 : i32, i32, i32
  }
  func.func @transform_13(%arg0: i32) -> (i32, i32, i32) {
    %c0_i32 = arith.constant 0 : i32
    %c0_i32_0 = arith.constant 0 : i32
    %c0_i32_1 = arith.constant 0 : i32
    %c0_i32_2 = arith.constant 0 : i32
    return %c0_i32, %c0_i32_0, %c0_i32_1 : i32, i32, i32
  }
  func.func @transform_14(%arg0: i32) -> (i32, i32, i32) {
    %c0_i32 = arith.constant 0 : i32
    %c0_i32_0 = arith.constant 0 : i32
    %c0_i32_1 = arith.constant 0 : i32
    %c0_i32_2 = arith.constant 0 : i32
    return %c0_i32, %c0_i32_0, %c0_i32_1 : i32, i32, i32
  }
  func.func @transform_15(%arg0: i32) -> (i32, i32, i32) {
    %c0_i32 = arith.constant 0 : i32
    %c0_i32_0 = arith.constant 0 : i32
    %c0_i32_1 = arith.constant 0 : i32
    %c0_i32_2 = arith.constant 0 : i32
    return %c0_i32, %c0_i32_0, %c0_i32_1 : i32, i32, i32
  }
  func.func @transform_16(%arg0: i32) -> (i32, i32, i32) {
    %c0_i32 = arith.constant 0 : i32
    %c0_i32_0 = arith.constant 0 : i32
    %c0_i32_1 = arith.constant 0 : i32
    %c0_i32_2 = arith.constant 0 : i32
    return %c0_i32, %c0_i32_0, %c0_i32_1 : i32, i32, i32
  }
  func.func @transform_17(%arg0: i32) -> (i32, i32, i32) {
    %c0_i32 = arith.constant 0 : i32
    %c0_i32_0 = arith.constant 0 : i32
    %c0_i32_1 = arith.constant 0 : i32
    %c0_i32_2 = arith.constant 0 : i32
    return %c0_i32, %c0_i32_0, %c0_i32_1 : i32, i32, i32
  }
  func.func @transform_18(%arg0: i32) -> (i32, i32, i32) {
    %c0_i32 = arith.constant 0 : i32
    %c0_i32_0 = arith.constant 0 : i32
    %c0_i32_1 = arith.constant 0 : i32
    %c0_i32_2 = arith.constant 0 : i32
    return %c0_i32, %c0_i32_0, %c0_i32_1 : i32, i32, i32
  }
  func.func @transform_19(%arg0: i32) -> (i32, i32, i32) {
    %c0_i32 = arith.constant 0 : i32
    %c0_i32_0 = arith.constant 0 : i32
    %c0_i32_1 = arith.constant 0 : i32
    %c0_i32_2 = arith.constant 0 : i32
    return %c0_i32, %c0_i32_0, %c0_i32_1 : i32, i32, i32
  }
  func.func @transform_20(%arg0: i32) -> (i32, i32, i32) {
    %c0_i32 = arith.constant 0 : i32
    %c0_i32_0 = arith.constant 0 : i32
    %c0_i32_1 = arith.constant 0 : i32
    %c0_i32_2 = arith.constant 0 : i32
    return %c0_i32, %c0_i32_0, %c0_i32_1 : i32, i32, i32
  }
  func.func @transform_21(%arg0: i32) -> (i32, i32, i32) {
    %c0_i32 = arith.constant 0 : i32
    %c0_i32_0 = arith.constant 0 : i32
    %c0_i32_1 = arith.constant 0 : i32
    %c0_i32_2 = arith.constant 0 : i32
    return %c0_i32, %c0_i32_0, %c0_i32_1 : i32, i32, i32
  }
  func.func @transform_22(%arg0: i32) -> (i32, i32, i32) {
    %c0_i32 = arith.constant 0 : i32
    %c0_i32_0 = arith.constant 0 : i32
    %c0_i32_1 = arith.constant 0 : i32
    %c0_i32_2 = arith.constant 0 : i32
    return %c0_i32, %c0_i32_0, %c0_i32_1 : i32, i32, i32
  }
  func.func @transform_23(%arg0: i32) -> (i32, i32, i32) {
    %c0_i32 = arith.constant 0 : i32
    %c0_i32_0 = arith.constant 0 : i32
    %c0_i32_1 = arith.constant 0 : i32
    %c0_i32_2 = arith.constant 0 : i32
    return %c0_i32, %c0_i32_0, %c0_i32_1 : i32, i32, i32
  }
  func.func @transform_24(%arg0: i32) -> (i32, i32, i32) {
    %c0_i32 = arith.constant 0 : i32
    %c0_i32_0 = arith.constant 0 : i32
    %c0_i32_1 = arith.constant 0 : i32
    %c0_i32_2 = arith.constant 0 : i32
    return %c0_i32, %c0_i32_0, %c0_i32_1 : i32, i32, i32
  }
  func.func @transform_25(%arg0: i32) -> (i32, i32) {
    %c0_i32 = arith.constant 0 : i32
    %c0_i32_0 = arith.constant 0 : i32
    %c0_i32_1 = arith.constant 0 : i32
    return %c0_i32, %c0_i32_0 : i32, i32
  }
  func.func @transform_26(%arg0: i32) -> (i32, i32) {
    %c0_i32 = arith.constant 0 : i32
    %c0_i32_0 = arith.constant 0 : i32
    %c0_i32_1 = arith.constant 0 : i32
    return %c0_i32, %c0_i32_0 : i32, i32
  }
  func.func @transform_27(%arg0: i32) -> (i32, i32, i32) {
    %c0_i32 = arith.constant 0 : i32
    %c0_i32_0 = arith.constant 0 : i32
    %c0_i32_1 = arith.constant 0 : i32
    %c0_i32_2 = arith.constant 0 : i32
    return %c0_i32, %c0_i32_0, %c0_i32_1 : i32, i32, i32
  }
  func.func @transform_28(%arg0: i32) -> (i32, i32) {
    %c0_i32 = arith.constant 0 : i32
    %c0_i32_0 = arith.constant 0 : i32
    %c0_i32_1 = arith.constant 0 : i32
    return %c0_i32, %c0_i32_0 : i32, i32
  }
  func.func @transform_29(%arg0: i32) -> (i32, i32) {
    %c0_i32 = arith.constant 0 : i32
    %c0_i32_0 = arith.constant 0 : i32
    %c0_i32_1 = arith.constant 0 : i32
    return %c0_i32, %c0_i32_0 : i32, i32
  }
}

</mosaic_0001>

<bundles_post_ra>
// kernel: tile.0
= control target key start
LH: loop header
LB: loop body
LE: loop exit
PB: predicated region body
PF: predicated region fallthrough
CT: control target
= control target key end

     0   :  { %s66_s8 = smov 125   ;;  %vm7_vm0 = vcmask 7168   ;;  %s67_s11 = smov 126   ;;  %s117_s0 = inlined_call_operand.vmem [shape: s32[2,8], index: 0, kind: input, shape index: {}]   ;;  %s118_s1 = inlined_call_operand.vmem [shape: s32[16,1], index: 1, kind: output, shape index: {}]  }
   0x1   :  { %v4_v0 = vld [vmem:[%s117_s0] sm:$0x3]  ;;  %s65_s0 = smov 127   ;;  %s68_s12 = smov 124  }
   0x2   :  { %5 = vst [vmem:[#allocation0] sm:$0x3] %v4_v0  ;;  %s69_s13 = smov 123   ;;  %s70_s14 = smov 122  }
   0x3   :  { %s71_s15 = smov 121  }
   0x9   :  { %v9_v1 = vld [vmem:[#allocation0] sm:$0x3]  }
   0xa   :  { %v21_v2 = vld [vmem:[#allocation0] sm:$0x3]   ;;  %10 = vrot.lane.b32.xlu0 %v9_v1, %s65_s0 }
   0xb   :  { %22 = vrot.lane.b32.xlu1 %v21_v2, %s66_s8  ;;  %v15_v3 = vld [vmem:[#allocation0] sm:$0x3]  }
   0xc   :  { %v27_v4 = vld [vmem:[#allocation0] sm:$0x3]  }
   0xd   :  { %v6_v5 = vld [vmem:[#allocation0] sm:$0x3]  }
   0xe   :  { %8 = vst.msk [vmem:[%s118_s1] ss:$8 sm:$0x3] %vm7_vm0, %v6_v5   ;;  %16 = vrot.lane.b32.xlu0 %v15_v3, %s67_s11  ;;  %v33_v6 = vld [vmem:[#allocation0] sm:$0x3]  }
   0xf   :  { %28 = vrot.lane.b32.xlu1 %v27_v4, %s68_s12  ;;  %v39_v7 = vld [vmem:[#allocation0] sm:$0x3]  }
  0x10   :  { %v45_v8 = vld [vmem:[#allocation0] sm:$0x3]  }
  0x12   :  { %34 = vrot.lane.b32.xlu0 %v33_v6, %s69_s13 }
  0x13   :  { %40 = vrot.lane.b32.xlu1 %v39_v7, %s70_s14 }
  0x16   :  { %46 = vrot.lane.b32.xlu0 %v45_v8, %s71_s15 }
  0x7c   :  { %v11_v9 = vpop.permute.xlu0 %10  }
  0x7d   :  { %v23_v10 = vpop.permute.xlu1 %22   ;;  %51 = vst.msk [vmem:[%s118_s1 + $0x1] ss:$8 sm:$0x3] %vm7_vm0, %v11_v9  }
  0x7e   :  { %53 = vst.msk [vmem:[%s118_s1 + $0x3] ss:$8 sm:$0x3] %vm7_vm0, %v23_v10  }
  0x80   :  { %v17_v11 = vpop.permute.xlu0 %16  }
  0x81   :  { %v29_v12 = vpop.permute.xlu1 %28   ;;  %52 = vst.msk [vmem:[%s118_s1 + $0x2] ss:$8 sm:$0x3] %vm7_vm0, %v17_v11  }
  0x82   :  { %54 = vst.msk [vmem:[%s118_s1 + $0x4] ss:$8 sm:$0x3] %vm7_vm0, %v29_v12  }
  0x84   :  { %v35_v13 = vpop.permute.xlu0 %34  }
  0x85   :  { %v41_v14 = vpop.permute.xlu1 %40   ;;  %55 = vst.msk [vmem:[%s118_s1 + $0x5] ss:$8 sm:$0x3] %vm7_vm0, %v35_v13  }
  0x86   :  { %56 = vst.msk [vmem:[%s118_s1 + $0x6] ss:$8 sm:$0x3] %vm7_vm0, %v41_v14  }
  0x88   :  { %v47_v15 = vpop.permute.xlu0 %46  }
  0x89   :  { %57 = vst.msk [vmem:[%s118_s1 + $0x7] ss:$8 sm:$0x3] %vm7_vm0, %v47_v15  }

// kernel: ptrnet_forward.1
= control target key start
LH: loop header
LB: loop body
LE: loop exit
PB: predicated region body
PF: predicated region fallthrough
CT: control target
= control target key end

     0   :  { %v8609_v0 = vmov 0   ;;  %s8610_s3 = smov 1   ;;  %s8611_s10 = smov 5   ;;  %vm185_vm0 = vcmask 1044480   ;;  %v8613_v5 = vmov 1   ;;  %v8614_v10 = vmov 2   ;;  %s10226_s0 = inlined_call_operand.smem [shape: u32[30], index: -1, kind: input, shape index: {}] }
   0x1   :  { %8415 = vset.pattern.permute.xlu1 %v8609_v0  ;;  %8414 = vset.pattern.permute.xlu0 %v8609_v0  ;;  %s6421_s6 = sld [smem:[%s10226_s0 + %s8610_s3]]   ;;  %s8612_s14 = smov 4   ;;  %v124_v17 = vlaneseq  ;;  %vm178_vm3 = vcmask 39936   ;;  %v8617_v21 = vmov 0.0   ;;  %vm264_vm12 = vcmask 171008  }
   0x2   :  { %s1_s9 = sld [smem:[%s10226_s0]]   ;;  %s8615_s18 = smov 2   ;;  %vm367_vm15 = vcmask 261120  }
   0x3   :  { %s6425_s13 = sld [smem:[%s10226_s0 + %s8611_s10]]   ;;  %s8616_s22 = smov 3   ;;  %v125_v18 = vand.u32 127, %v124_v17 }
   0x4   :  { %s8661_s17 = sld [smem:[%s10226_s0 + %s8612_s14]]   ;;  %s8618_s26 = smov 14  }
   0x5   :  { %s6422_s21 = sld [smem:[%s10226_s0 + %s8615_s18]]   ;;  %s8619_s30 = smov 15  }
   0x6   :  { %s6423_s25 = sld [smem:[%s10226_s0 + %s8616_s22]]   ;;  %s8620_s4 = smov 12  }
   0x7   :  { %v165_v1 = vld [vmem:[%s6421_s6] sm:$0xff]  ;;  %v166_v3 = vld [vmem:[%s6421_s6 + $0x8] sm:$0xff]  ;;  %s8691_s29 = sld [smem:[%s10226_s0 + %s8618_s26]]   ;;  %s8621_s8 = smov 13  }
   0x8   :  { %v122_v2 = vld [vmem:[%s1_s9] sm:$0xff]  ;;  %168 = vperm.xlu0 %8414, %v165_v1   ;;  %v123_v6 = vld [vmem:[%s1_s9 + $0x8] sm:$0xff]  ;;  %s8696_s3 = sld [smem:[%s10226_s0 + %s8619_s30]]   ;;  %s8622_s12 = smov 6  }
   0x9   :  { %127 = vperm.xlu1 %8415, %v122_v2   ;;  %v177_v4 = vld [vmem:[%s6425_s13] sm:$0x1f]  ;;  %s8709_s7 = sld [smem:[%s10226_s0 + %s8620_s4]]   ;;  %s8623_s16 = smov 18  }
   0xa   :  { %7324 = vmatprep.subr.msk.mxu0 %vm185_vm0, %v177_v4  ;;  %v162_v7 = vld [vmem:[%s8661_s17] sm:$0xff]  ;;  %v163_v8 = vld [vmem:[%s8661_s17 + $0x8] sm:$0xff]  ;;  %v164_v26 = vld [vmem:[%s8661_s17 + $0x10] sm:$0x1f]  ;;  %s8714_s11 = sld [smem:[%s10226_s0 + %s8621_s8]]   ;;  %s8624_s20 = smov 20  }
   0xb   :  { %7325 = vmatpush3.msk.msra.mxu0 %vm185_vm0, %v177_v4  ;;  %v8022_v9 = vpack.c.bf16 %v163_v8, %v162_v7  ;;  %v352_v12 = vld [vmem:[%s6422_s21 + $0x8] sm:$0xff]  ;;  %v351_v14 = vld [vmem:[%s6422_s21] sm:$0xff]  ;;  %s8725_s15 = sld [smem:[%s10226_s0 + %s8622_s12]]   ;;  %s8625_s24 = smov 21  }
   0xc   :  { %171 = vperm.xlu0 %8414, %v166_v3   ;;  %v350_v11 = vld [vmem:[%s6423_s25 + $0x8] sm:$0xff]  ;;  %v349_v13 = vld [vmem:[%s6423_s25] sm:$0xff]  ;;  %s8750_s19 = sld [smem:[%s10226_s0 + %s8623_s16]]   ;;  %s8626_s28 = smov 16  }
   0xd   :  { %8416 = vset.pattern.permute.xlu1 %v8613_v5  ;;  %8023 = vmatprep.subr.bf16.mxu0 %v8022_v9  ;;  %vm354_vm1 = vcmp.lt.s32.totalorder %v350_v11, %v352_v12  ;;  %vm353_vm2 = vcmp.lt.s32.totalorder %v349_v13, %v351_v14  ;;  %v413_v59 = vld [vmem:[%s8691_s29] sm:$0xff]  ;;  %v414_v60 = vld [vmem:[%s8691_s29 + $0x8] sm:$0xff]  ;;  %v416_v1 = vld [vmem:[%s8691_s29 + $0x18] sm:$0xff]  ;;  %s8755_s23 = sld [smem:[%s10226_s0 + %s8624_s20]]   ;;  %s8627_s4 = smov 17  }
   0xe   :  { %139 = vperm.xlu1 %8416, %v122_v2   ;;  %v356_v15 = vsel %vm354_vm1, 1, %v8609_v0  ;;  %v355_v16 = vsel %vm353_vm2, 1, %v8609_v0  ;;  %v498_v61 = vld [vmem:[%s8696_s3] sm:$0xff]  ;;  %v8026_v62 = vpack.c.bf16 %v414_v60, %v413_v59  ;;  %v499_v63 = vld [vmem:[%s8696_s3 + $0x8] sm:$0xff]  ;;  %v500_v4 = vld [vmem:[%s8696_s3 + $0x10] sm:$0xff]  ;;  %s8772_s27 = sld [smem:[%s10226_s0 + %s8625_s24]]   ;;  %s8628_s9 = smov 7  }
   0xf   :  { %v501_v5 = vld [vmem:[%s8696_s3 + $0x18] sm:$0xff]  ;;  %v6456_v14 = vld [vmem:[%s8709_s7] ss:$0 sm:$0xff]  ;;  %s8786_s2 = sld [smem:[%s10226_s0 + %s8626_s28]]   ;;  %s8629_s14 = smov 19  }
  0x10   :  { %130 = vperm.xlu0 %8414, %v123_v6   ;;  %8027 = vmatprep.subr.bf16.mxu1 %v8026_v62  ;;  %s8791_s8 = sld [smem:[%s10226_s0 + %s8627_s4]]   ;;  %s8630_s20 = smov 10  }
  0x11   :  { %8029 = vmatpush3.bf16.msra.mxu1 %v8026_v62  ;;  %s8824_s13 = sld [smem:[%s10226_s0 + %s8628_s9]]   ;;  %s8631_s25 = smov 22  }
  0x12   :  { %142 = vperm.xlu1 %8416, %v123_v6   ;;  %s8836_s18 = sld [smem:[%s10226_s0 + %s8629_s14]]   ;;  %s8632_s1 = smov 9  }
  0x13   :  { %v914_v59 = vld [vmem:[%s8755_s23 + $0x38] sm:$0xff]  ;;  %s8846_s24 = sld [smem:[%s10226_s0 + %s8630_s20]]   ;;  %s8633_s9 = smov 8  }
  0x14   :  { %8417 = vset.pattern.permute.xlu0 %v8614_v10  ;;  %v991_v62 = vld [vmem:[%s8772_s27 + $0x8] sm:$0xff]  ;;  %s9089_s30 = sld [smem:[%s10226_s0 + %s8631_s25]]   ;;  %s8634_s16 = smov 24  }
  0x15   :  { %151 = vperm.xlu0 %8417, %v122_v2   ;;  %v8034_v2 = vpack.c.bf16 %v499_v63, %v498_v61  ;;  %v990_v61 = vld [vmem:[%s8772_s27] sm:$0xff]  ;;  %s9197_s6 = sld [smem:[%s10226_s0 + %s8632_s1]]   ;;  %s8635_s22 = smov 23  }
  0x16   :  { %8418 = vset.pattern.permute.xlu1 %v8614_v10  ;;  %v8780_v63 = vpack.c.bf16 %v991_v62, %v990_v61  ;;  %s9207_s14 = sld [smem:[%s10226_s0 + %s8633_s9]]   ;;  %s8642_s5 = smov 28  }
  0x17   :  { %154 = vperm.xlu1 %8418, %v123_v6   ;;  %v8038_v6 = vpack.c.bf16 %v501_v5, %v500_v4  ;;  %v6470_v4 = vld [vmem:[%s8791_s8] ss:$0 sm:$0xff]  ;;  %s9397_s21 = sld [smem:[%s10226_s0 + %s8634_s16]]   ;;  %s8643_s12 = smov 29  }
  0x18   :  { %s9420_s28 = sld [smem:[%s10226_s0 + %s8635_s22]]  }
  0x19   :  { %8420 = vset.pattern.permute.xlu0 %v8609_v0  ;;  %s6448_s10 = sld [smem:[%s10226_s0 + %s8642_s5]]  }
  0x1a   :  { %361 = vperm.xlu0 %8420, %v356_v15   ;;  %s6449_s17 = sld [smem:[%s10226_s0 + %s8643_s12]]  }
  0x1b   :  { %8419 = vset.pattern.permute.xlu1 %v8609_v0  ;;  %v415_v0 = vld [vmem:[%s8691_s29 + $0x10] sm:$0xff] }
  0x1c   :  { %358 = vperm.xlu1 %8419, %v355_v16   ;;  %v8030_v3 = vpack.c.bf16 %v416_v1, %v415_v0  ;;  %v6471_v0 = vld [vmem:[%s8786_s2] ss:$0 sm:$0xff] }
  0x1e   :  { %8031 = vmatprep.subr.bf16.mxu1 %v8030_v3 }
  0x1f   :  { %8033 = vmatpush3.bf16.msra.mxu1 %v8030_v3 }
  0x87   :  { %v169_v19 = vpop.permute.xlu0 %168 }
  0x88   :  { %v128_v20 = vpop.permute.xlu1 %127  ;;  %vm173_vm4 = vcmp.eq.s32.totalorder %v169_v19, %v125_v18  ;;  %v6457_v19 = vld [vmem:[%s8714_s11] ss:$0 sm:$0xff] }
  0x89   :  { %v175_v22 = vsel %vm173_vm4, 1.0, %v8617_v21  ;;  %vm132_vm8 = vcmp.eq.s32.totalorder %v128_v20, %v125_v18 }
  0x8a   :  { %7326 = vmatprep.mubr.msk.f32.mxu0 %vm178_vm3, %v175_v22  ;;  %v134_v32 = vsel %vm132_vm8, 1.0, %v8617_v21 }
  0x8b   :  { %v172_v23 = vpop.permute.xlu0 %171 }
  0x8c   :  { %vm174_vm5 = vcmp.eq.s32.totalorder %v172_v23, %v125_v18 }
  0x8d   :  { %v140_v24 = vpop.permute.xlu1 %139  ;;  %v176_v25 = vsel %vm174_vm5, 1.0, %v8617_v21 }
  0x8e   :  { %7327 = vmatmul.mubr.msk.f32.vlgmr.msra.gmra.mrb[0].mxu0 %vm178_vm3, %v176_v25  ;;  %vm144_vm6 = vcmp.eq.s32.totalorder %v140_v24, %v125_v18  ;;  %v577_v24 = vld [vmem:[%s8725_s15] sm:$0xff]  ;;  %vm807_vm3 = vcmask 523264  }
  0x8f   :  { %v131_v27 = vpop.permute.xlu0 %130  ;;  %8025 = vmatpush3.bf16.msra.mxu0 %v8022_v9  ;;  %v146_v29 = vsel %vm144_vm6, 1.0, %v8617_v21 }
  0x90   :  { %vm133_vm7 = vcmp.eq.s32.totalorder %v131_v27, %v125_v18  ;;  %7333 = vmatprep.subr.msk.mxu0 %vm185_vm0, %v164_v26  ;;  %v148_v34 = vadd.f32 %v146_v29, %v134_v32  ;;  %v580_v32 = vld [vmem:[%s8725_s15 + $0x18] sm:$0xff] }
  0x91   :  { %v143_v28 = vpop.permute.xlu1 %142  ;;  %v135_v30 = vsel %vm133_vm7, 1.0, %v8617_v21 }
  0x92   :  { %vm145_vm9 = vcmp.eq.s32.totalorder %v143_v28, %v125_v18 }
  0x93   :  { %v147_v31 = vsel %vm145_vm9, 1.0, %v8617_v21  ;;  %7334 = vmatpush3.msk.msra.mxu0 %vm185_vm0, %v164_v26  ;;  %vm585_vm0 = vcmask 130048  }
  0x94   :  { %v152_v33 = vpop.permute.xlu0 %151  ;;  %v149_v36 = vadd.f32 %v147_v31, %v135_v30  ;;  %8035 = vmatprep.subr.bf16.mxu0 %v8034_v2  ;;  %v578_v30 = vld [vmem:[%s8725_s15 + $0x8] sm:$0xff]  ;;  %v579_v31 = vld [vmem:[%s8725_s15 + $0x10] sm:$0xff] }
  0x95   :  { %vm156_vm10 = vcmp.eq.s32.totalorder %v152_v33, %v125_v18  ;;  %v581_v33 = vld [vmem:[%s8725_s15 + $0x20] sm:$0xff] }
  0x96   :  { %v155_v35 = vpop.permute.xlu1 %154  ;;  %v158_v37 = vsel %vm156_vm10, 1.0, %v8617_v21  ;;  %vm8637_vm10 = vmmov 0  }
  0x97   :  { %vm157_vm11 = vcmp.eq.s32.totalorder %v155_v35, %v125_v18  ;;  %v160_v38 = vadd.f32 %v158_v37, %v148_v34  ;;  %v582_v34 = vld [vmem:[%s8725_s15 + $0x28] sm:$0xff]  ;;  %v583_v35 = vld [vmem:[%s8725_s15 + $0x30] sm:$0xff]  ;;  %v792_v37 = vld [vmem:[%s8750_s19] sm:$0xff] }
  0x98   :  { %v159_v39 = vsel %vm157_vm11, 1.0, %v8617_v21 }
  0x99   :  { %v161_v40 = vadd.f32 %v159_v39, %v149_v36  ;;  %7335 = vmatprep.mubr.msk.f32.mxu0 %vm264_vm12, %v160_v38  ;;  %v362_v41 = vpop.permute.xlu0 %361  ;;  %v584_v36 = vld [vmem:[%s8725_s15 + $0x38] sm:$0xff]  ;;  %v793_v38 = vld [vmem:[%s8750_s19 + $0x8] sm:$0xff] }
  0x9a   :  { %vm364_vm13 = vcmp.eq.s32.totalorder %v362_v41, 1  ;;  %v8046_v39 = vpack.c.bf16 %v793_v38, %v792_v37  ;;  %v908_v41 = vld [vmem:[%s8755_s23 + $0x8] sm:$0xff] }
  0x9b   :  { %7336 = vmatmul.mubr.msk.f32.vlgmr.msra.gmra.mrb[0].mxu0 %vm264_vm12, %v161_v40  ;;  %v359_v42 = vpop.permute.xlu1 %358  ;;  %v907_v40 = vld [vmem:[%s8755_s23] sm:$0xff] }
  0x9c   :  { %vm363_vm14 = vcmp.eq.s32.totalorder %v359_v42, 1  ;;  %8037 = vmatpush3.bf16.msra.mxu0 %v8034_v2  ;;  %v8062_v42 = vpack.c.bf16 %v908_v41, %v907_v40 }
  0x9d   :  { %8039 = vmatprep.subr.bf16.mxu0 %v8038_v6 }
  0xa0   :  { %8041 = vmatpush3.bf16.msra.mxu0 %v8038_v6  ;;  %v6473_v6 = vld [vmem:[%s8786_s2 + $0x1] ss:$0 sm:$0xff] }
  0xa1   :  { %8063 = vmatprep.subr.bf16.mxu0 %v8062_v42 }
 0x16e   :  { %v7337_v43 = vpop.f32.mrb[0].mxu0 }
 0x16f   :  { %v366_v44 = vsel %vm364_vm13, %v7337_v43, 0.0  ;;  %v340_v45 = vpop.f32.mrb[1].mxu0  ;;  %v794_v43 = vld [vmem:[%s8750_s19 + $0x10] sm:$0xff] }
 0x170   :  { %v365_v46 = vsel %vm363_vm14, %v340_v45, 0.0  ;;  %v371_v47 = vsel %vm367_vm15, %v366_v44, 0.0 }
 0x171   :  { %372 = vadd.xlane.f32.xlu0 %v371_v47  ;;  %v368_v48 = vsel %vm367_vm15, %v365_v46, 0.0  ;;  %v910_v47 = vld [vmem:[%s8755_s23 + $0x18] sm:$0xff] }
 0x172   :  { %369 = vadd.xlane.f32.xlu1 %v368_v48 }
 0x1fe   :  { %v373_v49 = vpop.xlane.xlu0 %372 }
 0x1ff   :  { %v376_v50 = vmul.f32 0.03125, %v373_v49  ;;  %v370_v51 = vpop.xlane.xlu1 %369  ;;  %v796_v49 = vld [vmem:[%s8750_s19 + $0x20] sm:$0xff] }
 0x200   :  { %v375_v52 = vmul.f32 0.03125, %v370_v51 }
 0x201   :  { %v378_v53 = vsub.f32 %v366_v44, %v376_v50  ;;  %v795_v44 = vld [vmem:[%s8750_s19 + $0x18] sm:$0xff]  ;;  %v797_v50 = vld [vmem:[%s8750_s19 + $0x28] sm:$0xff] }
 0x202   :  { %v377_v54 = vsub.f32 %v365_v46, %v375_v52  ;;  %v8050_v45 = vpack.c.bf16 %v795_v44, %v794_v43  ;;  %v909_v46 = vld [vmem:[%s8755_s23 + $0x10] sm:$0xff]  ;;  %v8054_v51 = vpack.c.bf16 %v797_v50, %v796_v49  ;;  %v911_v52 = vld [vmem:[%s8755_s23 + $0x20] sm:$0xff] }
 0x203   :  { %v380_v55 = vmul.f32 %v378_v53, %v378_v53  ;;  %v8066_v48 = vpack.c.bf16 %v910_v47, %v909_v46  ;;  %v992_v47 = vld [vmem:[%s8772_s27 + $0x10] sm:$0xff] }
 0x204   :  { %v379_v56 = vmul.f32 %v377_v54, %v377_v54 }
 0x205   :  { %v384_v57 = vsel %vm367_vm15, %v380_v55, 0.0  ;;  %v798_v55 = vld [vmem:[%s8750_s19 + $0x30] sm:$0xff] }
 0x206   :  { %385 = vadd.xlane.f32.xlu0 %v384_v57  ;;  %v381_v58 = vsel %vm367_vm15, %v379_v56, 0.0  ;;  %v799_v56 = vld [vmem:[%s8750_s19 + $0x38] sm:$0xff] }
 0x207   :  { %382 = vadd.xlane.f32.xlu1 %v381_v58  ;;  %v8058_v57 = vpack.c.bf16 %v799_v56, %v798_v55  ;;  %v913_v58 = vld [vmem:[%s8755_s23 + $0x30] sm:$0xff] }
 0x208   :  { %v8074_v60 = vpack.c.bf16 %v914_v59, %v913_v58  ;;  %v996_v56 = vld [vmem:[%s8772_s27 + $0x30] sm:$0xff]  ;;  %v8827_v59 = vld [vmem:[%s8824_s13] sm:$0xff] }
 0x293   :  { %v386_v7 = vpop.xlane.xlu0 %385 }
 0x294   :  { %v388_v8 = vmul.f32 0.03125, %v386_v7  ;;  %v383_v9 = vpop.xlane.xlu1 %382 }
 0x295   :  { %v387_v10 = vmul.f32 0.03125, %v383_v9 }
 0x296   :  { %v390_v11 = vadd.f32 1e-05, %v388_v8 }
 0x297   :  { %v389_v12 = vadd.f32 1e-05, %v387_v10 }
 0x298   :  { %8421 = vrsqrt.f32 %v390_v11 }
 0x299   :  { %8423 = vrsqrt.f32 %v389_v12 }
 0x2a2   :  { %v8422_v13 = vpop.eup %8421 }
 0x2a3   :  { %v8424_v15 = vpop.eup %8423  ;;  %v394_v16 = vmul.f32 %v8422_v13, %v378_v53  ;;  %v912_v53 = vld [vmem:[%s8755_s23 + $0x28] sm:$0xff]  ;;  %v6475_v13 = vld [vmem:[%s8786_s2 + $0x2] ss:$0 sm:$0xff] }
 0x2a4   :  { %v393_v17 = vmul.f32 %v8424_v15, %v377_v54  ;;  %v8070_v54 = vpack.c.bf16 %v912_v53, %v911_v52  ;;  %v994_v53 = vld [vmem:[%s8772_s27 + $0x20] sm:$0xff] }
 0x2a5   :  { %v403_v18 = vmul.f32 %v6456_v14, %v394_v16 }
 0x2a6   :  { %v402_v20 = vmul.f32 %v6456_v14, %v393_v17 }
 0x2a7   :  { %v412_v23 = vadd.f32 %v6457_v19, %v403_v18 }
 0x2a8   :  { %v411_v22 = vadd.f32 %v6457_v19, %v402_v20  ;;  %v6477_v20 = vld [vmem:[%s8786_s2 + $0x3] ss:$0 sm:$0xff] }
 0x2aa   :  { %7346 = vmatprep.mubr.msk.f32.mxu1 %vm367_vm15, %v411_v22  ;;  %7357 = vmatprep.mubr.msk.f32.mxu0 %vm367_vm15, %v411_v22 }
 0x2ab   :  { %7347 = vmatmul.mubr.msk.f32.vlgmr.msra.gmra.mrb[0].mxu1 %vm367_vm15, %v412_v23  ;;  %7358 = vmatmul.mubr.msk.f32.vlgmr.msra.gmra.mrb[2].mxu0 %vm367_vm15, %v412_v23 }
 0x2ac   :  { %7364 = vmatprep.mubr.msk.f32.mxu1 %vm585_vm0, %v577_v24  ;;  %8065 = vmatpush3.bf16.msra.mxu0 %v8062_v42 }
 0x2ad   :  { %8067 = vmatprep.subr.bf16.mxu0 %v8066_v48 }
 0x2b0   :  { %8069 = vmatpush3.bf16.msra.mxu0 %v8066_v48  ;;  %v993_v48 = vld [vmem:[%s8772_s27 + $0x18] sm:$0xff] }
 0x2b1   :  { %8071 = vmatprep.subr.bf16.mxu0 %v8070_v54  ;;  %v8082_v52 = vpack.c.bf16 %v993_v48, %v992_v47  ;;  %v8921_v47 = vld [vmem:[%s8824_s13 + $0x58] sm:$0xff]  ;;  %v8926_v48 = vld [vmem:[%s8824_s13 + $0x60] sm:$0xff] }
 0x2b4   :  { %8073 = vmatpush3.bf16.msra.mxu0 %v8070_v54  ;;  %v995_v54 = vld [vmem:[%s8772_s27 + $0x28] sm:$0xff] }
 0x2b5   :  { %8075 = vmatprep.subr.bf16.mxu0 %v8074_v60  ;;  %v8086_v55 = vpack.c.bf16 %v995_v54, %v994_v53  ;;  %v8949_v53 = vld [vmem:[%s8824_s13 + $0x78] sm:$0xff]  ;;  %v8954_v54 = vld [vmem:[%s8824_s13 + $0x80] sm:$0xff] }
 0x2b8   :  { %8077 = vmatpush3.bf16.msra.mxu0 %v8074_v60  ;;  %v6478_v60 = vld [vmem:[%s8836_s18] ss:$0 sm:$0xff] }
 0x37e   :  { %v7348_v25 = vpop.f32.mrb[0].mxu1  ;;  %v8729_v26 = vpop.f32.mrb[2].mxu0 }
 0x37f   :  { %v489_v27 = vpop.f32.mrb[1].mxu1  ;;  %v8731_v28 = vpop.f32.mrb[3].mxu0  ;;  %vm2648_vm5 = vcmp.ge.f32.partialorder %v8729_v26, 0.0 }
 0x380   :  { %v8042_v29 = vpack.c.bf16 %v7348_v25, %v489_v27  ;;  %vm2647_vm4 = vcmp.ge.f32.partialorder %v8731_v28, 0.0 }
 0x382   :  { %8043 = vmatprep.subr.bf16.mxu1 %v8042_v29 }
 0x383   :  { %8045 = vmatpush3.bf16.msra.mxu1 %v8042_v29 }
 0x384   :  { %8047 = vmatprep.subr.bf16.mxu1 %v8046_v39 }
 0x386   :  { %7365 = vmatmul.mubr.msk.f32.vlgmr.msra.gmra.mrb[2].mxu1 %vm585_vm0, %v578_v30 }
 0x387   :  { %7367 = vmatprep.mubr.msk.f32.mxu1 %vm585_vm0, %v579_v31  ;;  %8049 = vmatpush3.bf16.msra.mxu1 %v8046_v39 }
 0x388   :  { %8051 = vmatprep.subr.bf16.mxu1 %v8050_v45 }
 0x38a   :  { %7368 = vmatmul.mubr.msk.f32.gmra.mrb[4].mxu1 %vm585_vm0, %v580_v32 }
 0x38b   :  { %7370 = vmatprep.mubr.msk.f32.mxu1 %vm585_vm0, %v581_v33  ;;  %8053 = vmatpush3.bf16.msra.mxu1 %v8050_v45 }
 0x38c   :  { %8055 = vmatprep.subr.bf16.mxu1 %v8054_v51 }
 0x38e   :  { %7371 = vmatmul.mubr.msk.f32.gmra.mrb[6].mxu1 %vm585_vm0, %v582_v34 }
 0x38f   :  { %7373 = vmatprep.mubr.msk.f32.mxu1 %vm585_vm0, %v583_v35  ;;  %8057 = vmatpush3.bf16.msra.mxu1 %v8054_v51 }
 0x390   :  { %8059 = vmatprep.subr.bf16.mxu1 %v8058_v57 }
 0x392   :  { %7374 = vmatmul.mubr.msk.f32.gmra.mrb[8].mxu1 %vm585_vm0, %v584_v36 }
 0x393   :  { %8061 = vmatpush3.bf16.msra.mxu1 %v8058_v57  ;;  %v997_v57 = vld [vmem:[%s8772_s27 + $0x38] sm:$0xff] }
 0x394   :  { %8079 = vmatprep.subr.bf16.mxu1 %v8780_v63  ;;  %v8090_v58 = vpack.c.bf16 %v997_v57, %v996_v56  ;;  %v8968_v56 = vld [vmem:[%s8824_s13 + $0x90] sm:$0xff]  ;;  %v8977_v57 = vld [vmem:[%s8824_s13 + $0x98] sm:$0xff] }
 0x459   :  { %v7366_v1 = vpop.f32.mrb[2].mxu1 }
 0x45a   :  { %v731_v2 = vmul.f32 %v7366_v1, %v6471_v0  ;;  %v676_v3 = vpop.f32.mrb[3].mxu1 }
 0x45b   :  { %v730_v5 = vmul.f32 %v6471_v0, %v676_v3 }
 0x45c   :  { %v733_v8 = vadd.f32 %v6470_v4, %v731_v2 }
 0x45d   :  { %v7369_v7 = vpop.f32.mrb[4].mxu1  ;;  %v732_v11 = vadd.f32 %v6470_v4, %v730_v5 }
 0x45e   :  { %v743_v9 = vmul.f32 %v7369_v7, %v6473_v6  ;;  %v686_v10 = vpop.f32.mrb[5].mxu1 }
 0x45f   :  { %v742_v12 = vmul.f32 %v6473_v6, %v686_v10 }
 0x460   :  { %v745_v14 = vadd.f32 %v743_v9, %v733_v8 }
 0x461   :  { %v744_v15 = vadd.f32 %v742_v12, %v732_v11  ;;  %v7372_v16 = vpop.f32.mrb[6].mxu1 }
 0x462   :  { %v755_v17 = vmul.f32 %v7372_v16, %v6475_v13  ;;  %v696_v18 = vpop.f32.mrb[7].mxu1 }
 0x463   :  { %v754_v19 = vmul.f32 %v6475_v13, %v696_v18 }
 0x464   :  { %v757_v22 = vadd.f32 %v755_v17, %v745_v14 }
 0x465   :  { %v756_v23 = vadd.f32 %v754_v19, %v744_v15  ;;  %v7375_v24 = vpop.f32.mrb[8].mxu1 }
 0x466   :  { %v767_v25 = vmul.f32 %v7375_v24, %v6477_v20  ;;  %v706_v27 = vpop.f32.mrb[9].mxu1 }
 0x467   :  { %v766_v29 = vmul.f32 %v6477_v20, %v706_v27  ;;  %v2423_v27 = vld [vmem:[%s8846_s24 + $0x8] sm:$0xff] }
 0x468   :  { %v769_v30 = vadd.f32 %v767_v25, %v757_v22 }
 0x469   :  { %v768_v31 = vadd.f32 %v766_v29, %v756_v23  ;;  %v2425_v29 = vld [vmem:[%s8846_s24 + $0x18] sm:$0xff] }
 0x46a   :  { %v771_v32 = vand.u32 2147483647, %v769_v30  ;;  %vm785_vm1 = vcmp.ge.f32.partialorder %v769_v30, 0.0 }
 0x46b   :  { %v770_v33 = vand.u32 2147483647, %v768_v31  ;;  %vm784_vm2 = vcmp.ge.f32.partialorder %v768_v31, 0.0 }
 0x46c   :  { %v773_v34 = vsub.f32 0.0, %v771_v32 }
 0x46d   :  { %v772_v35 = vsub.f32 0.0, %v770_v33  ;;  %v8106_v33 = vpack.c.bf16 %v2425_v29, %v2423_v27  ;;  %v2042_v27 = vld [vmem:[%s9089_s30 + $0x20] sm:$0xff] }
 0x46e   :  { %v776_v36 = vmul.f32 1.442695, %v773_v34  ;;  %v2422_v34 = vld [vmem:[%s8846_s24] sm:$0xff] }
 0x46f   :  { %v774_v37 = vmul.f32 1.442695, %v772_v35  ;;  %v2424_v35 = vld [vmem:[%s8846_s24 + $0x10] sm:$0xff] }
 0x470   :  { %8425 = vpow2.f32 %v776_v36  ;;  %v8855_v36 = vld [vmem:[%s8824_s13 + $0x8] sm:$0xff] }
 0x471   :  { %8427 = vpow2.f32 %v774_v37  ;;  %v8858_v37 = vld [vmem:[%s8824_s13 + $0x10] sm:$0xff] }
 0x47a   :  { %v8426_v38 = vpop.eup %8425 }
 0x47b   :  { %v8428_v39 = vpop.eup %8427  ;;  %v779_v40 = vadd.f32 1.0, %v8426_v38  ;;  %v8108_v38 = vpack.c.bf16 %v2424_v35, %v2422_v34  ;;  %v2045_v35 = vld [vmem:[%s9089_s30 + $0x38] sm:$0xff] }
 0x47c   :  { %v778_v41 = vadd.f32 1.0, %v8428_v39  ;;  %v8865_v39 = vld [vmem:[%s8824_s13 + $0x18] sm:$0xff] }
 0x47d   :  { %8429 = vrcp.f32 %v779_v40  ;;  %v8870_v40 = vld [vmem:[%s8824_s13 + $0x20] sm:$0xff] }
 0x47e   :  { %8431 = vrcp.f32 %v778_v41  ;;  %v8879_v41 = vld [vmem:[%s8824_s13 + $0x28] sm:$0xff] }
 0x487   :  { %v8430_v42 = vpop.eup %8429 }
 0x488   :  { %v8432_v43 = vpop.eup %8431  ;;  %v787_v44 = vsub.f32 1.0, %v8430_v42 }
 0x489   :  { %v786_v45 = vsub.f32 1.0, %v8432_v43 }
 0x48a   :  { %v789_v46 = vsel %vm785_vm1, %v8430_v42, %v787_v44  ;;  %v8884_v42 = vld [vmem:[%s8824_s13 + $0x30] sm:$0xff]  ;;  %v8898_v44 = vld [vmem:[%s8824_s13 + $0x40] sm:$0xff] }
 0x48b   :  { %v788_v49 = vsel %vm784_vm2, %v8432_v43, %v786_v45  ;;  %v8802_v51 = vmul.f32 %v789_v46, %v769_v30  ;;  %v8893_v43 = vld [vmem:[%s8824_s13 + $0x38] sm:$0xff]  ;;  %v8907_v45 = vld [vmem:[%s8824_s13 + $0x48] sm:$0xff]  ;;  %v8912_v46 = vld [vmem:[%s8824_s13 + $0x50] sm:$0xff] }
 0x48c   :  { %v8800_v50 = vmul.f32 %v788_v49, %v768_v31  ;;  %v8935_v49 = vld [vmem:[%s8824_s13 + $0x68] sm:$0xff] }
 0x48e   :  { %7392 = vmatprep.mubr.msk.f32.mxu1 %vm807_vm3, %v8800_v50  ;;  %7411 = vmatprep.mubr.msk.f32.mxu0 %vm807_vm3, %v8800_v50 }
 0x48f   :  { %7393 = vmatmul.mubr.msk.f32.vlgmr.msra.gmra.mrb[10].mxu1 %vm807_vm3, %v8802_v51  ;;  %7412 = vmatmul.mubr.msk.f32.vlgmr.msra.gmra.mrb[4].mxu0 %vm807_vm3, %v8802_v51 }
 0x490   :  { %8081 = vmatpush3.bf16.msra.mxu1 %v8780_v63  ;;  %7430 = vmatprep.mubr.msk.f32.mxu1 %vm807_vm3, %v8800_v50 }
 0x491   :  { %8083 = vmatprep.subr.bf16.mxu1 %v8082_v52  ;;  %7437 = vmatprep.mubr.msk.f32.mxu0 %vm585_vm0, %v8827_v59 }
 0x494   :  { %8085 = vmatpush3.bf16.msra.mxu1 %v8082_v52  ;;  %v8940_v52 = vld [vmem:[%s8824_s13 + $0x70] sm:$0xff] }
 0x495   :  { %8087 = vmatprep.subr.bf16.mxu1 %v8086_v55 }
 0x498   :  { %8089 = vmatpush3.bf16.msra.mxu1 %v8086_v55  ;;  %v8963_v55 = vld [vmem:[%s8824_s13 + $0x88] sm:$0xff] }
 0x499   :  { %8091 = vmatprep.subr.bf16.mxu1 %v8090_v58 }
 0x49c   :  { %8093 = vmatpush3.bf16.msra.mxu1 %v8090_v58  ;;  %v8982_v58 = vld [vmem:[%s8824_s13 + $0xa0] sm:$0xff] }
 0x49f   :  { %7431 = vmatmul.mubr.msk.f32.vlgmr.msra.gmra.mrb[12].mxu1 %vm807_vm3, %v8802_v51 }
 0x4a0   :  { %7489 = vmatprep.mubr.msk.f32.mxu1 %vm585_vm0, %v8827_v59 }
 0x562   :  { %v7394_v61 = vpop.f32.mrb[10].mxu1  ;;  %v7413_v62 = vpop.f32.mrb[4].mxu0 }
 0x563   :  { %v886_v63 = vadd.f32 %v7394_v61, %v6478_v60  ;;  %v880_v0 = vpop.f32.mrb[11].mxu1  ;;  %v981_v1 = vpop.f32.mrb[5].mxu0  ;;  %v1095_v61 = vld [vmem:[%s8824_s13 + $0xb0] sm:$0xff] }
 0x564   :  { %v881_v2 = vadd.f32 %v6478_v60, %v880_v0  ;;  %v8102_v3 = vpack.c.bf16 %v7413_v62, %v981_v1  ;;  %v1094_v60 = vld [vmem:[%s8824_s13 + $0xa8] sm:$0xff]  ;;  %v1096_v62 = vld [vmem:[%s8824_s13 + $0xb8] sm:$0xff]  ;;  %v1099_v1 = vld [vmem:[%s8824_s13 + $0xd0] sm:$0xff] }
 0x565   :  { %v892_v4 = vand.u32 2147483647, %v886_v63  ;;  %v890_v18 = vmax.f32 %v886_v63, 0.0  ;;  %v1097_v63 = vld [vmem:[%s8824_s13 + $0xc0] sm:$0xff]  ;;  %v1098_v0 = vld [vmem:[%s8824_s13 + $0xc8] sm:$0xff] }
 0x566   :  { %v891_v5 = vand.u32 2147483647, %v881_v2  ;;  %v889_v20 = vmax.f32 %v881_v2, 0.0  ;;  %v1100_v2 = vld [vmem:[%s8824_s13 + $0xd8] sm:$0xff] }
 0x567   :  { %v894_v6 = vsub.f32 0.0, %v892_v4  ;;  %v1102_v4 = vld [vmem:[%s8824_s13 + $0xe8] sm:$0xff] }
 0x568   :  { %v893_v7 = vsub.f32 0.0, %v891_v5  ;;  %v1103_v5 = vld [vmem:[%s8824_s13 + $0xf0] sm:$0xff] }
 0x569   :  { %v897_v8 = vmul.f32 1.442695, %v894_v6  ;;  %v1104_v6 = vld [vmem:[%s8824_s13 + $0xf8] sm:$0xff] }
 0x56a   :  { %v895_v9 = vmul.f32 1.442695, %v893_v7  ;;  %v2038_v7 = vld [vmem:[%s9089_s30] sm:$0xff] }
 0x56b   :  { %8433 = vpow2.f32 %v897_v8 }
 0x56c   :  { %8435 = vpow2.f32 %v895_v9 }
 0x572   :  { %v8839_v10 = vpop.f32.mrb[12].mxu1 }
 0x573   :  { %v8841_v11 = vpop.f32.mrb[13].mxu1 }
 0x575   :  { %v8434_v12 = vpop.eup %8433 }
 0x576   :  { %v8436_v13 = vpop.eup %8435  ;;  %v900_v14 = vadd.f32 1.0, %v8434_v12  ;;  %v2041_v12 = vld [vmem:[%s9089_s30 + $0x18] sm:$0xff] }
 0x577   :  { %v899_v15 = vadd.f32 1.0, %v8436_v13 }
 0x578   :  { %8437 = vlog2.f32 %v900_v14 }
 0x579   :  { %8439 = vlog2.f32 %v899_v15  ;;  %v2040_v15 = vld [vmem:[%s9089_s30 + $0x10] sm:$0xff] }
 0x582   :  { %v8438_v16 = vpop.eup %8437 }
 0x583   :  { %v8440_v17 = vpop.eup %8439  ;;  %v904_v19 = vmul.f32 0.6931472, %v8438_v16 }
 0x584   :  { %v902_v22 = vmul.f32 0.6931472, %v8440_v17 }
 0x585   :  { %v906_v23 = vadd.f32 %v904_v19, %v890_v18 }
 0x586   :  { %v905_v24 = vadd.f32 %v902_v22, %v889_v20 }
 0x587   :  { %v1427_v25 = vmul.f32 %v906_v23, %v8802_v51 }
 0x588   :  { %v8094_v30 = vpack.c.bf16 %v906_v23, %v905_v24  ;;  %v1426_v31 = vmul.f32 %v905_v24, %v8800_v50  ;;  %v2043_v23 = vld [vmem:[%s9089_s30 + $0x28] sm:$0xff] }
 0x58a   :  { %8095 = vmatprep.subr.bf16.mxu0 %v8094_v30  ;;  %v8098_v32 = vpack.c.bf16 %v1427_v25, %v1426_v31 }
 0x58b   :  { %8097 = vmatpush3.bf16.msra.mxu0 %v8094_v30 }
 0x58c   :  { %8099 = vmatprep.subr.bf16.mxu1 %v8098_v32  ;;  %8103 = vmatprep.subr.bf16.mxu0 %v8102_v3 }
 0x58d   :  { %8101 = vmatpush3.bf16.msra.mxu1 %v8098_v32 }
 0x58e   :  { %7438 = vmatmul.mubr.msk.f32.vlgmr.msra.gmra.mrb[6].mxu0 %vm585_vm0, %v8855_v36  ;;  %8107 = vmatprep.subr.bf16.mxu1 %v8106_v33 }
 0x58f   :  { %8105 = vmatpush3.bf16.msra.mxu0 %v8102_v3  ;;  %7440 = vmatprep.mubr.msk.f32.mxu0 %vm585_vm0, %v8858_v37  ;;  %v1101_v3 = vld [vmem:[%s8824_s13 + $0xe0] sm:$0xff] }
 0x590   :  { %7490 = vmatmul.mubr.msk.f32.vlgmr.msra.gmra.mrb[14].mxu1 %vm585_vm0, %v8855_v36 }
 0x591   :  { %7492 = vmatprep.mubr.msk.f32.mxu1 %vm585_vm0, %v8858_v37  ;;  %8109 = vmatpush1.bf16.msra.mxu1 %v8108_v38  ;;  %v2044_v38 = vld [vmem:[%s9089_s30 + $0x30] sm:$0xff] }
 0x592   :  { %7441 = vmatmul.mubr.msk.f32.gmra.mrb[8].mxu0 %vm585_vm0, %v8865_v39 }
 0x593   :  { %7443 = vmatprep.mubr.msk.f32.mxu0 %vm585_vm0, %v8870_v40 }
 0x594   :  { %7493 = vmatmul.mubr.msk.f32.gmra.mrb[16].mxu1 %vm585_vm0, %v8865_v39 }
 0x595   :  { %7495 = vmatprep.mubr.msk.f32.mxu1 %vm585_vm0, %v8870_v40 }
 0x596   :  { %7444 = vmatmul.mubr.msk.f32.gmra.mrb[10].mxu0 %vm585_vm0, %v8879_v41 }
 0x597   :  { %7446 = vmatprep.mubr.msk.f32.mxu0 %vm585_vm0, %v8884_v42 }
 0x598   :  { %7496 = vmatmul.mubr.msk.f32.gmra.mrb[18].mxu1 %vm585_vm0, %v8879_v41 }
 0x599   :  { %7498 = vmatprep.mubr.msk.f32.mxu1 %vm585_vm0, %v8884_v42 }
 0x59a   :  { %7447 = vmatmul.mubr.msk.f32.gmra.mrb[12].mxu0 %vm585_vm0, %v8893_v43 }
 0x59b   :  { %7449 = vmatprep.mubr.msk.f32.mxu0 %vm585_vm0, %v8898_v44 }
 0x59c   :  { %7499 = vmatmul.mubr.msk.f32.gmra.mrb[20].mxu1 %vm585_vm0, %v8893_v43 }
 0x59d   :  { %7501 = vmatprep.mubr.msk.f32.mxu1 %vm585_vm0, %v8898_v44 }
 0x59e   :  { %7450 = vmatmul.mubr.msk.f32.gmra.mrb[14].mxu0 %vm585_vm0, %v8907_v45 }
 0x59f   :  { %7452 = vmatprep.mubr.msk.f32.mxu0 %vm585_vm0, %v8912_v46 }
 0x5a0   :  { %7502 = vmatmul.mubr.msk.f32.gmra.mrb[22].mxu1 %vm585_vm0, %v8907_v45 }
 0x5a1   :  { %7504 = vmatprep.mubr.msk.f32.mxu1 %vm585_vm0, %v8912_v46 }
 0x5a2   :  { %7453 = vmatmul.mubr.msk.f32.gmra.mrb[16].mxu0 %vm585_vm0, %v8921_v47 }
 0x5a3   :  { %7455 = vmatprep.mubr.msk.f32.mxu0 %vm585_vm0, %v8926_v48 }
 0x5a4   :  { %7505 = vmatmul.mubr.msk.f32.gmra.mrb[24].mxu1 %vm585_vm0, %v8921_v47 }
 0x5a5   :  { %7507 = vmatprep.mubr.msk.f32.mxu1 %vm585_vm0, %v8926_v48 }
 0x5a6   :  { %7456 = vmatmul.mubr.msk.f32.gmra.mrb[18].mxu0 %vm585_vm0, %v8935_v49 }
 0x5a7   :  { %7458 = vmatprep.mubr.msk.f32.mxu0 %vm585_vm0, %v8940_v52 }
 0x5a8   :  { %7508 = vmatmul.mubr.msk.f32.gmra.mrb[26].mxu1 %vm585_vm0, %v8935_v49 }
 0x5a9   :  { %7510 = vmatprep.mubr.msk.f32.mxu1 %vm585_vm0, %v8940_v52 }
 0x5aa   :  { %7459 = vmatmul.mubr.msk.f32.gmra.mrb[20].mxu0 %vm585_vm0, %v8949_v53 }
 0x5ab   :  { %7461 = vmatprep.mubr.msk.f32.mxu0 %vm585_vm0, %v8954_v54 }
 0x5ac   :  { %7511 = vmatmul.mubr.msk.f32.gmra.mrb[28].mxu1 %vm585_vm0, %v8949_v53 }
 0x5ad   :  { %7513 = vmatprep.mubr.msk.f32.mxu1 %vm585_vm0, %v8954_v54 }
 0x5ae   :  { %7462 = vmatmul.mubr.msk.f32.gmra.mrb[22].mxu0 %vm585_vm0, %v8963_v55 }
 0x5af   :  { %7464 = vmatprep.mubr.msk.f32.mxu0 %vm585_vm0, %v8968_v56 }
 0x5b0   :  { %7514 = vmatmul.mubr.msk.f32.gmra.mrb[30].mxu1 %vm585_vm0, %v8963_v55 }
 0x5b1   :  { %7516 = vmatprep.mubr.msk.f32.mxu1 %vm585_vm0, %v8968_v56 }
 0x5b2   :  { %7465 = vmatmul.mubr.msk.f32.gmra.mrb[24].mxu0 %vm585_vm0, %v8977_v57 }
 0x5b3   :  { %7467 = vmatprep.mubr.msk.f32.mxu0 %vm585_vm0, %v8982_v58 }
 0x5b4   :  { %7517 = vmatmul.mubr.msk.f32.gmra.mrb[32].mxu1 %vm585_vm0, %v8977_v57 }
 0x5b5   :  { %7519 = vmatprep.mubr.msk.f32.mxu1 %vm585_vm0, %v8982_v58 }
 0x5b6   :  { %7468 = vmatmul.mubr.msk.f32.gmra.mrb[26].mxu0 %vm585_vm0, %v1094_v60 }
 0x5b7   :  { %7470 = vmatprep.mubr.msk.f32.mxu0 %vm585_vm0, %v1095_v61 }
 0x5b8   :  { %7520 = vmatmul.mubr.msk.f32.gmra.mrb[34].mxu1 %vm585_vm0, %v1094_v60 }
 0x5b9   :  { %7522 = vmatprep.mubr.msk.f32.mxu1 %vm585_vm0, %v1095_v61 }
 0x5ba   :  { %7471 = vmatmul.mubr.msk.f32.gmra.mrb[28].mxu0 %vm585_vm0, %v1096_v62 }
 0x5bb   :  { %7473 = vmatprep.mubr.msk.f32.mxu0 %vm585_vm0, %v1097_v63 }
 0x5bc   :  { %7523 = vmatmul.mubr.msk.f32.gmra.mrb[36].mxu1 %vm585_vm0, %v1096_v62 }
 0x5bd   :  { %7525 = vmatprep.mubr.msk.f32.mxu1 %vm585_vm0, %v1097_v63 }
 0x5be   :  { %7474 = vmatmul.mubr.msk.f32.gmra.mrb[30].mxu0 %vm585_vm0, %v1098_v0 }
 0x5bf   :  { %7476 = vmatprep.mubr.msk.f32.mxu0 %vm585_vm0, %v1099_v1 }
 0x5c0   :  { %7526 = vmatmul.mubr.msk.f32.gmra.mrb[38].mxu1 %vm585_vm0, %v1098_v0 }
 0x5c1   :  { %7528 = vmatprep.mubr.msk.f32.mxu1 %vm585_vm0, %v1099_v1 }
 0x5c2   :  { %7477 = vmatmul.mubr.msk.f32.gmra.mrb[32].mxu0 %vm585_vm0, %v1100_v2 }
 0x5c3   :  { %7479 = vmatprep.mubr.msk.f32.mxu0 %vm585_vm0, %v1101_v3 }
 0x5c4   :  { %7529 = vmatmul.mubr.msk.f32.gmra.mrb[40].mxu1 %vm585_vm0, %v1100_v2 }
 0x5c5   :  { %7531 = vmatprep.mubr.msk.f32.mxu1 %vm585_vm0, %v1101_v3 }
 0x5c6   :  { %7480 = vmatmul.mubr.msk.f32.gmra.mrb[34].mxu0 %vm585_vm0, %v1102_v4 }
 0x5c7   :  { %7482 = vmatprep.mubr.msk.f32.mxu0 %vm585_vm0, %v1103_v5 }
 0x5c8   :  { %7532 = vmatmul.mubr.msk.f32.gmra.mrb[42].mxu1 %vm585_vm0, %v1102_v4 }
 0x5c9   :  { %7534 = vmatprep.mubr.msk.f32.mxu1 %vm585_vm0, %v1103_v5 }
 0x5ca   :  { %7483 = vmatmul.mubr.msk.f32.gmra.mrb[36].mxu0 %vm585_vm0, %v1104_v6 }
 0x5cb   :  { %7541 = vmatprep.mubr.msk.f32.mxu0 %vm585_vm0, %v8827_v59  ;;  %v2039_v59 = vld [vmem:[%s9089_s30 + $0x8] sm:$0xff] }
 0x5cc   :  { %7535 = vmatmul.mubr.msk.f32.gmra.mrb[44].mxu1 %vm585_vm0, %v1104_v6 }
 0x5cd   :  { %2496 = vmatprep.mubr.f32.mxu1 %v8617_v21 }
 0x5ce   :  { %7542 = vmatmul.mubr.msk.f32.vlgmr.msra.gmra.mrb[38].mxu0 %vm585_vm0, %v8855_v36 }
 0x5cf   :  { %7544 = vmatprep.mubr.msk.f32.mxu0 %vm585_vm0, %v8858_v37 }
 0x5d0   :  { %6581 = vmatmul.mubr.msk.f32.vlgmr.msra.gmra.mrb[46].mxu1 %vm585_vm0, %v8841_v11 }
 0x5d1   :  { %2502 = vmatprep.mubr.f32.mxu1 %v8617_v21 }
 0x5d2   :  { %7545 = vmatmul.mubr.msk.f32.gmra.mrb[40].mxu0 %vm585_vm0, %v8865_v39 }
 0x5d3   :  { %7547 = vmatprep.mubr.msk.f32.mxu0 %vm585_vm0, %v8870_v40 }
 0x5d4   :  { %6582 = vmatmul.mubr.msk.f32.gmra.mrb[48].mxu1 %vm585_vm0, %v8839_v10 }
 0x5d6   :  { %7548 = vmatmul.mubr.msk.f32.gmra.mrb[42].mxu0 %vm585_vm0, %v8879_v41 }
 0x5d7   :  { %7550 = vmatprep.mubr.msk.f32.mxu0 %vm585_vm0, %v8884_v42 }
 0x5da   :  { %7551 = vmatmul.mubr.msk.f32.gmra.mrb[44].mxu0 %vm585_vm0, %v8893_v43 }
 0x5db   :  { %7553 = vmatprep.mubr.msk.f32.mxu0 %vm585_vm0, %v8898_v44 }
 0x5de   :  { %7554 = vmatmul.mubr.msk.f32.gmra.mrb[46].mxu0 %vm585_vm0, %v8907_v45  ;;  %v2047_v45 = vld [vmem:[%s9089_s30 + $0x48] sm:$0xff] }
 0x5df   :  { %7556 = vmatprep.mubr.msk.f32.mxu0 %vm585_vm0, %v8912_v46 }
 0x5e2   :  { %7557 = vmatmul.mubr.msk.f32.gmra.mrb[48].mxu0 %vm585_vm0, %v8921_v47 }
 0x5e3   :  { %7559 = vmatprep.mubr.msk.f32.mxu0 %vm585_vm0, %v8926_v48 }
 0x5e6   :  { %7560 = vmatmul.mubr.msk.f32.gmra.mrb[50].mxu0 %vm585_vm0, %v8935_v49  ;;  %v2046_v49 = vld [vmem:[%s9089_s30 + $0x40] sm:$0xff] }
 0x5e7   :  { %7562 = vmatprep.mubr.msk.f32.mxu0 %vm585_vm0, %v8940_v52 }
 0x5ea   :  { %7563 = vmatmul.mubr.msk.f32.gmra.mrb[52].mxu0 %vm585_vm0, %v8949_v53 }
 0x5eb   :  { %7565 = vmatprep.mubr.msk.f32.mxu0 %vm585_vm0, %v8954_v54 }
 0x5ee   :  { %7566 = vmatmul.mubr.msk.f32.gmra.mrb[54].mxu0 %vm585_vm0, %v8963_v55 }
 0x5ef   :  { %7568 = vmatprep.mubr.msk.f32.mxu0 %vm585_vm0, %v8968_v56 }
 0x5f2   :  { %7569 = vmatmul.mubr.msk.f32.gmra.mrb[56].mxu0 %vm585_vm0, %v8977_v57 }
 0x5f3   :  { %7571 = vmatprep.mubr.msk.f32.mxu0 %vm585_vm0, %v8982_v58 }
 0x5f6   :  { %7572 = vmatmul.mubr.msk.f32.gmra.mrb[58].mxu0 %vm585_vm0, %v1094_v60  ;;  %v2049_v60 = vld [vmem:[%s9089_s30 + $0x58] sm:$0xff] }
 0x5f7   :  { %7574 = vmatprep.mubr.msk.f32.mxu0 %vm585_vm0, %v1095_v61 }
 0x5fa   :  { %7575 = vmatmul.mubr.msk.f32.gmra.mrb[60].mxu0 %vm585_vm0, %v1096_v62 }
 0x5fb   :  { %7577 = vmatprep.mubr.msk.f32.mxu0 %vm585_vm0, %v1097_v63 }
 0x5fe   :  { %7578 = vmatmul.mubr.msk.f32.gmra.mrb[62].mxu0 %vm585_vm0, %v1098_v0  ;;  %v2048_v0 = vld [vmem:[%s9089_s30 + $0x50] sm:$0xff] }
 0x5ff   :  { %7580 = vmatprep.mubr.msk.f32.mxu0 %vm585_vm0, %v1099_v1 }
 0x602   :  { %7581 = vmatmul.mubr.msk.f32.gmra.mrb[64].mxu0 %vm585_vm0, %v1100_v2 }
 0x603   :  { %7583 = vmatprep.mubr.msk.f32.mxu0 %vm585_vm0, %v1101_v3 }
 0x606   :  { %7584 = vmatmul.mubr.msk.f32.gmra.mrb[66].mxu0 %vm585_vm0, %v1102_v4 }
 0x607   :  { %7586 = vmatprep.mubr.msk.f32.mxu0 %vm585_vm0, %v1103_v5 }
 0x60a   :  { %7587 = vmatmul.mubr.msk.f32.gmra.mrb[68].mxu0 %vm585_vm0, %v1104_v6 }
 0x661   :  { %v7439_v8 = vpop.f32.mrb[6].mxu0 }
 0x662   :  { %v2071_v9 = vmul.f32 %v7439_v8, %v2039_v59  ;;  %v1267_v10 = vpop.f32.mrb[7].mxu0 }
 0x663   :  { %v2070_v11 = vmul.f32 %v2038_v7, %v1267_v10  ;;  %v9094_v13 = vpop.f32.mrb[14].mxu1  ;;  %v2051_v7 = vld [vmem:[%s9089_s30 + $0x68] sm:$0xff] }
 0x664   :  { %v2104_v14 = vmul.f32 1.442695, %v2071_v9  ;;  %v9097_v16 = vpop.f32.mrb[15].mxu1 }
 0x665   :  { %v2102_v17 = vmul.f32 1.442695, %v2070_v11  ;;  %v7442_v18 = vpop.f32.mrb[8].mxu0  ;;  %v2050_v11 = vld [vmem:[%s9089_s30 + $0x60] sm:$0xff] }
 0x666   :  { %8441 = vpow2.f32 %v2104_v14  ;;  %v2073_v19 = vmul.f32 %v7442_v18, %v2041_v12  ;;  %v1277_v20 = vpop.f32.mrb[9].mxu0 }
 0x667   :  { %8443 = vpow2.f32 %v2102_v17  ;;  %v2072_v22 = vmul.f32 %v2040_v15, %v1277_v20  ;;  %v9100_v24 = vpop.f32.mrb[16].mxu1 }
 0x668   :  { %v2108_v25 = vmul.f32 1.442695, %v2073_v19  ;;  %v9103_v29 = vpop.f32.mrb[17].mxu1 }
 0x669   :  { %v2106_v30 = vmul.f32 1.442695, %v2072_v22  ;;  %v7445_v31 = vpop.f32.mrb[10].mxu0  ;;  %v2053_v22 = vld [vmem:[%s9089_s30 + $0x78] sm:$0xff] }
 0x66a   :  { %8445 = vpow2.f32 %v2108_v25  ;;  %v2075_v32 = vmul.f32 %v7445_v31, %v2043_v23  ;;  %v1287_v33 = vpop.f32.mrb[11].mxu0 }
 0x66b   :  { %8447 = vpow2.f32 %v2106_v30  ;;  %v2074_v34 = vmul.f32 %v2042_v27, %v1287_v33  ;;  %v9106_v36 = vpop.f32.mrb[18].mxu1  ;;  %v2052_v30 = vld [vmem:[%s9089_s30 + $0x70] sm:$0xff] }
 0x66c   :  { %v2112_v37 = vmul.f32 1.442695, %v2075_v32  ;;  %v9109_v39 = vpop.f32.mrb[19].mxu1 }
 0x66d   :  { %v2110_v40 = vmul.f32 1.442695, %v2074_v34  ;;  %v7448_v41 = vpop.f32.mrb[12].mxu0 }
 0x66e   :  { %8449 = vpow2.f32 %v2112_v37  ;;  %v2077_v42 = vmul.f32 %v7448_v41, %v2045_v35  ;;  %v1297_v43 = vpop.f32.mrb[13].mxu0 }
 0x66f   :  { %8451 = vpow2.f32 %v2110_v40  ;;  %v2076_v44 = vmul.f32 %v2044_v38, %v1297_v43  ;;  %v9112_v46 = vpop.f32.mrb[20].mxu1  ;;  %v2055_v40 = vld [vmem:[%s9089_s30 + $0x88] sm:$0xff] }
 0x670   :  { %v8442_v47 = vpop.eup %8441  ;;  %v2116_v48 = vmul.f32 1.442695, %v2077_v42  ;;  %v9115_v52 = vpop.f32.mrb[21].mxu1 }
 0x671   :  { %v8444_v53 = vpop.eup %8443  ;;  %2167 = vst.msk [vmem:[#allocation2 + $0x8] sm:$0xff] %vm807_vm3, %v8442_v47  ;;  %v2114_v54 = vmul.f32 1.442695, %v2076_v44  ;;  %v7451_v55 = vpop.f32.mrb[14].mxu0  ;;  %v2054_v44 = vld [vmem:[%s9089_s30 + $0x80] sm:$0xff] }
 0x672   :  { %2166 = vst.msk [vmem:[#allocation2] sm:$0xff] %vm807_vm3, %v8444_v53  ;;  %8453 = vpow2.f32 %v2116_v48  ;;  %v2079_v56 = vmul.f32 %v7451_v55, %v2047_v45  ;;  %v1307_v57 = vpop.f32.mrb[15].mxu0 }
 0x673   :  { %8455 = vpow2.f32 %v2114_v54  ;;  %v2078_v58 = vmul.f32 %v2046_v49, %v1307_v57  ;;  %v9120_v61 = vpop.f32.mrb[22].mxu1 }
 0x674   :  { %v8446_v62 = vpop.eup %8445  ;;  %v2120_v63 = vmul.f32 1.442695, %v2079_v56  ;;  %v9123_v1 = vpop.f32.mrb[23].mxu1  ;;  %v2057_v56 = vld [vmem:[%s9089_s30 + $0x98] sm:$0xff] }
 0x675   :  { %v8448_v2 = vpop.eup %8447  ;;  %2169 = vst.msk [vmem:[#allocation2 + $0x18] sm:$0xff] %vm807_vm3, %v8446_v62  ;;  %v2118_v3 = vmul.f32 1.442695, %v2078_v58  ;;  %v7454_v4 = vpop.f32.mrb[16].mxu0  ;;  %v2056_v62 = vld [vmem:[%s9089_s30 + $0x90] sm:$0xff] }
 0x676   :  { %2168 = vst.msk [vmem:[#allocation2 + $0x10] sm:$0xff] %vm807_vm3, %v8448_v2  ;;  %8457 = vpow2.f32 %v2120_v63  ;;  %v2081_v5 = vmul.f32 %v7454_v4, %v2049_v60  ;;  %v1317_v6 = vpop.f32.mrb[17].mxu0 }
 0x677   :  { %8459 = vpow2.f32 %v2118_v3  ;;  %v2080_v59 = vmul.f32 %v2048_v0, %v1317_v6  ;;  %v9128_v8 = vpop.f32.mrb[24].mxu1 }
 0x678   :  { %v8450_v9 = vpop.eup %8449  ;;  %v2124_v10 = vmul.f32 1.442695, %v2081_v5  ;;  %v9131_v12 = vpop.f32.mrb[25].mxu1 }
 0x679   :  { %v8452_v14 = vpop.eup %8451  ;;  %2171 = vst.msk [vmem:[#allocation2 + $0x28] sm:$0xff] %vm807_vm3, %v8450_v9  ;;  %v2122_v15 = vmul.f32 1.442695, %v2080_v59  ;;  %v7457_v17 = vpop.f32.mrb[18].mxu0  ;;  %v2059_v59 = vld [vmem:[%s9089_s30 + $0xa8] sm:$0xff] }
 0x67a   :  { %2170 = vst.msk [vmem:[#allocation2 + $0x20] sm:$0xff] %vm807_vm3, %v8452_v14  ;;  %8461 = vpow2.f32 %v2124_v10  ;;  %v2083_v18 = vmul.f32 %v7457_v17, %v2051_v7  ;;  %v1327_v19 = vpop.f32.mrb[19].mxu0 }
 0x67b   :  { %8463 = vpow2.f32 %v2122_v15  ;;  %v2082_v20 = vmul.f32 %v2050_v11, %v1327_v19  ;;  %v9136_v23 = vpop.f32.mrb[26].mxu1  ;;  %v2058_v11 = vld [vmem:[%s9089_s30 + $0xa0] sm:$0xff] }
 0x67c   :  { %v8454_v25 = vpop.eup %8453  ;;  %v2128_v27 = vmul.f32 1.442695, %v2083_v18  ;;  %v9139_v31 = vpop.f32.mrb[27].mxu1 }
 0x67d   :  { %v8456_v32 = vpop.eup %8455  ;;  %2173 = vst.msk [vmem:[#allocation2 + $0x38] sm:$0xff] %vm807_vm3, %v8454_v25  ;;  %v2126_v33 = vmul.f32 1.442695, %v2082_v20  ;;  %v7460_v34 = vpop.f32.mrb[20].mxu0  ;;  %v2061_v25 = vld [vmem:[%s9089_s30 + $0xb8] sm:$0xff] }
 0x67e   :  { %2172 = vst.msk [vmem:[#allocation2 + $0x30] sm:$0xff] %vm807_vm3, %v8456_v32  ;;  %8465 = vpow2.f32 %v2128_v27  ;;  %v2085_v35 = vmul.f32 %v7460_v34, %v2053_v22  ;;  %v1337_v37 = vpop.f32.mrb[21].mxu0 }
 0x67f   :  { %8467 = vpow2.f32 %v2126_v33  ;;  %v2084_v38 = vmul.f32 %v2052_v30, %v1337_v37  ;;  %v9144_v41 = vpop.f32.mrb[28].mxu1  ;;  %v2060_v33 = vld [vmem:[%s9089_s30 + $0xb0] sm:$0xff] }
 0x680   :  { %v8458_v42 = vpop.eup %8457  ;;  %v2132_v43 = vmul.f32 1.442695, %v2085_v35  ;;  %v9147_v45 = vpop.f32.mrb[29].mxu1 }
 0x681   :  { %v8460_v47 = vpop.eup %8459  ;;  %2175 = vst.msk [vmem:[#allocation2 + $0x48] sm:$0xff] %vm807_vm3, %v8458_v42  ;;  %v2130_v48 = vmul.f32 1.442695, %v2084_v38  ;;  %v7463_v49 = vpop.f32.mrb[22].mxu0 }
 0x682   :  { %2174 = vst.msk [vmem:[#allocation2 + $0x40] sm:$0xff] %vm807_vm3, %v8460_v47  ;;  %8469 = vpow2.f32 %v2132_v43  ;;  %v2087_v53 = vmul.f32 %v7463_v49, %v2055_v40  ;;  %v1347_v54 = vpop.f32.mrb[23].mxu0 }
 0x683   :  { %8471 = vpow2.f32 %v2130_v48  ;;  %v2086_v55 = vmul.f32 %v2054_v44, %v1347_v54  ;;  %v9152_v57 = vpop.f32.mrb[30].mxu1  ;;  %v2063_v44 = vld [vmem:[%s9089_s30 + $0xc8] sm:$0xff] }
 0x684   :  { %v8462_v58 = vpop.eup %8461  ;;  %v2136_v60 = vmul.f32 1.442695, %v2087_v53  ;;  %v9155_v63 = vpop.f32.mrb[31].mxu1  ;;  %v2062_v53 = vld [vmem:[%s9089_s30 + $0xc0] sm:$0xff] }
 0x685   :  { %v8464_v0 = vpop.eup %8463  ;;  %2177 = vst.msk [vmem:[#allocation2 + $0x58] sm:$0xff] %vm807_vm3, %v8462_v58  ;;  %v2134_v2 = vmul.f32 1.442695, %v2086_v55  ;;  %v7466_v3 = vpop.f32.mrb[24].mxu0 }
 0x686   :  { %2176 = vst.msk [vmem:[#allocation2 + $0x50] sm:$0xff] %vm807_vm3, %v8464_v0  ;;  %8473 = vpow2.f32 %v2136_v60  ;;  %v2089_v4 = vmul.f32 %v7466_v3, %v2057_v56  ;;  %v1357_v5 = vpop.f32.mrb[25].mxu0 }
 0x687   :  { %8475 = vpow2.f32 %v2134_v2  ;;  %v2088_v6 = vmul.f32 %v2056_v62, %v1357_v5  ;;  %v9160_v7 = vpop.f32.mrb[32].mxu1  ;;  %v2065_v2 = vld [vmem:[%s9089_s30 + $0xd8] sm:$0xff] }
 0x688   :  { %v8466_v9 = vpop.eup %8465  ;;  %v2140_v10 = vmul.f32 1.442695, %v2089_v4  ;;  %v9163_v14 = vpop.f32.mrb[33].mxu1 }
 0x689   :  { %v8468_v15 = vpop.eup %8467  ;;  %2179 = vst.msk [vmem:[#allocation2 + $0x68] sm:$0xff] %vm807_vm3, %v8466_v9  ;;  %v2138_v17 = vmul.f32 1.442695, %v2088_v6  ;;  %v7469_v18 = vpop.f32.mrb[26].mxu0  ;;  %v2064_v6 = vld [vmem:[%s9089_s30 + $0xd0] sm:$0xff] }
 0x68a   :  { %2178 = vst.msk [vmem:[#allocation2 + $0x60] sm:$0xff] %vm807_vm3, %v8468_v15  ;;  %8477 = vpow2.f32 %v2140_v10  ;;  %v2091_v19 = vmul.f32 %v7469_v18, %v2059_v59  ;;  %v1367_v20 = vpop.f32.mrb[27].mxu0 }
 0x68b   :  { %8479 = vpow2.f32 %v2138_v17  ;;  %v2090_v22 = vmul.f32 %v2058_v11, %v1367_v20  ;;  %v9168_v27 = vpop.f32.mrb[34].mxu1 }
 0x68c   :  { %v8470_v30 = vpop.eup %8469  ;;  %v2144_v32 = vmul.f32 1.442695, %v2091_v19  ;;  %v9171_v34 = vpop.f32.mrb[35].mxu1  ;;  %v2067_v19 = vld [vmem:[%s9089_s30 + $0xe8] sm:$0xff] }
 0x68d   :  { %v8472_v35 = vpop.eup %8471  ;;  %2181 = vst.msk [vmem:[#allocation2 + $0x78] sm:$0xff] %vm807_vm3, %v8470_v30  ;;  %v2142_v37 = vmul.f32 1.442695, %v2090_v22  ;;  %v7472_v38 = vpop.f32.mrb[28].mxu0  ;;  %v2066_v30 = vld [vmem:[%s9089_s30 + $0xe0] sm:$0xff] }
 0x68e   :  { %2180 = vst.msk [vmem:[#allocation2 + $0x70] sm:$0xff] %vm807_vm3, %v8472_v35  ;;  %8481 = vpow2.f32 %v2144_v32  ;;  %v2093_v40 = vmul.f32 %v7472_v38, %v2061_v25  ;;  %v1377_v42 = vpop.f32.mrb[29].mxu0 }
 0x68f   :  { %8483 = vpow2.f32 %v2142_v37  ;;  %v2092_v43 = vmul.f32 %v2060_v33, %v1377_v42  ;;  %v9176_v47 = vpop.f32.mrb[36].mxu1 }
 0x690   :  { %v8474_v48 = vpop.eup %8473  ;;  %v2148_v49 = vmul.f32 1.442695, %v2093_v40  ;;  %v9179_v54 = vpop.f32.mrb[37].mxu1 }
 0x691   :  { %v8476_v55 = vpop.eup %8475  ;;  %2183 = vst.msk [vmem:[#allocation2 + $0x88] sm:$0xff] %vm807_vm3, %v8474_v48  ;;  %v2146_v56 = vmul.f32 1.442695, %v2092_v43  ;;  %v7475_v58 = vpop.f32.mrb[30].mxu0  ;;  %v2069_v43 = vld [vmem:[%s9089_s30 + $0xf8] sm:$0xff] }
 0x692   :  { %2182 = vst.msk [vmem:[#allocation2 + $0x80] sm:$0xff] %vm807_vm3, %v8476_v55  ;;  %8485 = vpow2.f32 %v2148_v49  ;;  %v2095_v60 = vmul.f32 %v7475_v58, %v2063_v44  ;;  %v1387_v62 = vpop.f32.mrb[31].mxu0 }
 0x693   :  { %8487 = vpow2.f32 %v2146_v56  ;;  %v2094_v0 = vmul.f32 %v2062_v53, %v1387_v62  ;;  %v9184_v3 = vpop.f32.mrb[38].mxu1  ;;  %v2068_v53 = vld [vmem:[%s9089_s30 + $0xf0] sm:$0xff] }
 0x694   :  { %v8478_v4 = vpop.eup %8477  ;;  %v2152_v5 = vmul.f32 1.442695, %v2095_v60  ;;  %v9187_v59 = vpop.f32.mrb[39].mxu1 }
 0x695   :  { %v8480_v9 = vpop.eup %8479  ;;  %2185 = vst.msk [vmem:[#allocation2 + $0x98] sm:$0xff] %vm807_vm3, %v8478_v4  ;;  %v2150_v10 = vmul.f32 1.442695, %v2094_v0  ;;  %v7478_v11 = vpop.f32.mrb[32].mxu0 }
 0x696   :  { %2184 = vst.msk [vmem:[#allocation2 + $0x90] sm:$0xff] %vm807_vm3, %v8480_v9  ;;  %8489 = vpow2.f32 %v2152_v5  ;;  %v2097_v15 = vmul.f32 %v7478_v11, %v2065_v2  ;;  %v1397_v17 = vpop.f32.mrb[33].mxu0  ;;  %v1879_v5 = vld [vmem:[%s9197_s6 + $0x8] sm:$0xff]  ;;  %v1878_v11 = vld [vmem:[%s9197_s6] sm:$0xff] }
 0x697   :  { %8491 = vpow2.f32 %v2150_v10  ;;  %v2096_v18 = vmul.f32 %v2064_v6, %v1397_v17  ;;  %v9192_v20 = vpop.f32.mrb[40].mxu1 }
 0x698   :  { %v8482_v22 = vpop.eup %8481  ;;  %v2156_v25 = vmul.f32 1.442695, %v2097_v15  ;;  %v9200_v32 = vpop.f32.mrb[41].mxu1 }
 0x699   :  { %v8484_v33 = vpop.eup %8483  ;;  %2187 = vst.msk [vmem:[#allocation2 + $0xa8] sm:$0xff] %vm807_vm3, %v8482_v22  ;;  %v2154_v35 = vmul.f32 1.442695, %v2096_v18  ;;  %v7481_v37 = vpop.f32.mrb[34].mxu0 }
 0x69a   :  { %2186 = vst.msk [vmem:[#allocation2 + $0xa0] sm:$0xff] %vm807_vm3, %v8484_v33  ;;  %8493 = vpow2.f32 %v2156_v25  ;;  %v2099_v38 = vmul.f32 %v7481_v37, %v2067_v19  ;;  %v1407_v40 = vpop.f32.mrb[35].mxu0  ;;  %v2510_v25 = vld [vmem:[%s9207_s14 + $0x8] sm:$0xff] }
 0x69b   :  { %8495 = vpow2.f32 %v2154_v35  ;;  %v2098_v42 = vmul.f32 %v2066_v30, %v1407_v40  ;;  %v9210_v44 = vpop.f32.mrb[42].mxu1  ;;  %v1881_v35 = vld [vmem:[%s9197_s6 + $0x18] sm:$0xff] }
 0x69c   :  { %v8486_v48 = vpop.eup %8485  ;;  %v2160_v49 = vmul.f32 1.442695, %v2099_v38  ;;  %v9213_v55 = vpop.f32.mrb[43].mxu1 }
 0x69d   :  { %v8488_v56 = vpop.eup %8487  ;;  %2189 = vst.msk [vmem:[#allocation2 + $0xb8] sm:$0xff] %vm807_vm3, %v8486_v48  ;;  %v2158_v58 = vmul.f32 1.442695, %v2098_v42  ;;  %v7484_v60 = vpop.f32.mrb[36].mxu0  ;;  %v1880_v42 = vld [vmem:[%s9197_s6 + $0x10] sm:$0xff] }
 0x69e   :  { %2188 = vst.msk [vmem:[#allocation2 + $0xb0] sm:$0xff] %vm807_vm3, %v8488_v56  ;;  %8497 = vpow2.f32 %v2160_v49  ;;  %v2101_v62 = vmul.f32 %v7484_v60, %v2069_v43  ;;  %v1417_v0 = vpop.f32.mrb[37].mxu0 }
 0x69f   :  { %8499 = vpow2.f32 %v2158_v58  ;;  %v2100_v2 = vmul.f32 %v2068_v53, %v1417_v0  ;;  %v9217_v4 = vpop.f32.mrb[44].mxu1  ;;  %v1883_v0 = vld [vmem:[%s9197_s6 + $0x28] sm:$0xff] }
 0x6a0   :  { %v8490_v6 = vpop.eup %8489  ;;  %v2164_v9 = vmul.f32 1.442695, %v2101_v62  ;;  %v9220_v10 = vpop.f32.mrb[45].mxu1 }
 0x6a1   :  { %v8492_v15 = vpop.eup %8491  ;;  %2191 = vst.msk [vmem:[#allocation2 + $0xc8] sm:$0xff] %vm807_vm3, %v8490_v6  ;;  %v2162_v17 = vmul.f32 1.442695, %v2100_v2  ;;  %v7543_v18 = vpop.f32.mrb[38].mxu0 }
 0x6a2   :  { %2190 = vst.msk [vmem:[#allocation2 + $0xc0] sm:$0xff] %vm807_vm3, %v8492_v15  ;;  %8501 = vpow2.f32 %v2164_v9  ;;  %v1911_v19 = vmul.f32 %v7543_v18, %v1879_v5  ;;  %v1719_v22 = vpop.f32.mrb[39].mxu0  ;;  %v1882_v9 = vld [vmem:[%s9197_s6 + $0x20] sm:$0xff] }
 0x6a3   :  { %8503 = vpow2.f32 %v2162_v17  ;;  %v1910_v30 = vmul.f32 %v1878_v11, %v1719_v22  ;;  %v9226_v33 = vpop.f32.mrb[46].mxu1 }
 0x6a4   :  { %v8494_v37 = vpop.eup %8493  ;;  %v2500_v38 = vpop.f32.mrb[47].mxu1  ;;  %v1945_v40 = vsel %vm585_vm0, %v1911_v19, 0.0 }
 0x6a5   :  { %v8496_v43 = vpop.eup %8495  ;;  %2193 = vst.msk [vmem:[#allocation2 + $0xd8] sm:$0xff] %vm807_vm3, %v8494_v37  ;;  %v2514_v48 = vmul.f32 %v2510_v25, %v2500_v38  ;;  %1946 = vadd.xlane.f32.xlu0 %v1945_v40  ;;  %v7546_v49 = vpop.f32.mrb[40].mxu0  ;;  %v1942_v53 = vsel %vm585_vm0, %v1910_v30, 0.0  ;;  %v1885_v25 = vld [vmem:[%s9197_s6 + $0x38] sm:$0xff]  ;;  %v1884_v37 = vld [vmem:[%s9197_s6 + $0x30] sm:$0xff] }
 0x6a6   :  { %2192 = vst.msk [vmem:[#allocation2 + $0xd0] sm:$0xff] %vm807_vm3, %v8496_v43  ;;  %v1913_v56 = vmul.f32 %v7546_v49, %v1881_v35  ;;  %1943 = vadd.xlane.f32.xlu1 %v1942_v53  ;;  %v1729_v58 = vpop.f32.mrb[41].mxu0  ;;  %v1887_v53 = vld [vmem:[%s9197_s6 + $0x48] sm:$0xff] }
 0x6a7   :  { %v1912_v60 = vmul.f32 %v1880_v42, %v1729_v58  ;;  %v9234_v62 = vpop.f32.mrb[48].mxu1  ;;  %2622 = vmatprep.mubr.f32.mxu1 %v2514_v48  ;;  %v1886_v58 = vld [vmem:[%s9197_s6 + $0x40] sm:$0xff] }
 0x6a8   :  { %v8498_v2 = vpop.eup %8497  ;;  %v9237_v5 = vpop.f32.mrb[49].mxu1  ;;  %v1951_v6 = vsel %vm585_vm0, %v1913_v56, 0.0 }
 0x6a9   :  { %v8500_v11 = vpop.eup %8499  ;;  %2195 = vst.msk [vmem:[#allocation2 + $0xe8] sm:$0xff] %vm807_vm3, %v8498_v2  ;;  %1952 = vadd.xlane.f32.xlu0 %v1951_v6  ;;  %v7549_v15 = vpop.f32.mrb[42].mxu0  ;;  %v1948_v17 = vsel %vm585_vm0, %v1912_v60, 0.0 }
 0x6aa   :  { %2194 = vst.msk [vmem:[#allocation2 + $0xe0] sm:$0xff] %vm807_vm3, %v8500_v11  ;;  %v1915_v18 = vmul.f32 %v7549_v15, %v1883_v0  ;;  %1949 = vadd.xlane.f32.xlu1 %v1948_v17  ;;  %v1739_v19 = vpop.f32.mrb[43].mxu0  ;;  %v1889_v11 = vld [vmem:[%s9197_s6 + $0x58] sm:$0xff]  ;;  %v1888_v17 = vld [vmem:[%s9197_s6 + $0x50] sm:$0xff] }
 0x6ab   :  { %v1914_v22 = vmul.f32 %v1882_v9, %v1739_v19 }
 0x6ac   :  { %v8502_v30 = vpop.eup %8501  ;;  %v1957_v35 = vsel %vm585_vm0, %v1915_v18, 0.0 }
 0x6ad   :  { %v8504_v38 = vpop.eup %8503  ;;  %2197 = vst.msk [vmem:[#allocation2 + $0xf8] sm:$0xff] %vm807_vm3, %v8502_v30  ;;  %1958 = vadd.xlane.f32.xlu0 %v1957_v35  ;;  %v7552_v40 = vpop.f32.mrb[44].mxu0  ;;  %v1954_v42 = vsel %vm585_vm0, %v1914_v22, 0.0  ;;  %v1891_v35 = vld [vmem:[%s9197_s6 + $0x68] sm:$0xff] }
 0x6ae   :  { %2196 = vst.msk [vmem:[#allocation2 + $0xf0] sm:$0xff] %vm807_vm3, %v8504_v38  ;;  %v1917_v43 = vmul.f32 %v7552_v40, %v1885_v25  ;;  %1955 = vadd.xlane.f32.xlu1 %v1954_v42  ;;  %v1749_v48 = vpop.f32.mrb[45].mxu0  ;;  %v1890_v38 = vld [vmem:[%s9197_s6 + $0x60] sm:$0xff] }
 0x6af   :  { %v1916_v49 = vmul.f32 %v1884_v37, %v1749_v48 }
 0x6b0   :  { %v1963_v56 = vsel %vm585_vm0, %v1917_v43, 0.0 }
 0x6b1   :  { %1964 = vadd.xlane.f32.xlu0 %v1963_v56  ;;  %v7555_v60 = vpop.f32.mrb[46].mxu0  ;;  %v1960_v0 = vsel %vm585_vm0, %v1916_v49, 0.0 }
 0x6b2   :  { %v1919_v2 = vmul.f32 %v7555_v60, %v1887_v53  ;;  %1961 = vadd.xlane.f32.xlu1 %v1960_v0  ;;  %v1759_v6 = vpop.f32.mrb[47].mxu0  ;;  %v1893_v53 = vld [vmem:[%s9197_s6 + $0x78] sm:$0xff] }
 0x6b3   :  { %v1918_v9 = vmul.f32 %v1886_v58, %v1759_v6  ;;  %v1892_v58 = vld [vmem:[%s9197_s6 + $0x70] sm:$0xff] }
 0x6b4   :  { %v1969_v15 = vsel %vm585_vm0, %v1919_v2, 0.0 }
 0x6b5   :  { %1970 = vadd.xlane.f32.xlu0 %v1969_v15  ;;  %v7558_v18 = vpop.f32.mrb[48].mxu0  ;;  %v1966_v19 = vsel %vm585_vm0, %v1918_v9, 0.0 }
 0x6b6   :  { %v1921_v22 = vmul.f32 %v7558_v18, %v1889_v11  ;;  %1967 = vadd.xlane.f32.xlu1 %v1966_v19  ;;  %v1769_v25 = vpop.f32.mrb[49].mxu0  ;;  %v1895_v11 = vld [vmem:[%s9197_s6 + $0x88] sm:$0xff] }
 0x6b7   :  { %v1920_v30 = vmul.f32 %v1888_v17, %v1769_v25  ;;  %v1894_v17 = vld [vmem:[%s9197_s6 + $0x80] sm:$0xff] }
 0x6b8   :  { %v1975_v37 = vsel %vm585_vm0, %v1921_v22, 0.0 }
 0x6b9   :  { %1976 = vadd.xlane.f32.xlu0 %v1975_v37  ;;  %v7561_v40 = vpop.f32.mrb[50].mxu0  ;;  %v1972_v42 = vsel %vm585_vm0, %v1920_v30, 0.0 }
 0x6ba   :  { %v1923_v43 = vmul.f32 %v7561_v40, %v1891_v35  ;;  %1973 = vadd.xlane.f32.xlu1 %v1972_v42  ;;  %v1779_v48 = vpop.f32.mrb[51].mxu0  ;;  %v1897_v35 = vld [vmem:[%s9197_s6 + $0x98] sm:$0xff] }
 0x6bb   :  { %v1922_v49 = vmul.f32 %v1890_v38, %v1779_v48  ;;  %v1896_v38 = vld [vmem:[%s9197_s6 + $0x90] sm:$0xff] }
 0x6bc   :  { %v1981_v56 = vsel %vm585_vm0, %v1923_v43, 0.0 }
 0x6bd   :  { %1982 = vadd.xlane.f32.xlu0 %v1981_v56  ;;  %v7564_v60 = vpop.f32.mrb[52].mxu0  ;;  %v1978_v0 = vsel %vm585_vm0, %v1922_v49, 0.0 }
 0x6be   :  { %v1925_v2 = vmul.f32 %v7564_v60, %v1893_v53  ;;  %1979 = vadd.xlane.f32.xlu1 %v1978_v0  ;;  %v1789_v6 = vpop.f32.mrb[53].mxu0  ;;  %v1899_v53 = vld [vmem:[%s9197_s6 + $0xa8] sm:$0xff] }
 0x6bf   :  { %v1924_v9 = vmul.f32 %v1892_v58, %v1789_v6  ;;  %v1898_v58 = vld [vmem:[%s9197_s6 + $0xa0] sm:$0xff] }
 0x6c0   :  { %v1987_v15 = vsel %vm585_vm0, %v1925_v2, 0.0 }
 0x6c1   :  { %1988 = vadd.xlane.f32.xlu0 %v1987_v15  ;;  %v7567_v18 = vpop.f32.mrb[54].mxu0  ;;  %v1984_v19 = vsel %vm585_vm0, %v1924_v9, 0.0 }
 0x6c2   :  { %v1927_v22 = vmul.f32 %v7567_v18, %v1895_v11  ;;  %1985 = vadd.xlane.f32.xlu1 %v1984_v19  ;;  %v1799_v25 = vpop.f32.mrb[55].mxu0  ;;  %v1901_v11 = vld [vmem:[%s9197_s6 + $0xb8] sm:$0xff] }
 0x6c3   :  { %v1926_v30 = vmul.f32 %v1894_v17, %v1799_v25  ;;  %v1900_v17 = vld [vmem:[%s9197_s6 + $0xb0] sm:$0xff] }
 0x6c4   :  { %v1993_v37 = vsel %vm585_vm0, %v1927_v22, 0.0 }
 0x6c5   :  { %1994 = vadd.xlane.f32.xlu0 %v1993_v37  ;;  %v7570_v40 = vpop.f32.mrb[56].mxu0  ;;  %v1990_v42 = vsel %vm585_vm0, %v1926_v30, 0.0 }
 0x6c6   :  { %v1929_v43 = vmul.f32 %v7570_v40, %v1897_v35  ;;  %1991 = vadd.xlane.f32.xlu1 %v1990_v42  ;;  %v1809_v48 = vpop.f32.mrb[57].mxu0  ;;  %v1903_v35 = vld [vmem:[%s9197_s6 + $0xc8] sm:$0xff] }
 0x6c7   :  { %v1928_v49 = vmul.f32 %v1896_v38, %v1809_v48  ;;  %v1902_v38 = vld [vmem:[%s9197_s6 + $0xc0] sm:$0xff] }
 0x6c8   :  { %v1999_v56 = vsel %vm585_vm0, %v1929_v43, 0.0 }
 0x6c9   :  { %2000 = vadd.xlane.f32.xlu0 %v1999_v56  ;;  %v7573_v60 = vpop.f32.mrb[58].mxu0  ;;  %v1996_v0 = vsel %vm585_vm0, %v1928_v49, 0.0 }
 0x6ca   :  { %v1931_v2 = vmul.f32 %v7573_v60, %v1899_v53  ;;  %1997 = vadd.xlane.f32.xlu1 %v1996_v0  ;;  %v1819_v6 = vpop.f32.mrb[59].mxu0  ;;  %v1905_v53 = vld [vmem:[%s9197_s6 + $0xd8] sm:$0xff] }
 0x6cb   :  { %v1930_v9 = vmul.f32 %v1898_v58, %v1819_v6  ;;  %v1904_v58 = vld [vmem:[%s9197_s6 + $0xd0] sm:$0xff] }
 0x6cc   :  { %v2005_v15 = vsel %vm585_vm0, %v1931_v2, 0.0 }
 0x6cd   :  { %2006 = vadd.xlane.f32.xlu0 %v2005_v15  ;;  %v7576_v18 = vpop.f32.mrb[60].mxu0  ;;  %v2002_v19 = vsel %vm585_vm0, %v1930_v9, 0.0 }
 0x6ce   :  { %v1933_v22 = vmul.f32 %v7576_v18, %v1901_v11  ;;  %2003 = vadd.xlane.f32.xlu1 %v2002_v19  ;;  %v1829_v25 = vpop.f32.mrb[61].mxu0  ;;  %v1907_v11 = vld [vmem:[%s9197_s6 + $0xe8] sm:$0xff] }
 0x6cf   :  { %v1932_v30 = vmul.f32 %v1900_v17, %v1829_v25  ;;  %v1906_v17 = vld [vmem:[%s9197_s6 + $0xe0] sm:$0xff] }
 0x6d0   :  { %v2011_v37 = vsel %vm585_vm0, %v1933_v22, 0.0 }
 0x6d1   :  { %2012 = vadd.xlane.f32.xlu0 %v2011_v37  ;;  %v7579_v40 = vpop.f32.mrb[62].mxu0  ;;  %v2008_v42 = vsel %vm585_vm0, %v1932_v30, 0.0 }
 0x6d2   :  { %v1935_v43 = vmul.f32 %v7579_v40, %v1903_v35  ;;  %2009 = vadd.xlane.f32.xlu1 %v2008_v42  ;;  %v1839_v48 = vpop.f32.mrb[63].mxu0  ;;  %v1909_v35 = vld [vmem:[%s9197_s6 + $0xf8] sm:$0xff] }
 0x6d3   :  { %v1934_v49 = vmul.f32 %v1902_v38, %v1839_v48  ;;  %v1908_v38 = vld [vmem:[%s9197_s6 + $0xf0] sm:$0xff] }
 0x6d4   :  { %v2017_v56 = vsel %vm585_vm0, %v1935_v43, 0.0 }
 0x6d5   :  { %2018 = vadd.xlane.f32.xlu0 %v2017_v56  ;;  %v7582_v60 = vpop.f32.mrb[64].mxu0  ;;  %v2014_v0 = vsel %vm585_vm0, %v1934_v49, 0.0 }
 0x6d6   :  { %v1937_v2 = vmul.f32 %v7582_v60, %v1905_v53  ;;  %2015 = vadd.xlane.f32.xlu1 %v2014_v0  ;;  %v1849_v6 = vpop.f32.mrb[65].mxu0 }
 0x6d7   :  { %v1936_v9 = vmul.f32 %v1904_v58, %v1849_v6 }
 0x6d8   :  { %v2023_v15 = vsel %vm585_vm0, %v1937_v2, 0.0 }
 0x6d9   :  { %2024 = vadd.xlane.f32.xlu0 %v2023_v15  ;;  %v7585_v18 = vpop.f32.mrb[66].mxu0  ;;  %v2020_v19 = vsel %vm585_vm0, %v1936_v9, 0.0  ;;  %v2263_v15 = vld [vmem:[#allocation2 + $0x8] sm:$0xff] }
 0x6da   :  { %v1939_v22 = vmul.f32 %v7585_v18, %v1907_v11  ;;  %2021 = vadd.xlane.f32.xlu1 %v2020_v19  ;;  %v1859_v25 = vpop.f32.mrb[67].mxu0  ;;  %v2262_v18 = vld [vmem:[#allocation2] sm:$0xff]  ;;  %v2267_v19 = vmul.f32 0.0, %v2263_v15 }
 0x6db   :  { %v1938_v30 = vmul.f32 %v1906_v17, %v1859_v25 }
 0x6dc   :  { %v2029_v37 = vsel %vm585_vm0, %v1939_v22, 0.0 }
 0x6dd   :  { %2030 = vadd.xlane.f32.xlu0 %v2029_v37  ;;  %v7588_v40 = vpop.f32.mrb[68].mxu0  ;;  %v2026_v42 = vsel %vm585_vm0, %v1938_v30, 0.0  ;;  %v2266_v30 = vmul.f32 0.0, %v2262_v18 }
 0x6de   :  { %v1941_v43 = vmul.f32 %v7588_v40, %v1909_v35  ;;  %2027 = vadd.xlane.f32.xlu1 %v2026_v42  ;;  %v1869_v48 = vpop.f32.mrb[69].mxu0  ;;  %v2265_v35 = vld [vmem:[#allocation2 + $0x18] sm:$0xff]  ;;  %v2264_v40 = vld [vmem:[#allocation2 + $0x10] sm:$0xff] }
 0x6df   :  { %v1940_v49 = vmul.f32 %v1908_v38, %v1869_v48 }
 0x6e0   :  { %v2035_v53 = vsel %vm585_vm0, %v1941_v43, 0.0  ;;  %v2269_v43 = vmul.f32 0.0, %v2265_v35 }
 0x6e1   :  { %2036 = vadd.xlane.f32.xlu0 %v2035_v53  ;;  %v2032_v56 = vsel %vm585_vm0, %v1940_v49, 0.0  ;;  %v2268_v53 = vmul.f32 0.0, %v2264_v40 }
 0x6e2   :  { %2033 = vadd.xlane.f32.xlu1 %v2032_v56 }
 0x732   :  { %v1947_v58 = vpop.xlane.xlu0 %1946 }
 0x733   :  { %v2199_v60 = vmul.f32 %v9094_v13, %v1947_v58  ;;  %v1944_v0 = vpop.xlane.xlu1 %1943 }
 0x734   :  { %v2198_v2 = vmul.f32 %v1944_v0, %v9097_v16  ;;  %v2283_v0 = vld [vmem:[#allocation2 + $0x28] sm:$0xff] }
 0x735   :  { %2231 = vst.msk [vmem:[#allocation3 + $0x8] sm:$0xff] %vm807_vm3, %v2199_v60 }
 0x736   :  { %2230 = vst.msk [vmem:[#allocation3] sm:$0xff] %vm807_vm3, %v2198_v2  ;;  %v1953_v6 = vpop.xlane.xlu0 %1952 }
 0x737   :  { %v2201_v9 = vmul.f32 %v9100_v24, %v1953_v6  ;;  %v1950_v11 = vpop.xlane.xlu1 %1949 }
 0x738   :  { %v2200_v17 = vmul.f32 %v1950_v11, %v9103_v29 }
 0x739   :  { %2233 = vst.msk [vmem:[#allocation3 + $0x18] sm:$0xff] %vm807_vm3, %v2201_v9 }
 0x73a   :  { %2232 = vst.msk [vmem:[#allocation3 + $0x10] sm:$0xff] %vm807_vm3, %v2200_v17  ;;  %v1959_v13 = vpop.xlane.xlu0 %1958 }
 0x73b   :  { %v2203_v16 = vmul.f32 %v9106_v36, %v1959_v13  ;;  %v1956_v22 = vpop.xlane.xlu1 %1955 }
 0x73c   :  { %v2271_v25 = vld [vmem:[#allocation3 + $0x8] sm:$0xff]  ;;  %v2202_v37 = vmul.f32 %v1956_v22, %v9109_v39 }
 0x73d   :  { %v2275_v24 = vadd.f32 %v2271_v25, %v2267_v19  ;;  %v2270_v38 = vld [vmem:[#allocation3] sm:$0xff]  ;;  %2235 = vst.msk [vmem:[#allocation3 + $0x28] sm:$0xff] %vm807_vm3, %v2203_v16  ;;  %v2285_v16 = vld [vmem:[#allocation2 + $0x38] sm:$0xff] }
 0x73e   :  { %v2274_v29 = vadd.f32 %v2270_v38, %v2266_v30  ;;  %2234 = vst.msk [vmem:[#allocation3 + $0x20] sm:$0xff] %vm807_vm3, %v2202_v37  ;;  %v1965_v42 = vpop.xlane.xlu0 %1964 }
 0x73f   :  { %2279 = vst.msk [vmem:[#allocation4 + $0x8] sm:$0xff] %vm807_vm3, %v2275_v24  ;;  %v2205_v36 = vmul.f32 %v9112_v46, %v1965_v42  ;;  %v1962_v48 = vpop.xlane.xlu1 %1961  ;;  %v2287_v6 = vmul.f32 %v2283_v0, %v2275_v24  ;;  %v2282_v46 = vld [vmem:[#allocation2 + $0x20] sm:$0xff]  ;;  %v2303_v42 = vld [vmem:[#allocation2 + $0x48] sm:$0xff]  ;;  %v2305_v0 = vld [vmem:[#allocation2 + $0x58] sm:$0xff] }
 0x740   :  { %2278 = vst.msk [vmem:[#allocation4] sm:$0xff] %vm807_vm3, %v2274_v29  ;;  %v2273_v49 = vld [vmem:[#allocation3 + $0x18] sm:$0xff]  ;;  %v2204_v39 = vmul.f32 %v1962_v48, %v9115_v52  ;;  %v2286_v52 = vmul.f32 %v2282_v46, %v2274_v29 }
 0x741   :  { %v2277_v56 = vadd.f32 %v2273_v49, %v2269_v43  ;;  %v2272_v58 = vld [vmem:[#allocation3 + $0x10] sm:$0xff]  ;;  %2237 = vst.msk [vmem:[#allocation3 + $0x38] sm:$0xff] %vm807_vm3, %v2205_v36 }
 0x742   :  { %v2276_v60 = vadd.f32 %v2272_v58, %v2268_v53  ;;  %2236 = vst.msk [vmem:[#allocation3 + $0x30] sm:$0xff] %vm807_vm3, %v2204_v39  ;;  %v1971_v2 = vpop.xlane.xlu0 %1970 }
 0x743   :  { %2281 = vst.msk [vmem:[#allocation4 + $0x18] sm:$0xff] %vm807_vm3, %v2277_v56  ;;  %v2207_v9 = vmul.f32 %v9120_v61, %v1971_v2  ;;  %v1968_v11 = vpop.xlane.xlu1 %1967  ;;  %v2289_v25 = vmul.f32 %v2285_v16, %v2277_v56  ;;  %v2284_v61 = vld [vmem:[#allocation2 + $0x30] sm:$0xff] }
 0x744   :  { %2280 = vst.msk [vmem:[#allocation4 + $0x10] sm:$0xff] %vm807_vm3, %v2276_v60  ;;  %v2291_v15 = vld [vmem:[#allocation3 + $0x28] sm:$0xff]  ;;  %v2206_v17 = vmul.f32 %v1968_v11, %v9123_v1  ;;  %v2288_v1 = vmul.f32 %v2284_v61, %v2276_v60 }
 0x745   :  { %v2295_v18 = vadd.f32 %v2291_v15, %v2287_v6  ;;  %v2290_v13 = vld [vmem:[#allocation3 + $0x20] sm:$0xff]  ;;  %2239 = vst.msk [vmem:[#allocation3 + $0x48] sm:$0xff] %vm807_vm3, %v2207_v9 }
 0x746   :  { %v2294_v19 = vadd.f32 %v2290_v13, %v2286_v52  ;;  %2238 = vst.msk [vmem:[#allocation3 + $0x40] sm:$0xff] %vm807_vm3, %v2206_v17  ;;  %v1977_v22 = vpop.xlane.xlu0 %1976  ;;  %v2323_v13 = vld [vmem:[#allocation2 + $0x68] sm:$0xff] }
 0x747   :  { %2299 = vst.msk [vmem:[#allocation4 + $0x28] sm:$0xff] %vm807_vm3, %v2295_v18  ;;  %v2209_v30 = vmul.f32 %v9128_v8, %v1977_v22  ;;  %v1974_v35 = vpop.xlane.xlu1 %1973  ;;  %v2307_v36 = vmul.f32 %v2303_v42, %v2295_v18  ;;  %v2302_v8 = vld [vmem:[#allocation2 + $0x40] sm:$0xff] }
 0x748   :  { %2298 = vst.msk [vmem:[#allocation4 + $0x20] sm:$0xff] %vm807_vm3, %v2294_v19  ;;  %v2293_v37 = vld [vmem:[#allocation3 + $0x38] sm:$0xff]  ;;  %v2208_v24 = vmul.f32 %v1974_v35, %v9131_v12  ;;  %v2306_v12 = vmul.f32 %v2302_v8, %v2294_v19 }
 0x749   :  { %v2297_v38 = vadd.f32 %v2293_v37, %v2289_v25  ;;  %v2292_v40 = vld [vmem:[#allocation3 + $0x30] sm:$0xff]  ;;  %2241 = vst.msk [vmem:[#allocation3 + $0x58] sm:$0xff] %vm807_vm3, %v2209_v30 }
 0x74a   :  { %v2296_v29 = vadd.f32 %v2292_v40, %v2288_v1  ;;  %2240 = vst.msk [vmem:[#allocation3 + $0x50] sm:$0xff] %vm807_vm3, %v2208_v24  ;;  %v1983_v43 = vpop.xlane.xlu0 %1982  ;;  %v2325_v24 = vld [vmem:[#allocation2 + $0x78] sm:$0xff] }
 0x74b   :  { %2301 = vst.msk [vmem:[#allocation4 + $0x38] sm:$0xff] %vm807_vm3, %v2297_v38  ;;  %v2211_v48 = vmul.f32 %v9136_v23, %v1983_v43  ;;  %v1980_v49 = vpop.xlane.xlu1 %1979  ;;  %v2309_v6 = vmul.f32 %v2305_v0, %v2297_v38  ;;  %v2304_v23 = vld [vmem:[#allocation2 + $0x50] sm:$0xff] }
 0x74c   :  { %2300 = vst.msk [vmem:[#allocation4 + $0x30] sm:$0xff] %vm807_vm3, %v2296_v29  ;;  %v2311_v53 = vld [vmem:[#allocation3 + $0x48] sm:$0xff]  ;;  %v2210_v39 = vmul.f32 %v1980_v49, %v9139_v31  ;;  %v2308_v31 = vmul.f32 %v2304_v23, %v2296_v29 }
 0x74d   :  { %v2315_v56 = vadd.f32 %v2311_v53, %v2307_v36  ;;  %v2310_v58 = vld [vmem:[#allocation3 + $0x40] sm:$0xff]  ;;  %2243 = vst.msk [vmem:[#allocation3 + $0x68] sm:$0xff] %vm807_vm3, %v2211_v48  ;;  %v2343_v53 = vld [vmem:[#allocation2 + $0x88] sm:$0xff] }
 0x74e   :  { %v2314_v60 = vadd.f32 %v2310_v58, %v2306_v12  ;;  %2242 = vst.msk [vmem:[#allocation3 + $0x60] sm:$0xff] %vm807_vm3, %v2210_v39  ;;  %v1989_v2 = vpop.xlane.xlu0 %1988 }
 0x74f   :  { %2319 = vst.msk [vmem:[#allocation4 + $0x48] sm:$0xff] %vm807_vm3, %v2315_v56  ;;  %v2213_v46 = vmul.f32 %v9144_v41, %v1989_v2  ;;  %v1986_v9 = vpop.xlane.xlu1 %1985  ;;  %v2327_v16 = vmul.f32 %v2323_v13, %v2315_v56  ;;  %v2322_v41 = vld [vmem:[#allocation2 + $0x60] sm:$0xff] }
 0x750   :  { %2318 = vst.msk [vmem:[#allocation4 + $0x40] sm:$0xff] %vm807_vm3, %v2314_v60  ;;  %v2313_v11 = vld [vmem:[#allocation3 + $0x58] sm:$0xff]  ;;  %v2212_v15 = vmul.f32 %v1986_v9, %v9147_v45  ;;  %v2326_v45 = vmul.f32 %v2322_v41, %v2314_v60 }
 0x751   :  { %v2317_v52 = vadd.f32 %v2313_v11, %v2309_v6  ;;  %v2312_v17 = vld [vmem:[#allocation3 + $0x50] sm:$0xff]  ;;  %2245 = vst.msk [vmem:[#allocation3 + $0x78] sm:$0xff] %vm807_vm3, %v2213_v46  ;;  %v2345_v46 = vld [vmem:[#allocation2 + $0x98] sm:$0xff] }
 0x752   :  { %v2316_v18 = vadd.f32 %v2312_v17, %v2308_v31  ;;  %2244 = vst.msk [vmem:[#allocation3 + $0x70] sm:$0xff] %vm807_vm3, %v2212_v15  ;;  %v1995_v19 = vpop.xlane.xlu0 %1994 }
 0x753   :  { %2321 = vst.msk [vmem:[#allocation4 + $0x58] sm:$0xff] %vm807_vm3, %v2317_v52  ;;  %v2215_v22 = vmul.f32 %v9152_v57, %v1995_v19  ;;  %v1992_v25 = vpop.xlane.xlu1 %1991  ;;  %v2329_v40 = vmul.f32 %v2325_v24, %v2317_v52  ;;  %v2324_v57 = vld [vmem:[#allocation2 + $0x70] sm:$0xff] }
 0x754   :  { %2320 = vst.msk [vmem:[#allocation4 + $0x50] sm:$0xff] %vm807_vm3, %v2316_v18  ;;  %v2331_v61 = vld [vmem:[#allocation3 + $0x68] sm:$0xff]  ;;  %v2214_v30 = vmul.f32 %v1992_v25, %v9155_v63  ;;  %v2328_v63 = vmul.f32 %v2324_v57, %v2316_v18  ;;  %v2517_v57 = vld [vmem:[#allocation4] sm:$0xff] }
 0x755   :  { %v2335_v35 = vadd.f32 %v2331_v61, %v2327_v16  ;;  %v2330_v37 = vld [vmem:[#allocation3 + $0x60] sm:$0xff]  ;;  %2247 = vst.msk [vmem:[#allocation3 + $0x88] sm:$0xff] %vm807_vm3, %v2215_v22  ;;  %v2363_v16 = vld [vmem:[#allocation2 + $0xa8] sm:$0xff] }
 0x756   :  { %v2334_v1 = vadd.f32 %v2330_v37, %v2326_v45  ;;  %2246 = vst.msk [vmem:[#allocation3 + $0x80] sm:$0xff] %vm807_vm3, %v2214_v30  ;;  %v2001_v38 = vpop.xlane.xlu0 %2000 }
 0x757   :  { %2339 = vst.msk [vmem:[#allocation4 + $0x68] sm:$0xff] %vm807_vm3, %v2335_v35  ;;  %v2217_v29 = vmul.f32 %v9160_v7, %v2001_v38  ;;  %v1998_v42 = vpop.xlane.xlu1 %1997  ;;  %v2347_v39 = vmul.f32 %v2343_v53, %v2335_v35  ;;  %v2342_v7 = vld [vmem:[#allocation2 + $0x80] sm:$0xff] }
 0x758   :  { %2338 = vst.msk [vmem:[#allocation4 + $0x60] sm:$0xff] %vm807_vm3, %v2334_v1  ;;  %v2333_v43 = vld [vmem:[#allocation3 + $0x78] sm:$0xff]  ;;  %v2216_v36 = vmul.f32 %v1998_v42, %v9163_v14  ;;  %v2346_v14 = vmul.f32 %v2342_v7, %v2334_v1  ;;  %v2364_v42 = vld [vmem:[#allocation2 + $0xb0] sm:$0xff] }
 0x759   :  { %v2337_v8 = vadd.f32 %v2333_v43, %v2329_v40  ;;  %v2332_v48 = vld [vmem:[#allocation3 + $0x70] sm:$0xff]  ;;  %2249 = vst.msk [vmem:[#allocation3 + $0x98] sm:$0xff] %vm807_vm3, %v2217_v29  ;;  %v2365_v1 = vld [vmem:[#allocation2 + $0xb8] sm:$0xff]  ;;  %v2518_v29 = vld [vmem:[#allocation4 + $0x8] sm:$0xff] }
 0x75a   :  { %v2336_v49 = vadd.f32 %v2332_v48, %v2328_v63  ;;  %2248 = vst.msk [vmem:[#allocation3 + $0x90] sm:$0xff] %vm807_vm3, %v2216_v36  ;;  %v2007_v12 = vpop.xlane.xlu0 %2006  ;;  %v8112_v7 = vpack.c.bf16 %v2518_v29, %v2517_v57  ;;  %v2402_v29 = vld [vmem:[#allocation2 + $0xe0] sm:$0xff] }
 0x75b   :  { %2341 = vst.msk [vmem:[#allocation4 + $0x78] sm:$0xff] %vm807_vm3, %v2337_v8  ;;  %v2219_v56 = vmul.f32 %v9168_v27, %v2007_v12  ;;  %v2004_v58 = vpop.xlane.xlu1 %2003  ;;  %v2349_v11 = vmul.f32 %v2345_v46, %v2337_v8  ;;  %v2344_v27 = vld [vmem:[#allocation2 + $0x90] sm:$0xff] }
 0x75c   :  { %2340 = vst.msk [vmem:[#allocation4 + $0x70] sm:$0xff] %vm807_vm3, %v2336_v49  ;;  %v2351_v60 = vld [vmem:[#allocation3 + $0x88] sm:$0xff]  ;;  %v2218_v0 = vmul.f32 %v2004_v58, %v9171_v34  ;;  %v2348_v34 = vmul.f32 %v2344_v27, %v2336_v49 }
 0x75d   :  { %v2355_v2 = vadd.f32 %v2351_v60, %v2347_v39  ;;  %v2350_v6 = vld [vmem:[#allocation3 + $0x80] sm:$0xff]  ;;  %2251 = vst.msk [vmem:[#allocation3 + $0xa8] sm:$0xff] %vm807_vm3, %v2219_v56  ;;  %v2383_v39 = vld [vmem:[#allocation2 + $0xc8] sm:$0xff]  ;;  %v2519_v60 = vld [vmem:[#allocation4 + $0x10] sm:$0xff] }
 0x75e   :  { %v2354_v23 = vadd.f32 %v2350_v6, %v2346_v14  ;;  %2250 = vst.msk [vmem:[#allocation3 + $0xa0] sm:$0xff] %vm807_vm3, %v2218_v0  ;;  %v2013_v9 = vpop.xlane.xlu0 %2012  ;;  %v2520_v14 = vld [vmem:[#allocation4 + $0x18] sm:$0xff] }
 0x75f   :  { %2359 = vst.msk [vmem:[#allocation4 + $0x88] sm:$0xff] %vm807_vm3, %v2355_v2  ;;  %v2221_v31 = vmul.f32 %v9176_v47, %v2013_v9  ;;  %v2010_v15 = vpop.xlane.xlu1 %2009  ;;  %v2367_v22 = vmul.f32 %v2363_v16, %v2355_v2  ;;  %v2362_v47 = vld [vmem:[#allocation2 + $0xa0] sm:$0xff] }
 0x760   :  { %2358 = vst.msk [vmem:[#allocation4 + $0x80] sm:$0xff] %vm807_vm3, %v2354_v23  ;;  %v2353_v52 = vld [vmem:[#allocation3 + $0x98] sm:$0xff]  ;;  %v2220_v17 = vmul.f32 %v2010_v15, %v9179_v54  ;;  %v2366_v54 = vmul.f32 %v2362_v47, %v2354_v23  ;;  %v2382_v2 = vld [vmem:[#allocation2 + $0xc0] sm:$0xff] }
 0x761   :  { %v2357_v18 = vadd.f32 %v2353_v52, %v2349_v11  ;;  %v2352_v13 = vld [vmem:[#allocation3 + $0x90] sm:$0xff]  ;;  %2253 = vst.msk [vmem:[#allocation3 + $0xb8] sm:$0xff] %vm807_vm3, %v2221_v31  ;;  %v2385_v52 = vld [vmem:[#allocation2 + $0xd8] sm:$0xff] }
 0x762   :  { %v2356_v19 = vadd.f32 %v2352_v13, %v2348_v34  ;;  %2252 = vst.msk [vmem:[#allocation3 + $0xb0] sm:$0xff] %vm807_vm3, %v2220_v17  ;;  %v2019_v41 = vpop.xlane.xlu0 %2018  ;;  %v8116_v34 = vpack.c.bf16 %v2520_v14, %v2519_v60  ;;  %v2521_v13 = vld [vmem:[#allocation4 + $0x20] sm:$0xff] }
 0x763   :  { %2361 = vst.msk [vmem:[#allocation4 + $0x98] sm:$0xff] %vm807_vm3, %v2357_v18  ;;  %v2223_v25 = vmul.f32 %v9184_v3, %v2019_v41  ;;  %v2016_v61 = vpop.xlane.xlu1 %2015  ;;  %v2369_v3 = vmul.f32 %v2365_v1, %v2357_v18  ;;  %v2384_v41 = vld [vmem:[#allocation2 + $0xd0] sm:$0xff] }
 0x764   :  { %2360 = vst.msk [vmem:[#allocation4 + $0x90] sm:$0xff] %vm807_vm3, %v2356_v19  ;;  %v2371_v45 = vld [vmem:[#allocation3 + $0xa8] sm:$0xff]  ;;  %v2222_v30 = vmul.f32 %v2016_v61, %v9187_v59  ;;  %v2368_v8 = vmul.f32 %v2364_v42, %v2356_v19 }
 0x765   :  { %v2375_v35 = vadd.f32 %v2371_v45, %v2367_v22  ;;  %v2370_v37 = vld [vmem:[#allocation3 + $0xa0] sm:$0xff]  ;;  %2255 = vst.msk [vmem:[#allocation3 + $0xc8] sm:$0xff] %vm807_vm3, %v2223_v25  ;;  %v2522_v19 = vld [vmem:[#allocation4 + $0x28] sm:$0xff] }
 0x766   :  { %v2374_v24 = vadd.f32 %v2370_v37, %v2366_v54  ;;  %2254 = vst.msk [vmem:[#allocation3 + $0xc0] sm:$0xff] %vm807_vm3, %v2222_v30  ;;  %v2025_v38 = vpop.xlane.xlu0 %2024  ;;  %v2534_v40 = vld [vmem:[#allocation4 + $0x88] sm:$0xff]  ;;  %v8120_v1 = vpack.c.bf16 %v2522_v19, %v2521_v13 }
 0x767   :  { %2379 = vst.msk [vmem:[#allocation4 + $0xa8] sm:$0xff] %vm807_vm3, %v2375_v35  ;;  %v2225_v43 = vmul.f32 %v9192_v20, %v2025_v38  ;;  %v2022_v63 = vpop.xlane.xlu1 %2021  ;;  %v2533_v59 = vld [vmem:[#allocation4 + $0x80] sm:$0xff]  ;;  %v2387_v0 = vmul.f32 %v2383_v39, %v2375_v35  ;;  %v2403_v37 = vld [vmem:[#allocation2 + $0xe8] sm:$0xff]  ;;  %v2523_v38 = vld [vmem:[#allocation4 + $0x30] sm:$0xff] }
 0x768   :  { %2378 = vst.msk [vmem:[#allocation4 + $0xa0] sm:$0xff] %vm807_vm3, %v2374_v24  ;;  %v2373_v36 = vld [vmem:[#allocation3 + $0xb8] sm:$0xff]  ;;  %v2224_v48 = vmul.f32 %v2022_v63, %v9200_v32  ;;  %v8110_v49 = vpack.c.bf16 %v2534_v40, %v2533_v59  ;;  %v2386_v9 = vmul.f32 %v2382_v2, %v2374_v24  ;;  %v2658_v13 = vld [vmem:[%s9397_s21 + $0x8] sm:$0xff] }
 0x769   :  { %v2377_v53 = vadd.f32 %v2373_v36, %v2369_v3  ;;  %v2372_v12 = vld [vmem:[#allocation3 + $0xb0] sm:$0xff]  ;;  %2257 = vst.msk [vmem:[#allocation3 + $0xd8] sm:$0xff] %vm807_vm3, %v2225_v43  ;;  %v2524_v40 = vld [vmem:[#allocation4 + $0x38] sm:$0xff] }
 0x76a   :  { %v2376_v56 = vadd.f32 %v2372_v12, %v2368_v8  ;;  %2256 = vst.msk [vmem:[#allocation3 + $0xd0] sm:$0xff] %vm807_vm3, %v2224_v48  ;;  %8111 = vmatprep.subr.bf16.mxu1 %v8110_v49  ;;  %v2031_v20 = vpop.xlane.xlu0 %2030  ;;  %v2536_v58 = vld [vmem:[#allocation4 + $0x98] sm:$0xff]  ;;  %v8124_v8 = vpack.c.bf16 %v2524_v40, %v2523_v38  ;;  %v2526_v12 = vld [vmem:[#allocation4 + $0x48] sm:$0xff]  ;;  %v2661_v38 = vld [vmem:[%s9397_s21 + $0x20] sm:$0xff] }
 0x76b   :  { %2381 = vst.msk [vmem:[#allocation4 + $0xb8] sm:$0xff] %vm807_vm3, %v2377_v53  ;;  %v2227_v32 = vmul.f32 %v9210_v44, %v2031_v20  ;;  %8113 = vmatpush3.bf16.msra.mxu1 %v8112_v7  ;;  %v2028_v6 = vpop.xlane.xlu1 %2027  ;;  %v2535_v23 = vld [vmem:[#allocation4 + $0x90] sm:$0xff]  ;;  %v2389_v16 = vmul.f32 %v2385_v52, %v2377_v53  ;;  %v2405_v36 = vld [vmem:[#allocation2 + $0xf8] sm:$0xff]  ;;  %v2525_v53 = vld [vmem:[#allocation4 + $0x40] sm:$0xff] }
 0x76c   :  { %2380 = vst.msk [vmem:[#allocation4 + $0xb0] sm:$0xff] %vm807_vm3, %v2376_v56  ;;  %v2391_v46 = vld [vmem:[#allocation3 + $0xc8] sm:$0xff]  ;;  %v2226_v11 = vmul.f32 %v2028_v6, %v9213_v55  ;;  %v8114_v27 = vpack.c.bf16 %v2536_v58, %v2535_v23  ;;  %v2388_v61 = vmul.f32 %v2384_v41, %v2376_v56  ;;  %v2404_v7 = vld [vmem:[#allocation2 + $0xf0] sm:$0xff]  ;;  %v8128_v2 = vpack.c.bf16 %v2526_v12, %v2525_v53  ;;  %v2532_v41 = vld [vmem:[#allocation4 + $0x78] sm:$0xff] }
 0x76d   :  { %v2395_v31 = vadd.f32 %v2391_v46, %v2387_v0  ;;  %v2390_v15 = vld [vmem:[#allocation3 + $0xc0] sm:$0xff]  ;;  %2259 = vst.msk [vmem:[#allocation3 + $0xe8] sm:$0xff] %vm807_vm3, %v2227_v32  ;;  %v2527_v23 = vld [vmem:[#allocation4 + $0x50] sm:$0xff]  ;;  %v2528_v46 = vld [vmem:[#allocation4 + $0x58] sm:$0xff] }
 0x76e   :  { %v2394_v17 = vadd.f32 %v2390_v15, %v2386_v9  ;;  %2258 = vst.msk [vmem:[#allocation3 + $0xe0] sm:$0xff] %vm807_vm3, %v2226_v11  ;;  %8115 = vmatprep.subr.bf16.mxu1 %v8114_v27  ;;  %v2037_v44 = vpop.xlane.xlu0 %2036  ;;  %v2538_v18 = vld [vmem:[#allocation4 + $0xa8] sm:$0xff]  ;;  %v8132_v27 = vpack.c.bf16 %v2528_v46, %v2527_v23  ;;  %v2529_v15 = vld [vmem:[#allocation4 + $0x60] sm:$0xff] }
 0x76f   :  { %2399 = vst.msk [vmem:[#allocation4 + $0xc8] sm:$0xff] %vm807_vm3, %v2395_v31  ;;  %v2229_v55 = vmul.f32 %v9217_v4, %v2037_v44  ;;  %8117 = vmatpush3.bf16.msra.mxu1 %v8116_v34  ;;  %v2034_v22 = vpop.xlane.xlu1 %2033  ;;  %v2537_v47 = vld [vmem:[#allocation4 + $0xa0] sm:$0xff]  ;;  %v2407_v57 = vmul.f32 %v2403_v37, %v2395_v31  ;;  %v2530_v52 = vld [vmem:[#allocation4 + $0x68] sm:$0xff] }
 0x770   :  { %2398 = vst.msk [vmem:[#allocation4 + $0xc0] sm:$0xff] %vm807_vm3, %v2394_v17  ;;  %v2393_v25 = vld [vmem:[#allocation3 + $0xd8] sm:$0xff]  ;;  %v2228_v45 = vmul.f32 %v2034_v22, %v9220_v10  ;;  %v8118_v54 = vpack.c.bf16 %v2538_v18, %v2537_v47  ;;  %v2406_v42 = vmul.f32 %v2402_v29, %v2394_v17  ;;  %v8136_v44 = vpack.c.bf16 %v2530_v52, %v2529_v15  ;;  %v2657_v18 = vld [vmem:[%s9397_s21] sm:$0xff]  ;;  %v2662_v40 = vld [vmem:[%s9397_s21 + $0x28] sm:$0xff] }
 0x771   :  { %v2397_v30 = vadd.f32 %v2393_v25, %v2389_v16  ;;  %v2392_v35 = vld [vmem:[#allocation3 + $0xd0] sm:$0xff]  ;;  %2261 = vst.msk [vmem:[#allocation3 + $0xf8] sm:$0xff] %vm807_vm3, %v2229_v55  ;;  %v8142_v47 = vpack.c.bf16 %v2658_v13, %v2657_v18  ;;  %v2509_v25 = vld [vmem:[%s9207_s14] sm:$0xff] }
 0x772   :  { %v2396_v24 = vadd.f32 %v2392_v35, %v2388_v61  ;;  %2260 = vst.msk [vmem:[#allocation3 + $0xf0] sm:$0xff] %vm807_vm3, %v2228_v45  ;;  %8119 = vmatprep.subr.bf16.mxu1 %v8118_v54  ;;  %v2540_v4 = vld [vmem:[#allocation4 + $0xb8] sm:$0xff]  ;;  %v2531_v16 = vld [vmem:[#allocation4 + $0x70] sm:$0xff]  ;;  %v2513_v54 = vmul.f32 %v2509_v25, %v9226_v33  ;;  %v8150_v33 = vpack.c.bf16 %v2662_v40, %v2661_v38 }
 0x773   :  { %2401 = vst.msk [vmem:[#allocation4 + $0xd8] sm:$0xff] %vm807_vm3, %v2397_v30  ;;  %8121 = vmatpush3.bf16.msra.mxu1 %v8120_v1  ;;  %v2539_v10 = vld [vmem:[#allocation4 + $0xb0] sm:$0xff]  ;;  %v2409_v39 = vmul.f32 %v2405_v36, %v2397_v30  ;;  %v8140_v61 = vpack.c.bf16 %v2532_v41, %v2531_v16  ;;  %v2512_v45 = vld [vmem:[%s9207_s14 + $0x18] sm:$0xff] }
 0x774   :  { %2400 = vst.msk [vmem:[#allocation4 + $0xd0] sm:$0xff] %vm807_vm3, %v2396_v24  ;;  %v2411_v3 = vld [vmem:[#allocation3 + $0xe8] sm:$0xff]  ;;  %v8122_v43 = vpack.c.bf16 %v2540_v4, %v2539_v10  ;;  %v2408_v58 = vmul.f32 %v2404_v7, %v2396_v24  ;;  %v2511_v30 = vld [vmem:[%s9207_s14 + $0x10] sm:$0xff]  ;;  %v2516_v35 = vmul.f32 %v2512_v45, %v9237_v5  ;;  %v2660_v24 = vld [vmem:[%s9397_s21 + $0x18] sm:$0xff]  ;;  %v2633_v10 = vand.u32 2147483647, %v8731_v28 }
 0x775   :  { %v2415_v63 = vadd.f32 %v2411_v3, %v2407_v57  ;;  %v2410_v59 = vld [vmem:[#allocation3 + $0xe0] sm:$0xff]  ;;  %v2515_v37 = vmul.f32 %v2511_v30, %v9234_v62  ;;  %v2659_v1 = vld [vmem:[%s9397_s21 + $0x10] sm:$0xff]  ;;  %v2664_v5 = vld [vmem:[%s9397_s21 + $0x38] sm:$0xff]  ;;  %v2634_v62 = vand.u32 2147483647, %v8729_v26 }
 0x776   :  { %v2414_v48 = vadd.f32 %v2410_v59, %v2406_v42  ;;  %8123 = vmatprep.subr.bf16.mxu1 %v8122_v43  ;;  %v2542_v49 = vld [vmem:[#allocation4 + $0xc8] sm:$0xff]  ;;  %v8146_v4 = vpack.c.bf16 %v2660_v24, %v2659_v1  ;;  %v2663_v57 = vld [vmem:[%s9397_s21 + $0x30] sm:$0xff]  ;;  %v2635_v3 = vsub.f32 0.0, %v2633_v10  ;;  %v6599_v24 = vld [vmem:[%s8696_s3 + $0x38] sm:$0xff] }
 0x777   :  { %2419 = vst.msk [vmem:[#allocation4 + $0xe8] sm:$0xff] %vm807_vm3, %v2415_v63  ;;  %8125 = vmatpush3.bf16.msra.mxu1 %v8124_v8  ;;  %v2541_v56 = vld [vmem:[#allocation4 + $0xc0] sm:$0xff]  ;;  %v8154_v29 = vpack.c.bf16 %v2664_v5, %v2663_v57  ;;  %v2636_v42 = vsub.f32 0.0, %v2634_v62  ;;  %v6597_v45 = vld [vmem:[%s8696_s3 + $0x28] sm:$0xff]  ;;  %v6592_v30 = vld [vmem:[%s8691_s29 + $0x30] sm:$0xff] }
 0x778   :  { %2418 = vst.msk [vmem:[#allocation4 + $0xe0] sm:$0xff] %vm807_vm3, %v2414_v48  ;;  %v2413_v20 = vld [vmem:[#allocation3 + $0xf8] sm:$0xff]  ;;  %v8126_v60 = vpack.c.bf16 %v2542_v49, %v2541_v56  ;;  %v2637_v43 = vmul.f32 1.442695, %v2635_v3  ;;  %v6587_v62 = vld [vmem:[%s8709_s7 + $0x1] ss:$0 sm:$0xff] }
 0x779   :  { %v2417_v14 = vadd.f32 %v2413_v20, %v2409_v39  ;;  %v2412_v0 = vld [vmem:[#allocation3 + $0xf0] sm:$0xff]  ;;  %v2639_v63 = vmul.f32 1.442695, %v2636_v42  ;;  %v6583_v39 = vld [vmem:[%s9420_s28] ss:$0 sm:$0xff] }
 0x77a   :  { %v2416_v32 = vadd.f32 %v2412_v0, %v2408_v58  ;;  %8127 = vmatprep.subr.bf16.mxu1 %v8126_v60  ;;  %v2544_v6 = vld [vmem:[#allocation4 + $0xd8] sm:$0xff]  ;;  %8505 = vpow2.f32 %v2637_v43  ;;  %v2556_v60 = vmul.f32 %v6583_v39, %v8800_v50 }
 0x77b   :  { %2421 = vst.msk [vmem:[#allocation4 + $0xf8] sm:$0xff] %vm807_vm3, %v2417_v14  ;;  %8129 = vmatpush3.bf16.msra.mxu1 %v8128_v2  ;;  %v2543_v9 = vld [vmem:[#allocation4 + $0xd0] sm:$0xff]  ;;  %8507 = vpow2.f32 %v2639_v63 }
 0x77c   :  { %2420 = vst.msk [vmem:[#allocation4 + $0xf0] sm:$0xff] %vm807_vm3, %v2416_v32  ;;  %v8130_v11 = vpack.c.bf16 %v2544_v6, %v2543_v9  ;;  %v2557_v9 = vmul.f32 %v6583_v39, %v8802_v51 }
 0x77e   :  { %8131 = vmatprep.subr.bf16.mxu1 %v8130_v11  ;;  %v2546_v31 = vld [vmem:[#allocation4 + $0xe8] sm:$0xff] }
 0x77f   :  { %8133 = vmatpush3.bf16.msra.mxu1 %v8132_v27  ;;  %v2545_v34 = vld [vmem:[#allocation4 + $0xe0] sm:$0xff] }
 0x780   :  { %v8134_v17 = vpack.c.bf16 %v2546_v31, %v2545_v34 }
 0x782   :  { %8135 = vmatprep.subr.bf16.mxu1 %v8134_v17  ;;  %v2548_v19 = vld [vmem:[#allocation4 + $0xf8] sm:$0xff]  ;;  %v6590_v17 = vld [vmem:[%s8691_s29 + $0x20] sm:$0xff] }
 0x783   :  { %8137 = vmatpush3.bf16.msra.mxu1 %v8136_v44  ;;  %v2547_v55 = vld [vmem:[#allocation4 + $0xf0] sm:$0xff]  ;;  %v6591_v44 = vld [vmem:[%s8691_s29 + $0x28] sm:$0xff] }
 0x784   :  { %v8138_v22 = vpack.c.bf16 %v2548_v19, %v2547_v55  ;;  %v8506_v59 = vpop.eup %8505  ;;  %v8158_v51 = vpack.c.bf16 %v6591_v44, %v6590_v17  ;;  %v6624_v17 = vld [vmem:[%s8750_s19 + $0x60] sm:$0xff]  ;;  %v6625_v44 = vld [vmem:[%s8750_s19 + $0x68] sm:$0xff] }
 0x785   :  { %v2641_v36 = vadd.f32 1.0, %v8506_v59  ;;  %v8508_v8 = vpop.eup %8507  ;;  %v6589_v59 = vld [vmem:[%s8714_s11 + $0x1] ss:$0 sm:$0xff] }
 0x786   :  { %8139 = vmatprep.subr.bf16.mxu1 %v8138_v22  ;;  %v2642_v48 = vadd.f32 1.0, %v8508_v8  ;;  %8159 = vmatprep.subr.bf16.mxu0 %v8158_v51 }
 0x787   :  { %8141 = vmatpush3.bf16.msra.mxu1 %v8140_v61  ;;  %8509 = vrcp.f32 %v2641_v36  ;;  %8161 = vmatpush3.bf16.msra.mxu0 %v8158_v51  ;;  %v6596_v61 = vld [vmem:[%s8696_s3 + $0x20] sm:$0xff]  ;;  %v8186_v51 = vpack.c.bf16 %v6625_v44, %v6624_v17 }
 0x788   :  { %8143 = vmatprep.subr.bf16.mxu1 %v8142_v47  ;;  %8511 = vrcp.f32 %v2642_v48 }
 0x78a   :  { %2623 = vmatmul.mubr.f32.vlgmr.msra.gmra.mrb[50].mxu1 %v2513_v54  ;;  %v8166_v54 = vpack.c.bf16 %v6597_v45, %v6596_v61  ;;  %v6643_v61 = vld [vmem:[%s8772_s27 + $0x48] sm:$0xff] }
 0x78b   :  { %2627 = vmatprep.mubr.f32.mxu1 %v2516_v35  ;;  %8145 = vmatpush3.bf16.msra.mxu1 %v8142_v47  ;;  %v6593_v35 = vld [vmem:[%s8691_s29 + $0x38] sm:$0xff]  ;;  %s8638_s29 = smov 27  }
 0x78c   :  { %8147 = vmatprep.subr.bf16.mxu1 %v8146_v4  ;;  %v8162_v1 = vpack.c.bf16 %v6593_v35, %v6592_v30  ;;  %s10101_s11 = sld [smem:[%s10226_s0 + %s8638_s29]]  }
 0x78e   :  { %2628 = vmatmul.mubr.f32.gmra.mrb[52].mxu1 %v2515_v37  ;;  %v6598_v37 = vld [vmem:[%s8696_s3 + $0x30] sm:$0xff]  ;;  %8163 = vmatprep.subr.bf16.mxu0 %v8162_v1 }
 0x78f   :  { %8149 = vmatpush3.bf16.msra.mxu1 %v8146_v4  ;;  %v8170_v4 = vpack.c.bf16 %v6599_v24, %v6598_v37  ;;  %8165 = vmatpush3.bf16.msra.mxu0 %v8162_v1  ;;  %v6611_v1 = vld [vmem:[%s8791_s8 + $0x1] ss:$0 sm:$0xff] }
 0x790   :  { %8151 = vmatprep.subr.bf16.mxu1 %v8150_v33 }
 0x791   :  { %v8510_v49 = vpop.eup %8509 }
 0x792   :  { %v2649_v53 = vsub.f32 1.0, %v8510_v49  ;;  %v8512_v12 = vpop.eup %8511 }
 0x793   :  { %8153 = vmatpush3.bf16.msra.mxu1 %v8150_v33  ;;  %v2650_v56 = vsub.f32 1.0, %v8512_v12 }
 0x794   :  { %8155 = vmatprep.subr.bf16.mxu1 %v8154_v29  ;;  %v2651_v20 = vsel %vm2647_vm4, %v8510_v49, %v2649_v53  ;;  %v2958_v49 = vld [vmem:[%s8725_s15] sm:$0xff] }
 0x795   :  { %v2653_v0 = vmul.f32 %v2651_v20, %v8731_v28  ;;  %v2652_v6 = vsel %vm2648_vm5, %v8512_v12, %v2650_v56  ;;  %v2959_v20 = vld [vmem:[%s8725_s15 + $0x8] sm:$0xff] }
 0x796   :  { %v2654_v27 = vmul.f32 %v8729_v26, %v2652_v6  ;;  %v6620_v6 = vld [vmem:[%s8750_s19 + $0x40] sm:$0xff] }
 0x797   :  { %8157 = vmatpush3.bf16.msra.mxu1 %v8154_v29 }
 0x798   :  { %8167 = vmatprep.subr.bf16.mxu1 %v8166_v54 }
 0x85d   :  { %v7042_v7 = vpop.f32.mrb[50].mxu1 }
 0x85e   :  { %v7043_v58 = vpop.f32.mrb[51].mxu1 }
 0x85f   :  { %v7044_v14 = vadd.f32 %v7043_v58, %v7042_v7  ;;  %v2960_v58 = vld [vmem:[%s8725_s15 + $0x10] sm:$0xff] }
 0x861   :  { %v2625_v2 = vadd.f32 %v7044_v14, %v2556_v60  ;;  %v7045_v32 = vpop.f32.mrb[52].mxu1  ;;  %v2961_v60 = vld [vmem:[%s8725_s15 + $0x18] sm:$0xff]  ;;  %v2962_v14 = vld [vmem:[%s8725_s15 + $0x20] sm:$0xff] }
 0x862   :  { %v7046_v23 = vpop.f32.mrb[53].mxu1 }
 0x863   :  { %v2655_v46 = vmul.f32 %v2653_v0, %v2625_v2  ;;  %v7047_v11 = vadd.f32 %v7046_v23, %v7045_v32  ;;  %v2963_v0 = vld [vmem:[%s8725_s15 + $0x28] sm:$0xff]  ;;  %v2964_v2 = vld [vmem:[%s8725_s15 + $0x30] sm:$0xff]  ;;  %v2965_v32 = vld [vmem:[%s8725_s15 + $0x38] sm:$0xff]  ;;  %s8639_s15 = smov 25  }
 0x864   :  { %v6621_v23 = vld [vmem:[%s8750_s19 + $0x48] sm:$0xff] }
 0x865   :  { %v2630_v31 = vadd.f32 %v7047_v11, %v2557_v9  ;;  %7605 = vmatprep.mubr.msk.f32.mxu1 %vm807_vm3, %v2655_v46  ;;  %v8178_v46 = vpack.c.bf16 %v6621_v23, %v6620_v6  ;;  %v6632_v9 = vld [vmem:[%s8755_s23 + $0x40] sm:$0xff]  ;;  %v6633_v11 = vld [vmem:[%s8755_s23 + $0x48] sm:$0xff] }
 0x867   :  { %v2656_v50 = vmul.f32 %v2654_v27, %v2630_v31  ;;  %v8194_v27 = vpack.c.bf16 %v6633_v11, %v6632_v9  ;;  %v6622_v31 = vld [vmem:[%s8750_s19 + $0x50] sm:$0xff] }
 0x869   :  { %7606 = vmatmul.mubr.msk.f32.vlgmr.msra.gmra.mrb[54].mxu1 %vm807_vm3, %v2656_v50  ;;  %v6623_v50 = vld [vmem:[%s8750_s19 + $0x58] sm:$0xff] }
 0x86a   :  { %8169 = vmatpush3.bf16.msra.mxu1 %v8166_v54  ;;  %v6613_v54 = vld [vmem:[%s8786_s2 + $0x4] ss:$0 sm:$0xff] }
 0x86b   :  { %8171 = vmatprep.subr.bf16.mxu1 %v8170_v4 }
 0x86e   :  { %8173 = vmatpush3.bf16.msra.mxu1 %v8170_v4  ;;  %v6615_v4 = vld [vmem:[%s8786_s2 + $0x5] ss:$0 sm:$0xff] }
 0x86f   :  { %8195 = vmatprep.subr.bf16.mxu1 %v8194_v27 }
 0x93c   :  { %v7607_v15 = vpop.f32.mrb[54].mxu1 }
 0x93d   :  { %v2737_v28 = vpop.f32.mrb[55].mxu1  ;;  %v2749_v52 = vsel %vm367_vm15, %v7607_v15, 0.0 }
 0x93e   :  { %2750 = vadd.xlane.f32.xlu0 %v2749_v52  ;;  %v2746_v34 = vsel %vm367_vm15, %v2737_v28, 0.0  ;;  %v6635_v52 = vld [vmem:[%s8755_s23 + $0x58] sm:$0xff] }
 0x93f   :  { %2747 = vadd.xlane.f32.xlu1 %v2746_v34 }
 0x9cb   :  { %v2751_v26 = vpop.xlane.xlu0 %2750 }
 0x9cc   :  { %v2753_v18 = vmul.f32 0.03125, %v2751_v26  ;;  %v2748_v13 = vpop.xlane.xlu1 %2747  ;;  %v6636_v26 = vld [vmem:[%s8755_s23 + $0x60] sm:$0xff] }
 0x9cd   :  { %v2752_v19 = vmul.f32 0.03125, %v2748_v13 }
 0x9ce   :  { %v2755_v16 = vsub.f32 %v7607_v15, %v2753_v18  ;;  %v8182_v15 = vpack.c.bf16 %v6623_v50, %v6622_v31  ;;  %v6637_v18 = vld [vmem:[%s8755_s23 + $0x68] sm:$0xff] }
 0x9cf   :  { %v2754_v41 = vsub.f32 %v2737_v28, %v2752_v19  ;;  %v6634_v28 = vld [vmem:[%s8755_s23 + $0x50] sm:$0xff]  ;;  %v8202_v13 = vpack.c.bf16 %v6637_v18, %v6636_v26  ;;  %v6646_v18 = vld [vmem:[%s8772_s27 + $0x60] sm:$0xff] }
 0x9d0   :  { %v2757_v55 = vmul.f32 %v2755_v16, %v2755_v16  ;;  %v8198_v34 = vpack.c.bf16 %v6635_v52, %v6634_v28  ;;  %v6626_v19 = vld [vmem:[%s8750_s19 + $0x70] sm:$0xff] }
 0x9d1   :  { %v2756_v22 = vmul.f32 %v2754_v41, %v2754_v41  ;;  %v6644_v52 = vld [vmem:[%s8772_s27 + $0x50] sm:$0xff] }
 0x9d2   :  { %v2761_v47 = vsel %vm367_vm15, %v2757_v55, 0.0  ;;  %v6638_v55 = vld [vmem:[%s8755_s23 + $0x70] sm:$0xff] }
 0x9d3   :  { %2762 = vadd.xlane.f32.xlu0 %v2761_v47  ;;  %v2758_v25 = vsel %vm367_vm15, %v2756_v22, 0.0  ;;  %v6639_v22 = vld [vmem:[%s8755_s23 + $0x78] sm:$0xff] }
 0x9d4   :  { %2759 = vadd.xlane.f32.xlu1 %v2758_v25  ;;  %v8206_v47 = vpack.c.bf16 %v6639_v22, %v6638_v55  ;;  %v6642_v25 = vld [vmem:[%s8772_s27 + $0x40] sm:$0xff] }
 0x9d5   :  { %v9487_v45 = vpack.c.bf16 %v6643_v61, %v6642_v25  ;;  %v9519_v22 = vld [vmem:[%s8824_s13] sm:$0xff] }
 0xa60   :  { %v2763_v38 = vpop.xlane.xlu0 %2762 }
 0xa61   :  { %v2765_v40 = vmul.f32 0.03125, %v2763_v38  ;;  %v2760_v33 = vpop.xlane.xlu1 %2759 }
 0xa62   :  { %v2764_v57 = vmul.f32 0.03125, %v2760_v33 }
 0xa63   :  { %v2767_v5 = vadd.f32 1e-05, %v2765_v40 }
 0xa64   :  { %v2766_v29 = vadd.f32 1e-05, %v2764_v57 }
 0xa65   :  { %8513 = vrsqrt.f32 %v2767_v5 }
 0xa66   :  { %8515 = vrsqrt.f32 %v2766_v29 }
 0xa6f   :  { %v8514_v10 = vpop.eup %8513 }
 0xa70   :  { %v8516_v3 = vpop.eup %8515  ;;  %v2771_v42 = vmul.f32 %v8514_v10, %v2755_v16  ;;  %v6627_v16 = vld [vmem:[%s8750_s19 + $0x78] sm:$0xff]  ;;  %v6617_v10 = vld [vmem:[%s8786_s2 + $0x6] ss:$0 sm:$0xff] }
 0xa71   :  { %v2770_v43 = vmul.f32 %v8516_v3, %v2754_v41  ;;  %v8190_v41 = vpack.c.bf16 %v6627_v16, %v6626_v19  ;;  %v6648_v16 = vld [vmem:[%s8772_s27 + $0x70] sm:$0xff] }
 0xa72   :  { %v2781_v63 = vmul.f32 %v6587_v62, %v2771_v42 }
 0xa73   :  { %v2780_v36 = vmul.f32 %v6587_v62, %v2770_v43 }
 0xa74   :  { %v2791_v48 = vadd.f32 %v6589_v59, %v2781_v63 }
 0xa75   :  { %v2790_v8 = vadd.f32 %v6589_v59, %v2780_v36  ;;  %v6619_v36 = vld [vmem:[%s8786_s2 + $0x7] ss:$0 sm:$0xff]  ;;  %s8640_s2 = smov 26  }
 0xa77   :  { %7616 = vmatprep.mubr.msk.f32.mxu0 %vm367_vm15, %v2790_v8  ;;  %7627 = vmatprep.mubr.msk.f32.mxu1 %vm367_vm15, %v2790_v8 }
 0xa78   :  { %7617 = vmatmul.mubr.msk.f32.vlgmr.msra.gmra.mrb[70].mxu0 %vm367_vm15, %v2791_v48  ;;  %7628 = vmatmul.mubr.msk.f32.vlgmr.msra.gmra.mrb[56].mxu1 %vm367_vm15, %v2791_v48 }
 0xa79   :  { %7634 = vmatprep.mubr.msk.f32.mxu0 %vm585_vm0, %v2958_v49  ;;  %8197 = vmatpush3.bf16.msra.mxu1 %v8194_v27 }
 0xa7a   :  { %8199 = vmatprep.subr.bf16.mxu1 %v8198_v34 }
 0xa7d   :  { %8201 = vmatpush3.bf16.msra.mxu1 %v8198_v34  ;;  %v6645_v34 = vld [vmem:[%s8772_s27 + $0x58] sm:$0xff] }
 0xa7e   :  { %8203 = vmatprep.subr.bf16.mxu1 %v8202_v13  ;;  %v8214_v26 = vpack.c.bf16 %v6645_v34, %v6644_v52  ;;  %v9618_v52 = vld [vmem:[%s8824_s13 + $0x70] sm:$0xff]  ;;  %v9629_v34 = vld [vmem:[%s8824_s13 + $0x78] sm:$0xff] }
 0xa81   :  { %8205 = vmatpush3.bf16.msra.mxu1 %v8202_v13  ;;  %v6647_v13 = vld [vmem:[%s8772_s27 + $0x68] sm:$0xff] }
 0xa82   :  { %8207 = vmatprep.subr.bf16.mxu1 %v8206_v47  ;;  %v8218_v19 = vpack.c.bf16 %v6647_v13, %v6646_v18  ;;  %v9646_v18 = vld [vmem:[%s8824_s13 + $0x90] sm:$0xff]  ;;  %v9657_v13 = vld [vmem:[%s8824_s13 + $0x98] sm:$0xff] }
 0xa85   :  { %8209 = vmatpush3.bf16.msra.mxu1 %v8206_v47  ;;  %v6629_v47 = vld [vmem:[%s8836_s18 + $0x1] ss:$0 sm:$0xff]  ;;  %s6446_s18 = sld [smem:[%s10226_s0 + %s8640_s2]]  }
 0xb4b   :  { %v7618_v53 = vpop.f32.mrb[70].mxu0  ;;  %v9451_v12 = vpop.f32.mrb[56].mxu1 }
 0xb4c   :  { %v2869_v39 = vpop.f32.mrb[71].mxu0  ;;  %v9453_v7 = vpop.f32.mrb[57].mxu1  ;;  %vm5035_vm9 = vcmp.ge.f32.partialorder %v9451_v12, 0.0 }
 0xb4d   :  { %v8174_v56 = vpack.c.bf16 %v7618_v53, %v2869_v39  ;;  %vm5034_vm8 = vcmp.ge.f32.partialorder %v9453_v7, 0.0 }
 0xb4f   :  { %8175 = vmatprep.subr.bf16.mxu0 %v8174_v56 }
 0xb50   :  { %8177 = vmatpush3.bf16.msra.mxu0 %v8174_v56 }
 0xb51   :  { %8179 = vmatprep.subr.bf16.mxu0 %v8178_v46 }
 0xb53   :  { %7635 = vmatmul.mubr.msk.f32.vlgmr.msra.gmra.mrb[72].mxu0 %vm585_vm0, %v2959_v20 }
 0xb54   :  { %7637 = vmatprep.mubr.msk.f32.mxu0 %vm585_vm0, %v2960_v58  ;;  %8181 = vmatpush3.bf16.msra.mxu0 %v8178_v46 }
 0xb55   :  { %8183 = vmatprep.subr.bf16.mxu0 %v8182_v15 }
 0xb57   :  { %7638 = vmatmul.mubr.msk.f32.gmra.mrb[74].mxu0 %vm585_vm0, %v2961_v60 }
 0xb58   :  { %7640 = vmatprep.mubr.msk.f32.mxu0 %vm585_vm0, %v2962_v14  ;;  %8185 = vmatpush3.bf16.msra.mxu0 %v8182_v15 }
 0xb59   :  { %8187 = vmatprep.subr.bf16.mxu0 %v8186_v51 }
 0xb5b   :  { %7641 = vmatmul.mubr.msk.f32.gmra.mrb[76].mxu0 %vm585_vm0, %v2963_v0 }
 0xb5c   :  { %7643 = vmatprep.mubr.msk.f32.mxu0 %vm585_vm0, %v2964_v2  ;;  %8189 = vmatpush3.bf16.msra.mxu0 %v8186_v51 }
 0xb5d   :  { %8191 = vmatprep.subr.bf16.mxu0 %v8190_v41 }
 0xb5f   :  { %7644 = vmatmul.mubr.msk.f32.gmra.mrb[78].mxu0 %vm585_vm0, %v2965_v32 }
 0xb60   :  { %8193 = vmatpush3.bf16.msra.mxu0 %v8190_v41  ;;  %v6649_v41 = vld [vmem:[%s8772_s27 + $0x78] sm:$0xff]  ;;  %s6445_s27 = sld [smem:[%s10226_s0 + %s8639_s15]]  }
 0xb61   :  { %8211 = vmatprep.subr.bf16.mxu0 %v9487_v45  ;;  %v8222_v55 = vpack.c.bf16 %v6649_v41, %v6648_v16  ;;  %v3479_v16 = vld [vmem:[%s8824_s13 + $0xa8] sm:$0xff]  ;;  %v3480_v41 = vld [vmem:[%s8824_s13 + $0xb0] sm:$0xff] }
 0xc26   :  { %v7636_v30 = vpop.f32.mrb[72].mxu0 }
 0xc27   :  { %v3113_v35 = vmul.f32 %v7636_v30, %v6613_v54  ;;  %v3056_v37 = vpop.f32.mrb[73].mxu0 }
 0xc28   :  { %v3112_v24 = vmul.f32 %v6613_v54, %v3056_v37 }
 0xc29   :  { %v3115_v40 = vadd.f32 %v6611_v1, %v3113_v35 }
 0xc2a   :  { %v7639_v38 = vpop.f32.mrb[74].mxu0  ;;  %v3114_v5 = vadd.f32 %v6611_v1, %v3112_v24 }
 0xc2b   :  { %v3125_v33 = vmul.f32 %v7639_v38, %v6615_v4  ;;  %v3066_v57 = vpop.f32.mrb[75].mxu0 }
 0xc2c   :  { %v3124_v29 = vmul.f32 %v6615_v4, %v3066_v57 }
 0xc2d   :  { %v3127_v62 = vadd.f32 %v3125_v33, %v3115_v40 }
 0xc2e   :  { %v3126_v3 = vadd.f32 %v3124_v29, %v3114_v5  ;;  %v7642_v42 = vpop.f32.mrb[76].mxu0 }
 0xc2f   :  { %v3137_v43 = vmul.f32 %v7642_v42, %v6617_v10  ;;  %v3076_v63 = vpop.f32.mrb[77].mxu0 }
 0xc30   :  { %v3136_v59 = vmul.f32 %v6617_v10, %v3076_v63 }
 0xc31   :  { %v3139_v8 = vadd.f32 %v3137_v43, %v3127_v62 }
 0xc32   :  { %v3138_v48 = vadd.f32 %v3136_v59, %v3126_v3  ;;  %v7645_v49 = vpop.f32.mrb[78].mxu0 }
 0xc33   :  { %v3149_v53 = vmul.f32 %v7645_v49, %v6619_v36  ;;  %v3086_v39 = vpop.f32.mrb[79].mxu0 }
 0xc34   :  { %v3148_v56 = vmul.f32 %v6619_v36, %v3086_v39 }
 0xc35   :  { %v3151_v20 = vadd.f32 %v3149_v53, %v3139_v8 }
 0xc36   :  { %v3150_v58 = vadd.f32 %v3148_v56, %v3138_v48 }
 0xc37   :  { %v3153_v60 = vand.u32 2147483647, %v3151_v20  ;;  %vm3167_vm6 = vcmp.ge.f32.partialorder %v3151_v20, 0.0 }
 0xc38   :  { %v3152_v14 = vand.u32 2147483647, %v3150_v58  ;;  %vm3166_vm7 = vcmp.ge.f32.partialorder %v3150_v58, 0.0 }
 0xc39   :  { %v3155_v0 = vsub.f32 0.0, %v3153_v60 }
 0xc3a   :  { %v3154_v2 = vsub.f32 0.0, %v3152_v14  ;;  %v9535_v14 = vld [vmem:[%s8824_s13 + $0x8] sm:$0xff] }
 0xc3b   :  { %v3158_v32 = vmul.f32 1.442695, %v3155_v0  ;;  %v9538_v0 = vld [vmem:[%s8824_s13 + $0x10] sm:$0xff] }
 0xc3c   :  { %v3156_v6 = vmul.f32 1.442695, %v3154_v2 }
 0xc3d   :  { %8517 = vpow2.f32 %v3158_v32  ;;  %v9545_v32 = vld [vmem:[%s8824_s13 + $0x18] sm:$0xff] }
 0xc3e   :  { %8519 = vpow2.f32 %v3156_v6  ;;  %v9548_v6 = vld [vmem:[%s8824_s13 + $0x20] sm:$0xff] }
 0xc47   :  { %v8518_v23 = vpop.eup %8517 }
 0xc48   :  { %v8520_v46 = vpop.eup %8519  ;;  %v3161_v9 = vadd.f32 1.0, %v8518_v23  ;;  %v9559_v23 = vld [vmem:[%s8824_s13 + $0x28] sm:$0xff] }
 0xc49   :  { %v3160_v11 = vadd.f32 1.0, %v8520_v46  ;;  %v9562_v46 = vld [vmem:[%s8824_s13 + $0x30] sm:$0xff] }
 0xc4a   :  { %8521 = vrcp.f32 %v3161_v9  ;;  %v9573_v9 = vld [vmem:[%s8824_s13 + $0x38] sm:$0xff] }
 0xc4b   :  { %8523 = vrcp.f32 %v3160_v11  ;;  %v9576_v11 = vld [vmem:[%s8824_s13 + $0x40] sm:$0xff] }
 0xc54   :  { %v8522_v27 = vpop.eup %8521 }
 0xc55   :  { %v8524_v31 = vpop.eup %8523  ;;  %v3169_v50 = vsub.f32 1.0, %v8522_v27 }
 0xc56   :  { %v3168_v15 = vsub.f32 1.0, %v8524_v31 }
 0xc57   :  { %v3171_v28 = vsel %vm3167_vm6, %v8522_v27, %v3169_v50  ;;  %v9587_v27 = vld [vmem:[%s8824_s13 + $0x48] sm:$0xff]  ;;  %v9601_v50 = vld [vmem:[%s8824_s13 + $0x58] sm:$0xff] }
 0xc58   :  { %v3170_v17 = vsel %vm3166_vm7, %v8524_v31, %v3168_v15  ;;  %v9499_v51 = vmul.f32 %v3171_v28, %v3151_v20  ;;  %v4809_v20 = vld [vmem:[%s8846_s24 + $0x8] sm:$0xff]  ;;  %v9590_v31 = vld [vmem:[%s8824_s13 + $0x50] sm:$0xff]  ;;  %v9604_v15 = vld [vmem:[%s8824_s13 + $0x60] sm:$0xff] }
 0xc59   :  { %v9497_v44 = vmul.f32 %v3170_v17, %v3150_v58  ;;  %v4811_v58 = vld [vmem:[%s8846_s24 + $0x18] sm:$0xff]  ;;  %v9615_v28 = vld [vmem:[%s8824_s13 + $0x68] sm:$0xff]  ;;  %v9632_v17 = vld [vmem:[%s8824_s13 + $0x80] sm:$0xff] }
 0xc5a   :  { %v8238_v2 = vpack.c.bf16 %v4811_v58, %v4809_v20 }
 0xc5b   :  { %7662 = vmatprep.mubr.msk.f32.mxu0 %vm807_vm3, %v9497_v44  ;;  %7681 = vmatprep.mubr.msk.f32.mxu1 %vm807_vm3, %v9497_v44 }
 0xc5c   :  { %7663 = vmatmul.mubr.msk.f32.vlgmr.msra.gmra.mrb[80].mxu0 %vm807_vm3, %v9499_v51  ;;  %7682 = vmatmul.mubr.msk.f32.vlgmr.msra.gmra.mrb[58].mxu1 %vm807_vm3, %v9499_v51 }
 0xc5d   :  { %8213 = vmatpush3.bf16.msra.mxu0 %v9487_v45  ;;  %7700 = vmatprep.mubr.msk.f32.mxu0 %vm807_vm3, %v9497_v44 }
 0xc5e   :  { %8215 = vmatprep.subr.bf16.mxu0 %v8214_v26  ;;  %7707 = vmatprep.mubr.msk.f32.mxu1 %vm585_vm0, %v9519_v22 }
 0xc61   :  { %8217 = vmatpush3.bf16.msra.mxu0 %v8214_v26  ;;  %v9643_v26 = vld [vmem:[%s8824_s13 + $0x88] sm:$0xff] }
 0xc62   :  { %8219 = vmatprep.subr.bf16.mxu0 %v8218_v19 }
 0xc65   :  { %8221 = vmatpush3.bf16.msra.mxu0 %v8218_v19  ;;  %v9660_v19 = vld [vmem:[%s8824_s13 + $0xa0] sm:$0xff] }
 0xc66   :  { %8223 = vmatprep.subr.bf16.mxu0 %v8222_v55 }
 0xc69   :  { %8225 = vmatpush3.bf16.msra.mxu0 %v8222_v55  ;;  %v3481_v55 = vld [vmem:[%s8824_s13 + $0xb8] sm:$0xff] }
 0xc6c   :  { %7701 = vmatmul.mubr.msk.f32.vlgmr.msra.gmra.mrb[82].mxu0 %vm807_vm3, %v9499_v51 }
 0xc6d   :  { %7759 = vmatprep.mubr.msk.f32.mxu0 %vm585_vm0, %v9519_v22 }
 0xd2f   :  { %v7664_v25 = vpop.f32.mrb[80].mxu0  ;;  %v7683_v61 = vpop.f32.mrb[58].mxu1 }
 0xd30   :  { %v3269_v45 = vadd.f32 %v7664_v25, %v6629_v47  ;;  %v3263_v54 = vpop.f32.mrb[81].mxu0  ;;  %v3365_v30 = vpop.f32.mrb[59].mxu1  ;;  %v3483_v25 = vld [vmem:[%s8824_s13 + $0xc8] sm:$0xff] }
 0xd31   :  { %v3264_v35 = vadd.f32 %v6629_v47, %v3263_v54  ;;  %v8234_v37 = vpack.c.bf16 %v7683_v61, %v3365_v30  ;;  %v3482_v47 = vld [vmem:[%s8824_s13 + $0xc0] sm:$0xff]  ;;  %v3484_v61 = vld [vmem:[%s8824_s13 + $0xd0] sm:$0xff]  ;;  %v3487_v30 = vld [vmem:[%s8824_s13 + $0xe8] sm:$0xff] }
 0xd32   :  { %v3275_v1 = vand.u32 2147483647, %v3269_v45  ;;  %v3273_v63 = vmax.f32 %v3269_v45, 0.0  ;;  %v3485_v45 = vld [vmem:[%s8824_s13 + $0xd8] sm:$0xff]  ;;  %v3486_v54 = vld [vmem:[%s8824_s13 + $0xe0] sm:$0xff] }
 0xd33   :  { %v3274_v24 = vand.u32 2147483647, %v3264_v35  ;;  %v3272_v36 = vmax.f32 %v3264_v35, 0.0  ;;  %v3488_v35 = vld [vmem:[%s8824_s13 + $0xf0] sm:$0xff] }
 0xd34   :  { %v3277_v4 = vsub.f32 0.0, %v3275_v1  ;;  %v4808_v1 = vld [vmem:[%s8846_s24] sm:$0xff] }
 0xd35   :  { %v3276_v38 = vsub.f32 0.0, %v3274_v24  ;;  %v4810_v24 = vld [vmem:[%s8846_s24 + $0x10] sm:$0xff]  ;;  %s8641_s24 = smov 11  }
 0xd36   :  { %v3280_v40 = vmul.f32 1.442695, %v3277_v4  ;;  %v8240_v4 = vpack.c.bf16 %v4810_v24, %v4808_v1  ;;  %s10118_s4 = sld [smem:[%s10226_s0 + %s8641_s24]]  }
 0xd37   :  { %v3278_v33 = vmul.f32 1.442695, %v3276_v38  ;;  %v6748_v38 = vld [vmem:[%s9089_s30 + $0x100] sm:$0xff] }
 0xd38   :  { %8525 = vpow2.f32 %v3280_v40 }
 0xd39   :  { %8527 = vpow2.f32 %v3278_v33 }
 0xd3f   :  { %v9526_v57 = vpop.f32.mrb[82].mxu0 }
 0xd40   :  { %v9528_v5 = vpop.f32.mrb[83].mxu0 }
 0xd42   :  { %v8526_v29 = vpop.eup %8525 }
 0xd43   :  { %v8528_v10 = vpop.eup %8527  ;;  %v3283_v62 = vadd.f32 1.0, %v8526_v29 }
 0xd44   :  { %v3282_v3 = vadd.f32 1.0, %v8528_v10 }
 0xd45   :  { %8529 = vlog2.f32 %v3283_v62  ;;  %v6751_v62 = vld [vmem:[%s9089_s30 + $0x118] sm:$0xff] }
 0xd46   :  { %8531 = vlog2.f32 %v3282_v3 }
 0xd4f   :  { %v8530_v42 = vpop.eup %8529 }
 0xd50   :  { %v8532_v43 = vpop.eup %8531  ;;  %v3287_v59 = vmul.f32 0.6931472, %v8530_v42  ;;  %v6750_v42 = vld [vmem:[%s9089_s30 + $0x110] sm:$0xff] }
 0xd51   :  { %v3285_v8 = vmul.f32 0.6931472, %v8532_v43 }
 0xd52   :  { %v3289_v48 = vadd.f32 %v3287_v59, %v3273_v63 }
 0xd53   :  { %v3288_v49 = vadd.f32 %v3285_v8, %v3272_v36  ;;  %v6753_v36 = vld [vmem:[%s9089_s30 + $0x128] sm:$0xff] }
 0xd54   :  { %v3812_v53 = vmul.f32 %v3289_v48, %v9499_v51 }
 0xd55   :  { %v8226_v39 = vpack.c.bf16 %v3289_v48, %v3288_v49  ;;  %v3811_v56 = vmul.f32 %v3288_v49, %v9497_v44  ;;  %v6752_v49 = vld [vmem:[%s9089_s30 + $0x120] sm:$0xff] }
 0xd57   :  { %8227 = vmatprep.subr.bf16.mxu1 %v8226_v39  ;;  %v8230_v60 = vpack.c.bf16 %v3812_v53, %v3811_v56 }
 0xd58   :  { %8229 = vmatpush3.bf16.msra.mxu1 %v8226_v39 }
 0xd59   :  { %8231 = vmatprep.subr.bf16.mxu0 %v8230_v60  ;;  %8235 = vmatprep.subr.bf16.mxu1 %v8234_v37 }
 0xd5a   :  { %8233 = vmatpush3.bf16.msra.mxu0 %v8230_v60 }
 0xd5b   :  { %7708 = vmatmul.mubr.msk.f32.vlgmr.msra.gmra.mrb[60].mxu1 %vm585_vm0, %v9535_v14 }
 0xd5c   :  { %8237 = vmatpush3.bf16.msra.mxu1 %v8234_v37  ;;  %7710 = vmatprep.mubr.msk.f32.mxu1 %vm585_vm0, %v9538_v0  ;;  %v3489_v37 = vld [vmem:[%s8824_s13 + $0xf8] sm:$0xff] }
 0xd5d   :  { %8239 = vmatprep.subr.bf16.mxu1 %v8238_v2  ;;  %7760 = vmatmul.mubr.msk.f32.vlgmr.msra.gmra.mrb[84].mxu0 %vm585_vm0, %v9535_v14  ;;  %v6754_v2 = vld [vmem:[%s9089_s30 + $0x130] sm:$0xff] }
 0xd5e   :  { %7762 = vmatprep.mubr.msk.f32.mxu0 %vm585_vm0, %v9538_v0 }
 0xd5f   :  { %7711 = vmatmul.mubr.msk.f32.gmra.mrb[62].mxu1 %vm585_vm0, %v9545_v32 }
 0xd60   :  { %7713 = vmatprep.mubr.msk.f32.mxu1 %vm585_vm0, %v9548_v6 }
 0xd61   :  { %7763 = vmatmul.mubr.msk.f32.gmra.mrb[86].mxu0 %vm585_vm0, %v9545_v32 }
 0xd62   :  { %7765 = vmatprep.mubr.msk.f32.mxu0 %vm585_vm0, %v9548_v6 }
 0xd63   :  { %7714 = vmatmul.mubr.msk.f32.gmra.mrb[64].mxu1 %vm585_vm0, %v9559_v23 }
 0xd64   :  { %7716 = vmatprep.mubr.msk.f32.mxu1 %vm585_vm0, %v9562_v46 }
 0xd65   :  { %7766 = vmatmul.mubr.msk.f32.gmra.mrb[88].mxu0 %vm585_vm0, %v9559_v23 }
 0xd66   :  { %7768 = vmatprep.mubr.msk.f32.mxu0 %vm585_vm0, %v9562_v46 }
 0xd67   :  { %7717 = vmatmul.mubr.msk.f32.gmra.mrb[66].mxu1 %vm585_vm0, %v9573_v9 }
 0xd68   :  { %7719 = vmatprep.mubr.msk.f32.mxu1 %vm585_vm0, %v9576_v11 }
 0xd69   :  { %7769 = vmatmul.mubr.msk.f32.gmra.mrb[90].mxu0 %vm585_vm0, %v9573_v9 }
 0xd6a   :  { %7771 = vmatprep.mubr.msk.f32.mxu0 %vm585_vm0, %v9576_v11 }
 0xd6b   :  { %7720 = vmatmul.mubr.msk.f32.gmra.mrb[68].mxu1 %vm585_vm0, %v9587_v27 }
 0xd6c   :  { %7722 = vmatprep.mubr.msk.f32.mxu1 %vm585_vm0, %v9590_v31 }
 0xd6d   :  { %7772 = vmatmul.mubr.msk.f32.gmra.mrb[92].mxu0 %vm585_vm0, %v9587_v27 }
 0xd6e   :  { %7774 = vmatprep.mubr.msk.f32.mxu0 %vm585_vm0, %v9590_v31 }
 0xd6f   :  { %7723 = vmatmul.mubr.msk.f32.gmra.mrb[70].mxu1 %vm585_vm0, %v9601_v50 }
 0xd70   :  { %7725 = vmatprep.mubr.msk.f32.mxu1 %vm585_vm0, %v9604_v15 }
 0xd71   :  { %7775 = vmatmul.mubr.msk.f32.gmra.mrb[94].mxu0 %vm585_vm0, %v9601_v50 }
 0xd72   :  { %7777 = vmatprep.mubr.msk.f32.mxu0 %vm585_vm0, %v9604_v15 }
 0xd73   :  { %7726 = vmatmul.mubr.msk.f32.gmra.mrb[72].mxu1 %vm585_vm0, %v9615_v28 }
 0xd74   :  { %7728 = vmatprep.mubr.msk.f32.mxu1 %vm585_vm0, %v9618_v52 }
 0xd75   :  { %7778 = vmatmul.mubr.msk.f32.gmra.mrb[96].mxu0 %vm585_vm0, %v9615_v28 }
 0xd76   :  { %7780 = vmatprep.mubr.msk.f32.mxu0 %vm585_vm0, %v9618_v52 }
 0xd77   :  { %7729 = vmatmul.mubr.msk.f32.gmra.mrb[74].mxu1 %vm585_vm0, %v9629_v34 }
 0xd78   :  { %7731 = vmatprep.mubr.msk.f32.mxu1 %vm585_vm0, %v9632_v17 }
 0xd79   :  { %7781 = vmatmul.mubr.msk.f32.gmra.mrb[98].mxu0 %vm585_vm0, %v9629_v34 }
 0xd7a   :  { %7783 = vmatprep.mubr.msk.f32.mxu0 %vm585_vm0, %v9632_v17 }
 0xd7b   :  { %7732 = vmatmul.mubr.msk.f32.gmra.mrb[76].mxu1 %vm585_vm0, %v9643_v26 }
 0xd7c   :  { %7734 = vmatprep.mubr.msk.f32.mxu1 %vm585_vm0, %v9646_v18 }
 0xd7d   :  { %7784 = vmatmul.mubr.msk.f32.gmra.mrb[100].mxu0 %vm585_vm0, %v9643_v26 }
 0xd7e   :  { %7786 = vmatprep.mubr.msk.f32.mxu0 %vm585_vm0, %v9646_v18 }
 0xd7f   :  { %7735 = vmatmul.mubr.msk.f32.gmra.mrb[78].mxu1 %vm585_vm0, %v9657_v13 }
 0xd80   :  { %7737 = vmatprep.mubr.msk.f32.mxu1 %vm585_vm0, %v9660_v19 }
 0xd81   :  { %7787 = vmatmul.mubr.msk.f32.gmra.mrb[102].mxu0 %vm585_vm0, %v9657_v13 }
 0xd82   :  { %7789 = vmatprep.mubr.msk.f32.mxu0 %vm585_vm0, %v9660_v19 }
 0xd83   :  { %7738 = vmatmul.mubr.msk.f32.gmra.mrb[80].mxu1 %vm585_vm0, %v3479_v16 }
 0xd84   :  { %7740 = vmatprep.mubr.msk.f32.mxu1 %vm585_vm0, %v3480_v41 }
 0xd85   :  { %7790 = vmatmul.mubr.msk.f32.gmra.mrb[104].mxu0 %vm585_vm0, %v3479_v16 }
 0xd86   :  { %7792 = vmatprep.mubr.msk.f32.mxu0 %vm585_vm0, %v3480_v41 }
 0xd87   :  { %7741 = vmatmul.mubr.msk.f32.gmra.mrb[82].mxu1 %vm585_vm0, %v3481_v55 }
 0xd88   :  { %7743 = vmatprep.mubr.msk.f32.mxu1 %vm585_vm0, %v3482_v47 }
 0xd89   :  { %7793 = vmatmul.mubr.msk.f32.gmra.mrb[106].mxu0 %vm585_vm0, %v3481_v55 }
 0xd8a   :  { %7795 = vmatprep.mubr.msk.f32.mxu0 %vm585_vm0, %v3482_v47 }
 0xd8b   :  { %7744 = vmatmul.mubr.msk.f32.gmra.mrb[84].mxu1 %vm585_vm0, %v3483_v25 }
 0xd8c   :  { %7746 = vmatprep.mubr.msk.f32.mxu1 %vm585_vm0, %v3484_v61 }
 0xd8d   :  { %7796 = vmatmul.mubr.msk.f32.gmra.mrb[108].mxu0 %vm585_vm0, %v3483_v25 }
 0xd8e   :  { %7798 = vmatprep.mubr.msk.f32.mxu0 %vm585_vm0, %v3484_v61 }
 0xd8f   :  { %7747 = vmatmul.mubr.msk.f32.gmra.mrb[86].mxu1 %vm585_vm0, %v3485_v45 }
 0xd90   :  { %7749 = vmatprep.mubr.msk.f32.mxu1 %vm585_vm0, %v3486_v54 }
 0xd91   :  { %7799 = vmatmul.mubr.msk.f32.gmra.mrb[110].mxu0 %vm585_vm0, %v3485_v45 }
 0xd92   :  { %7801 = vmatprep.mubr.msk.f32.mxu0 %vm585_vm0, %v3486_v54 }
 0xd93   :  { %7750 = vmatmul.mubr.msk.f32.gmra.mrb[88].mxu1 %vm585_vm0, %v3487_v30 }
 0xd94   :  { %7752 = vmatprep.mubr.msk.f32.mxu1 %vm585_vm0, %v3488_v35 }
 0xd95   :  { %7802 = vmatmul.mubr.msk.f32.gmra.mrb[112].mxu0 %vm585_vm0, %v3487_v30 }
 0xd96   :  { %7804 = vmatprep.mubr.msk.f32.mxu0 %vm585_vm0, %v3488_v35 }
 0xd97   :  { %7753 = vmatmul.mubr.msk.f32.gmra.mrb[90].mxu1 %vm585_vm0, %v3489_v37 }
 0xd98   :  { %7811 = vmatprep.mubr.msk.f32.mxu1 %vm585_vm0, %v9519_v22  ;;  %v6749_v22 = vld [vmem:[%s9089_s30 + $0x108] sm:$0xff] }
 0xd99   :  { %7805 = vmatmul.mubr.msk.f32.gmra.mrb[114].mxu0 %vm585_vm0, %v3489_v37 }
 0xd9b   :  { %7812 = vmatmul.mubr.msk.f32.vlgmr.msra.gmra.mrb[92].mxu1 %vm585_vm0, %v9535_v14  ;;  %v6755_v14 = vld [vmem:[%s9089_s30 + $0x138] sm:$0xff] }
 0xd9c   :  { %7814 = vmatprep.mubr.msk.f32.mxu1 %vm585_vm0, %v9538_v0  ;;  %8241 = vmatpush1.bf16.msra.mxu1 %v8240_v4 }
 0xd9f   :  { %7815 = vmatmul.mubr.msk.f32.gmra.mrb[94].mxu1 %vm585_vm0, %v9545_v32 }
 0xda0   :  { %7817 = vmatprep.mubr.msk.f32.mxu1 %vm585_vm0, %v9548_v6 }
 0xda3   :  { %7818 = vmatmul.mubr.msk.f32.gmra.mrb[96].mxu1 %vm585_vm0, %v9559_v23 }
 0xda4   :  { %7820 = vmatprep.mubr.msk.f32.mxu1 %vm585_vm0, %v9562_v46 }
 0xda7   :  { %7821 = vmatmul.mubr.msk.f32.gmra.mrb[98].mxu1 %vm585_vm0, %v9573_v9 }
 0xda8   :  { %7823 = vmatprep.mubr.msk.f32.mxu1 %vm585_vm0, %v9576_v11  ;;  %v6757_v11 = vld [vmem:[%s9089_s30 + $0x148] sm:$0xff] }
 0xdab   :  { %7824 = vmatmul.mubr.msk.f32.gmra.mrb[100].mxu1 %vm585_vm0, %v9587_v27 }
 0xdac   :  { %7826 = vmatprep.mubr.msk.f32.mxu1 %vm585_vm0, %v9590_v31 }
 0xdaf   :  { %7827 = vmatmul.mubr.msk.f32.gmra.mrb[102].mxu1 %vm585_vm0, %v9601_v50  ;;  %v6756_v50 = vld [vmem:[%s9089_s30 + $0x140] sm:$0xff] }
 0xdb0   :  { %7829 = vmatprep.mubr.msk.f32.mxu1 %vm585_vm0, %v9604_v15 }
 0xdb3   :  { %7830 = vmatmul.mubr.msk.f32.gmra.mrb[104].mxu1 %vm585_vm0, %v9615_v28 }
 0xdb4   :  { %7832 = vmatprep.mubr.msk.f32.mxu1 %vm585_vm0, %v9618_v52 }
 0xdb7   :  { %7833 = vmatmul.mubr.msk.f32.gmra.mrb[106].mxu1 %vm585_vm0, %v9629_v34 }
 0xdb8   :  { %7835 = vmatprep.mubr.msk.f32.mxu1 %vm585_vm0, %v9632_v17 }
 0xdbb   :  { %7836 = vmatmul.mubr.msk.f32.gmra.mrb[108].mxu1 %vm585_vm0, %v9643_v26 }
 0xdbc   :  { %7838 = vmatprep.mubr.msk.f32.mxu1 %vm585_vm0, %v9646_v18  ;;  %v6759_v18 = vld [vmem:[%s9089_s30 + $0x158] sm:$0xff] }
 0xdbf   :  { %7839 = vmatmul.mubr.msk.f32.gmra.mrb[110].mxu1 %vm585_vm0, %v9657_v13 }
 0xdc0   :  { %7841 = vmatprep.mubr.msk.f32.mxu1 %vm585_vm0, %v9660_v19 }
 0xdc3   :  { %7842 = vmatmul.mubr.msk.f32.gmra.mrb[112].mxu1 %vm585_vm0, %v3479_v16  ;;  %v6758_v16 = vld [vmem:[%s9089_s30 + $0x150] sm:$0xff] }
 0xdc4   :  { %7844 = vmatprep.mubr.msk.f32.mxu1 %vm585_vm0, %v3480_v41 }
 0xdc7   :  { %7845 = vmatmul.mubr.msk.f32.gmra.mrb[114].mxu1 %vm585_vm0, %v3481_v55 }
 0xdc8   :  { %7847 = vmatprep.mubr.msk.f32.mxu1 %vm585_vm0, %v3482_v47 }
 0xdcb   :  { %7848 = vmatmul.mubr.msk.f32.gmra.mrb[116].mxu1 %vm585_vm0, %v3483_v25 }
 0xdcc   :  { %7850 = vmatprep.mubr.msk.f32.mxu1 %vm585_vm0, %v3484_v61 }
 0xdcf   :  { %7851 = vmatmul.mubr.msk.f32.gmra.mrb[118].mxu1 %vm585_vm0, %v3485_v45 }
 0xdd0   :  { %7853 = vmatprep.mubr.msk.f32.mxu1 %vm585_vm0, %v3486_v54  ;;  %v6761_v54 = vld [vmem:[%s9089_s30 + $0x168] sm:$0xff] }
 0xdd3   :  { %7854 = vmatmul.mubr.msk.f32.gmra.mrb[120].mxu1 %vm585_vm0, %v3487_v30 }
 0xdd4   :  { %7856 = vmatprep.mubr.msk.f32.mxu1 %vm585_vm0, %v3488_v35 }
 0xdd7   :  { %7857 = vmatmul.mubr.msk.f32.gmra.mrb[122].mxu1 %vm585_vm0, %v3489_v37  ;;  %v6760_v37 = vld [vmem:[%s9089_s30 + $0x160] sm:$0xff] }
 0xdd8   :  { %4882 = vmatprep.mubr.f32.mxu1 %v8617_v21 }
 0xddb   :  { %6780 = vmatmul.mubr.msk.f32.vlgmr.msra.gmra.mrb[124].mxu1 %vm585_vm0, %v9528_v5 }
 0xddc   :  { %4888 = vmatprep.mubr.f32.mxu1 %v8617_v21 }
 0xddf   :  { %6781 = vmatmul.mubr.msk.f32.gmra.mrb[126].mxu1 %vm585_vm0, %v9526_v57 }
 0xde0   :  { %7882 = vmatprep.mubr.msk.f32.mxu1 %vm8637_vm10, %v8617_v21 }
 0xe2e   :  { %v7709_v40 = vpop.f32.mrb[60].mxu1 }
 0xe2f   :  { %v4457_v33 = vmul.f32 %v7709_v40, %v6749_v22  ;;  %v3652_v29 = vpop.f32.mrb[61].mxu1 }
 0xe30   :  { %v4456_v10 = vmul.f32 %v6748_v38, %v3652_v29  ;;  %v9773_v8 = vpop.f32.mrb[84].mxu0 }
 0xe31   :  { %v4490_v3 = vmul.f32 1.442695, %v4457_v33  ;;  %v9776_v53 = vpop.f32.mrb[85].mxu0  ;;  %v6763_v33 = vld [vmem:[%s9089_s30 + $0x178] sm:$0xff] }
 0xe32   :  { %v4488_v43 = vmul.f32 1.442695, %v4456_v10  ;;  %v7712_v63 = vpop.f32.mrb[62].mxu1 }
 0xe33   :  { %8533 = vpow2.f32 %v4490_v3  ;;  %v4459_v5 = vmul.f32 %v7712_v63, %v6751_v62  ;;  %v3662_v59 = vpop.f32.mrb[63].mxu1  ;;  %v6762_v62 = vld [vmem:[%s9089_s30 + $0x170] sm:$0xff] }
 0xe34   :  { %8535 = vpow2.f32 %v4488_v43  ;;  %v4458_v57 = vmul.f32 %v6750_v42, %v3662_v59 }
 0xe35   :  { %v4494_v48 = vmul.f32 1.442695, %v4459_v5 }
 0xe36   :  { %v4492_v39 = vmul.f32 1.442695, %v4458_v57  ;;  %v7715_v56 = vpop.f32.mrb[64].mxu1  ;;  %v6765_v57 = vld [vmem:[%s9089_s30 + $0x188] sm:$0xff] }
 0xe37   :  { %8537 = vpow2.f32 %v4494_v48  ;;  %v4461_v20 = vmul.f32 %v7715_v56, %v6753_v36  ;;  %v3672_v58 = vpop.f32.mrb[65].mxu1 }
 0xe38   :  { %8539 = vpow2.f32 %v4492_v39  ;;  %v4460_v60 = vmul.f32 %v6752_v49, %v3672_v58  ;;  %v6764_v49 = vld [vmem:[%s9089_s30 + $0x180] sm:$0xff] }
 0xe39   :  { %v4498_v0 = vmul.f32 1.442695, %v4461_v20 }
 0xe3a   :  { %v4496_v32 = vmul.f32 1.442695, %v4460_v60  ;;  %v7718_v6 = vpop.f32.mrb[66].mxu1 }
 0xe3b   :  { %8541 = vpow2.f32 %v4498_v0  ;;  %v4463_v23 = vmul.f32 %v7718_v6, %v6755_v14  ;;  %v3682_v46 = vpop.f32.mrb[67].mxu1  ;;  %v6767_v0 = vld [vmem:[%s9089_s30 + $0x198] sm:$0xff]  ;;  %v6766_v6 = vld [vmem:[%s9089_s30 + $0x190] sm:$0xff] }
 0xe3c   :  { %8543 = vpow2.f32 %v4496_v32  ;;  %v4462_v9 = vmul.f32 %v6754_v2, %v3682_v46 }
 0xe3d   :  { %v8534_v27 = vpop.eup %8533  ;;  %v4502_v31 = vmul.f32 1.442695, %v4463_v23 }
 0xe3e   :  { %v8536_v15 = vpop.eup %8535  ;;  %4553 = vst.msk [vmem:[#allocation2 + $0x8] sm:$0xff] %vm807_vm3, %v8534_v27  ;;  %v4500_v28 = vmul.f32 1.442695, %v4462_v9  ;;  %v7721_v52 = vpop.f32.mrb[68].mxu1 }
 0xe3f   :  { %4552 = vst.msk [vmem:[#allocation2] sm:$0xff] %vm807_vm3, %v8536_v15  ;;  %8545 = vpow2.f32 %v4502_v31  ;;  %v4465_v34 = vmul.f32 %v7721_v52, %v6757_v11  ;;  %v3692_v17 = vpop.f32.mrb[69].mxu1  ;;  %v6768_v52 = vld [vmem:[%s9089_s30 + $0x1a0] sm:$0xff] }
 0xe40   :  { %8547 = vpow2.f32 %v4500_v28  ;;  %v4464_v26 = vmul.f32 %v6756_v50, %v3692_v17  ;;  %v6769_v50 = vld [vmem:[%s9089_s30 + $0x1a8] sm:$0xff] }
 0xe41   :  { %v8538_v13 = vpop.eup %8537  ;;  %v4506_v19 = vmul.f32 1.442695, %v4465_v34 }
 0xe42   :  { %v8540_v41 = vpop.eup %8539  ;;  %4555 = vst.msk [vmem:[#allocation2 + $0x18] sm:$0xff] %vm807_vm3, %v8538_v13  ;;  %v4504_v55 = vmul.f32 1.442695, %v4464_v26  ;;  %v7724_v47 = vpop.f32.mrb[70].mxu1 }
 0xe43   :  { %4554 = vst.msk [vmem:[#allocation2 + $0x10] sm:$0xff] %vm807_vm3, %v8540_v41  ;;  %8549 = vpow2.f32 %v4506_v19  ;;  %v4467_v25 = vmul.f32 %v7724_v47, %v6759_v18  ;;  %v3702_v61 = vpop.f32.mrb[71].mxu1  ;;  %v6770_v47 = vld [vmem:[%s9089_s30 + $0x1b0] sm:$0xff] }
 0xe44   :  { %8551 = vpow2.f32 %v4504_v55  ;;  %v4466_v45 = vmul.f32 %v6758_v16, %v3702_v61  ;;  %v6771_v16 = vld [vmem:[%s9089_s30 + $0x1b8] sm:$0xff] }
 0xe45   :  { %v8542_v30 = vpop.eup %8541  ;;  %v4510_v35 = vmul.f32 1.442695, %v4467_v25 }
 0xe46   :  { %v8544_v1 = vpop.eup %8543  ;;  %4557 = vst.msk [vmem:[#allocation2 + $0x28] sm:$0xff] %vm807_vm3, %v8542_v30  ;;  %v4508_v24 = vmul.f32 1.442695, %v4466_v45  ;;  %v7727_v4 = vpop.f32.mrb[72].mxu1 }
 0xe47   :  { %4556 = vst.msk [vmem:[#allocation2 + $0x20] sm:$0xff] %vm807_vm3, %v8544_v1  ;;  %8553 = vpow2.f32 %v4510_v35  ;;  %v4469_v22 = vmul.f32 %v7727_v4, %v6761_v54  ;;  %v3712_v38 = vpop.f32.mrb[73].mxu1  ;;  %v6772_v4 = vld [vmem:[%s9089_s30 + $0x1c0] sm:$0xff] }
 0xe48   :  { %8555 = vpow2.f32 %v4508_v24  ;;  %v4468_v40 = vmul.f32 %v6760_v37, %v3712_v38  ;;  %v6773_v37 = vld [vmem:[%s9089_s30 + $0x1c8] sm:$0xff] }
 0xe49   :  { %v8546_v29 = vpop.eup %8545  ;;  %v4514_v10 = vmul.f32 1.442695, %v4469_v22 }
 0xe4a   :  { %v8548_v3 = vpop.eup %8547  ;;  %4559 = vst.msk [vmem:[#allocation2 + $0x38] sm:$0xff] %vm807_vm3, %v8546_v29  ;;  %v4512_v42 = vmul.f32 1.442695, %v4468_v40  ;;  %v7730_v43 = vpop.f32.mrb[74].mxu1 }
 0xe4b   :  { %4558 = vst.msk [vmem:[#allocation2 + $0x30] sm:$0xff] %vm807_vm3, %v8548_v3  ;;  %8557 = vpow2.f32 %v4514_v10  ;;  %v4471_v63 = vmul.f32 %v7730_v43, %v6763_v33  ;;  %v3722_v5 = vpop.f32.mrb[75].mxu1  ;;  %v6774_v43 = vld [vmem:[%s9089_s30 + $0x1d0] sm:$0xff] }
 0xe4c   :  { %8559 = vpow2.f32 %v4512_v42  ;;  %v4470_v59 = vmul.f32 %v6762_v62, %v3722_v5  ;;  %v6775_v62 = vld [vmem:[%s9089_s30 + $0x1d8] sm:$0xff] }
 0xe4d   :  { %v8550_v36 = vpop.eup %8549  ;;  %v4518_v48 = vmul.f32 1.442695, %v4471_v63 }
 0xe4e   :  { %v8552_v39 = vpop.eup %8551  ;;  %4561 = vst.msk [vmem:[#allocation2 + $0x48] sm:$0xff] %vm807_vm3, %v8550_v36  ;;  %v4516_v56 = vmul.f32 1.442695, %v4470_v59  ;;  %v7733_v20 = vpop.f32.mrb[76].mxu1 }
 0xe4f   :  { %4560 = vst.msk [vmem:[#allocation2 + $0x40] sm:$0xff] %vm807_vm3, %v8552_v39  ;;  %8561 = vpow2.f32 %v4518_v48  ;;  %v4473_v58 = vmul.f32 %v7733_v20, %v6765_v57  ;;  %v3732_v60 = vpop.f32.mrb[77].mxu1  ;;  %v6776_v20 = vld [vmem:[%s9089_s30 + $0x1e0] sm:$0xff] }
 0xe50   :  { %8563 = vpow2.f32 %v4516_v56  ;;  %v4472_v14 = vmul.f32 %v6764_v49, %v3732_v60  ;;  %v6777_v49 = vld [vmem:[%s9089_s30 + $0x1e8] sm:$0xff] }
 0xe51   :  { %v8554_v2 = vpop.eup %8553  ;;  %v4522_v32 = vmul.f32 1.442695, %v4473_v58 }
 0xe52   :  { %v8556_v23 = vpop.eup %8555  ;;  %4563 = vst.msk [vmem:[#allocation2 + $0x58] sm:$0xff] %vm807_vm3, %v8554_v2  ;;  %v4520_v46 = vmul.f32 1.442695, %v4472_v14  ;;  %v7736_v9 = vpop.f32.mrb[78].mxu1 }
 0xe53   :  { %4562 = vst.msk [vmem:[#allocation2 + $0x50] sm:$0xff] %vm807_vm3, %v8556_v23  ;;  %8565 = vpow2.f32 %v4522_v32  ;;  %v4475_v11 = vmul.f32 %v7736_v9, %v6767_v0  ;;  %v3742_v27 = vpop.f32.mrb[79].mxu1  ;;  %v6778_v9 = vld [vmem:[%s9089_s30 + $0x1f0] sm:$0xff] }
 0xe54   :  { %8567 = vpow2.f32 %v4520_v46  ;;  %v4474_v31 = vmul.f32 %v6766_v6, %v3742_v27  ;;  %v6779_v6 = vld [vmem:[%s9089_s30 + $0x1f8] sm:$0xff] }
 0xe55   :  { %v8558_v15 = vpop.eup %8557  ;;  %v4526_v28 = vmul.f32 1.442695, %v4475_v11 }
 0xe56   :  { %v8560_v34 = vpop.eup %8559  ;;  %4565 = vst.msk [vmem:[#allocation2 + $0x68] sm:$0xff] %vm807_vm3, %v8558_v15  ;;  %v4524_v17 = vmul.f32 1.442695, %v4474_v31  ;;  %v7739_v26 = vpop.f32.mrb[80].mxu1 }
 0xe57   :  { %4564 = vst.msk [vmem:[#allocation2 + $0x60] sm:$0xff] %vm807_vm3, %v8560_v34  ;;  %8569 = vpow2.f32 %v4526_v28  ;;  %v4477_v18 = vmul.f32 %v7739_v26, %v6769_v50  ;;  %v3752_v13 = vpop.f32.mrb[81].mxu1  ;;  %v4263_v26 = vld [vmem:[%s9197_s6] sm:$0xff] }
 0xe58   :  { %8571 = vpow2.f32 %v4524_v17  ;;  %v4476_v19 = vmul.f32 %v6768_v52, %v3752_v13  ;;  %v4264_v52 = vld [vmem:[%s9197_s6 + $0x8] sm:$0xff] }
 0xe59   :  { %v8562_v41 = vpop.eup %8561  ;;  %v4530_v55 = vmul.f32 1.442695, %v4477_v18 }
 0xe5a   :  { %v8564_v25 = vpop.eup %8563  ;;  %4567 = vst.msk [vmem:[#allocation2 + $0x78] sm:$0xff] %vm807_vm3, %v8562_v41  ;;  %v4528_v61 = vmul.f32 1.442695, %v4476_v19  ;;  %v7742_v45 = vpop.f32.mrb[82].mxu1 }
 0xe5b   :  { %4566 = vst.msk [vmem:[#allocation2 + $0x70] sm:$0xff] %vm807_vm3, %v8564_v25  ;;  %8573 = vpow2.f32 %v4530_v55  ;;  %v4479_v54 = vmul.f32 %v7742_v45, %v6771_v16  ;;  %v3762_v30 = vpop.f32.mrb[83].mxu1  ;;  %v4265_v45 = vld [vmem:[%s9197_s6 + $0x10] sm:$0xff] }
 0xe5c   :  { %8575 = vpow2.f32 %v4528_v61  ;;  %v4478_v35 = vmul.f32 %v6770_v47, %v3762_v30  ;;  %v4266_v47 = vld [vmem:[%s9197_s6 + $0x18] sm:$0xff] }
 0xe5d   :  { %v8566_v1 = vpop.eup %8565  ;;  %v4534_v24 = vmul.f32 1.442695, %v4479_v54 }
 0xe5e   :  { %v8568_v22 = vpop.eup %8567  ;;  %4569 = vst.msk [vmem:[#allocation2 + $0x88] sm:$0xff] %vm807_vm3, %v8566_v1  ;;  %v4532_v38 = vmul.f32 1.442695, %v4478_v35  ;;  %v7745_v40 = vpop.f32.mrb[84].mxu1 }
 0xe5f   :  { %4568 = vst.msk [vmem:[#allocation2 + $0x80] sm:$0xff] %vm807_vm3, %v8568_v22  ;;  %8577 = vpow2.f32 %v4534_v24  ;;  %v4481_v33 = vmul.f32 %v7745_v40, %v6773_v37  ;;  %v3772_v29 = vpop.f32.mrb[85].mxu1  ;;  %v4267_v40 = vld [vmem:[%s9197_s6 + $0x20] sm:$0xff] }
 0xe60   :  { %8579 = vpow2.f32 %v4532_v38  ;;  %v4480_v10 = vmul.f32 %v6772_v4, %v3772_v29  ;;  %v4268_v4 = vld [vmem:[%s9197_s6 + $0x28] sm:$0xff] }
 0xe61   :  { %v8570_v3 = vpop.eup %8569  ;;  %v4538_v42 = vmul.f32 1.442695, %v4481_v33 }
 0xe62   :  { %v8572_v63 = vpop.eup %8571  ;;  %4571 = vst.msk [vmem:[#allocation2 + $0x98] sm:$0xff] %vm807_vm3, %v8570_v3  ;;  %v4536_v5 = vmul.f32 1.442695, %v4480_v10  ;;  %v7748_v59 = vpop.f32.mrb[86].mxu1 }
 0xe63   :  { %4570 = vst.msk [vmem:[#allocation2 + $0x90] sm:$0xff] %vm807_vm3, %v8572_v63  ;;  %8581 = vpow2.f32 %v4538_v42  ;;  %v4483_v57 = vmul.f32 %v7748_v59, %v6775_v62  ;;  %v3782_v36 = vpop.f32.mrb[87].mxu1  ;;  %v4269_v59 = vld [vmem:[%s9197_s6 + $0x30] sm:$0xff] }
 0xe64   :  { %8583 = vpow2.f32 %v4536_v5  ;;  %v4482_v48 = vmul.f32 %v6774_v43, %v3782_v36  ;;  %v4270_v43 = vld [vmem:[%s9197_s6 + $0x38] sm:$0xff] }
 0xe65   :  { %v8574_v39 = vpop.eup %8573  ;;  %v4542_v56 = vmul.f32 1.442695, %v4483_v57 }
 0xe66   :  { %v8576_v58 = vpop.eup %8575  ;;  %4573 = vst.msk [vmem:[#allocation2 + $0xa8] sm:$0xff] %vm807_vm3, %v8574_v39  ;;  %v4540_v60 = vmul.f32 1.442695, %v4482_v48  ;;  %v7751_v14 = vpop.f32.mrb[88].mxu1 }
 0xe67   :  { %4572 = vst.msk [vmem:[#allocation2 + $0xa0] sm:$0xff] %vm807_vm3, %v8576_v58  ;;  %8585 = vpow2.f32 %v4542_v56  ;;  %v4485_v0 = vmul.f32 %v7751_v14, %v6777_v49  ;;  %v3792_v2 = vpop.f32.mrb[89].mxu1 }
 0xe68   :  { %8587 = vpow2.f32 %v4540_v60  ;;  %v4484_v32 = vmul.f32 %v6776_v20, %v3792_v2  ;;  %v4272_v20 = vld [vmem:[%s9197_s6 + $0x48] sm:$0xff]  ;;  %v4271_v60 = vld [vmem:[%s9197_s6 + $0x40] sm:$0xff] }
 0xe69   :  { %v8578_v23 = vpop.eup %8577  ;;  %v4546_v46 = vmul.f32 1.442695, %v4485_v0 }
 0xe6a   :  { %v8580_v11 = vpop.eup %8579  ;;  %4575 = vst.msk [vmem:[#allocation2 + $0xb8] sm:$0xff] %vm807_vm3, %v8578_v23  ;;  %v4544_v27 = vmul.f32 1.442695, %v4484_v32  ;;  %v7754_v31 = vpop.f32.mrb[90].mxu1  ;;  %v4274_v23 = vld [vmem:[%s9197_s6 + $0x58] sm:$0xff] }
 0xe6b   :  { %4574 = vst.msk [vmem:[#allocation2 + $0xb0] sm:$0xff] %vm807_vm3, %v8580_v11  ;;  %8589 = vpow2.f32 %v4546_v46  ;;  %v4487_v50 = vmul.f32 %v7754_v31, %v6779_v6  ;;  %v3802_v15 = vpop.f32.mrb[91].mxu1 }
 0xe6c   :  { %8591 = vpow2.f32 %v4544_v27  ;;  %v4486_v28 = vmul.f32 %v6778_v9, %v3802_v15  ;;  %v4273_v9 = vld [vmem:[%s9197_s6 + $0x50] sm:$0xff]  ;;  %v9858_v15 = vpop.f32.mrb[86].mxu0 }
 0xe6d   :  { %v8582_v34 = vpop.eup %8581  ;;  %v4550_v17 = vmul.f32 1.442695, %v4487_v50 }
 0xe6e   :  { %v8584_v18 = vpop.eup %8583  ;;  %4577 = vst.msk [vmem:[#allocation2 + $0xc8] sm:$0xff] %vm807_vm3, %v8582_v34  ;;  %v4548_v13 = vmul.f32 1.442695, %v4486_v28  ;;  %v7813_v19 = vpop.f32.mrb[92].mxu1 }
 0xe6f   :  { %4576 = vst.msk [vmem:[#allocation2 + $0xc0] sm:$0xff] %vm807_vm3, %v8584_v18  ;;  %8593 = vpow2.f32 %v4550_v17  ;;  %v4296_v16 = vmul.f32 %v7813_v19, %v4264_v52  ;;  %v4104_v41 = vpop.f32.mrb[93].mxu1  ;;  %v4276_v52 = vld [vmem:[%s9197_s6 + $0x68] sm:$0xff]  ;;  %v9861_v34 = vpop.f32.mrb[87].mxu0 }
 0xe70   :  { %8595 = vpow2.f32 %v4548_v13  ;;  %v4295_v55 = vmul.f32 %v4263_v26, %v4104_v41  ;;  %v4275_v26 = vld [vmem:[%s9197_s6 + $0x60] sm:$0xff]  ;;  %v9866_v41 = vpop.f32.mrb[88].mxu0 }
 0xe71   :  { %v8586_v25 = vpop.eup %8585  ;;  %v4330_v61 = vsel %vm585_vm0, %v4296_v16, 0.0 }
 0xe72   :  { %v8588_v54 = vpop.eup %8587  ;;  %4579 = vst.msk [vmem:[#allocation2 + $0xd8] sm:$0xff] %vm807_vm3, %v8586_v25  ;;  %4331 = vadd.xlane.f32.xlu0 %v4330_v61  ;;  %v7816_v30 = vpop.f32.mrb[94].mxu1  ;;  %v4327_v35 = vsel %vm585_vm0, %v4295_v55, 0.0 }
 0xe73   :  { %4578 = vst.msk [vmem:[#allocation2 + $0xd0] sm:$0xff] %vm807_vm3, %v8588_v54  ;;  %v4298_v37 = vmul.f32 %v7816_v30, %v4266_v47  ;;  %4328 = vadd.xlane.f32.xlu1 %v4327_v35  ;;  %v4114_v1 = vpop.f32.mrb[95].mxu1  ;;  %v4278_v47 = vld [vmem:[%s9197_s6 + $0x78] sm:$0xff]  ;;  %v9869_v25 = vpop.f32.mrb[89].mxu0 }
 0xe74   :  { %v4297_v24 = vmul.f32 %v4265_v45, %v4114_v1  ;;  %v4277_v45 = vld [vmem:[%s9197_s6 + $0x70] sm:$0xff]  ;;  %v9874_v1 = vpop.f32.mrb[90].mxu0 }
 0xe75   :  { %v8590_v22 = vpop.eup %8589  ;;  %v4336_v38 = vsel %vm585_vm0, %v4298_v37, 0.0 }
 0xe76   :  { %v8592_v33 = vpop.eup %8591  ;;  %4581 = vst.msk [vmem:[#allocation2 + $0xe8] sm:$0xff] %vm807_vm3, %v8590_v22  ;;  %4337 = vadd.xlane.f32.xlu0 %v4336_v38  ;;  %v7819_v29 = vpop.f32.mrb[96].mxu1  ;;  %v4333_v10 = vsel %vm585_vm0, %v4297_v24, 0.0 }
 0xe77   :  { %4580 = vst.msk [vmem:[#allocation2 + $0xe0] sm:$0xff] %vm807_vm3, %v8592_v33  ;;  %v4300_v62 = vmul.f32 %v7819_v29, %v4268_v4  ;;  %4334 = vadd.xlane.f32.xlu1 %v4333_v10  ;;  %v4124_v3 = vpop.f32.mrb[97].mxu1  ;;  %v4280_v4 = vld [vmem:[%s9197_s6 + $0x88] sm:$0xff]  ;;  %v9877_v22 = vpop.f32.mrb[91].mxu0 }
 0xe78   :  { %v4299_v42 = vmul.f32 %v4267_v40, %v4124_v3  ;;  %v4279_v40 = vld [vmem:[%s9197_s6 + $0x80] sm:$0xff]  ;;  %v9882_v3 = vpop.f32.mrb[92].mxu0 }
 0xe79   :  { %v8594_v63 = vpop.eup %8593  ;;  %v4342_v5 = vsel %vm585_vm0, %v4300_v62, 0.0 }
 0xe7a   :  { %v8596_v57 = vpop.eup %8595  ;;  %4583 = vst.msk [vmem:[#allocation2 + $0xf8] sm:$0xff] %vm807_vm3, %v8594_v63  ;;  %4343 = vadd.xlane.f32.xlu0 %v4342_v5  ;;  %v7822_v36 = vpop.f32.mrb[98].mxu1  ;;  %v4339_v48 = vsel %vm585_vm0, %v4299_v42, 0.0 }
 0xe7b   :  { %4582 = vst.msk [vmem:[#allocation2 + $0xf0] sm:$0xff] %vm807_vm3, %v8596_v57  ;;  %v4302_v49 = vmul.f32 %v7822_v36, %v4270_v43  ;;  %4340 = vadd.xlane.f32.xlu1 %v4339_v48  ;;  %v4134_v39 = vpop.f32.mrb[99].mxu1  ;;  %v4282_v43 = vld [vmem:[%s9197_s6 + $0x98] sm:$0xff]  ;;  %v9885_v63 = vpop.f32.mrb[93].mxu0 }
 0xe7c   :  { %v4301_v56 = vmul.f32 %v4269_v59, %v4134_v39  ;;  %v4281_v59 = vld [vmem:[%s9197_s6 + $0x90] sm:$0xff]  ;;  %v9890_v39 = vpop.f32.mrb[94].mxu0 }
 0xe7d   :  { %v4348_v58 = vsel %vm585_vm0, %v4302_v49, 0.0 }
 0xe7e   :  { %4349 = vadd.xlane.f32.xlu0 %v4348_v58  ;;  %v7825_v14 = vpop.f32.mrb[100].mxu1  ;;  %v4345_v0 = vsel %vm585_vm0, %v4301_v56, 0.0  ;;  %v9893_v58 = vpop.f32.mrb[95].mxu0 }
 0xe7f   :  { %v4304_v2 = vmul.f32 %v7825_v14, %v4272_v20  ;;  %4346 = vadd.xlane.f32.xlu1 %v4345_v0  ;;  %v4144_v32 = vpop.f32.mrb[101].mxu1  ;;  %v4284_v20 = vld [vmem:[%s9197_s6 + $0xa8] sm:$0xff]  ;;  %v4283_v14 = vld [vmem:[%s9197_s6 + $0xa0] sm:$0xff] }
 0xe80   :  { %v4303_v6 = vmul.f32 %v4271_v60, %v4144_v32 }
 0xe81   :  { %v4354_v46 = vsel %vm585_vm0, %v4304_v2, 0.0 }
 0xe82   :  { %4355 = vadd.xlane.f32.xlu0 %v4354_v46  ;;  %v7828_v11 = vpop.f32.mrb[102].mxu1  ;;  %v4351_v27 = vsel %vm585_vm0, %v4303_v6, 0.0 }
 0xe83   :  { %v4306_v31 = vmul.f32 %v7828_v11, %v4274_v23  ;;  %4352 = vadd.xlane.f32.xlu1 %v4351_v27  ;;  %v4154_v50 = vpop.f32.mrb[103].mxu1  ;;  %v9898_v23 = vpop.f32.mrb[96].mxu0 }
 0xe84   :  { %v4305_v28 = vmul.f32 %v4273_v9, %v4154_v50  ;;  %v4286_v9 = vld [vmem:[%s9197_s6 + $0xb8] sm:$0xff]  ;;  %v9901_v11 = vpop.f32.mrb[97].mxu0 }
 0xe85   :  { %v4360_v17 = vsel %vm585_vm0, %v4306_v31, 0.0  ;;  %v4285_v31 = vld [vmem:[%s9197_s6 + $0xb0] sm:$0xff] }
 0xe86   :  { %4361 = vadd.xlane.f32.xlu0 %v4360_v17  ;;  %v7831_v18 = vpop.f32.mrb[104].mxu1  ;;  %v4357_v13 = vsel %vm585_vm0, %v4305_v28, 0.0 }
 0xe87   :  { %v4308_v19 = vmul.f32 %v7831_v18, %v4276_v52  ;;  %4358 = vadd.xlane.f32.xlu1 %v4357_v13  ;;  %v4164_v16 = vpop.f32.mrb[105].mxu1  ;;  %v4288_v13 = vld [vmem:[%s9197_s6 + $0xc8] sm:$0xff] }
 0xe88   :  { %v4307_v55 = vmul.f32 %v4275_v26, %v4164_v16  ;;  %v9906_v26 = vpop.f32.mrb[98].mxu0 }
 0xe89   :  { %v4366_v61 = vsel %vm585_vm0, %v4308_v19, 0.0  ;;  %v9909_v19 = vpop.f32.mrb[99].mxu0 }
 0xe8a   :  { %4367 = vadd.xlane.f32.xlu0 %v4366_v61  ;;  %v7834_v54 = vpop.f32.mrb[106].mxu1  ;;  %v4363_v30 = vsel %vm585_vm0, %v4307_v55, 0.0  ;;  %v4287_v55 = vld [vmem:[%s9197_s6 + $0xc0] sm:$0xff] }
 0xe8b   :  { %v4310_v35 = vmul.f32 %v7834_v54, %v4278_v47  ;;  %4364 = vadd.xlane.f32.xlu1 %v4363_v30  ;;  %v4174_v37 = vpop.f32.mrb[107].mxu1  ;;  %v9914_v30 = vpop.f32.mrb[100].mxu0 }
 0xe8c   :  { %v4309_v24 = vmul.f32 %v4277_v45, %v4174_v37  ;;  %v4290_v37 = vld [vmem:[%s9197_s6 + $0xd8] sm:$0xff] }
 0xe8d   :  { %v4372_v38 = vsel %vm585_vm0, %v4310_v35, 0.0 }
 0xe8e   :  { %4373 = vadd.xlane.f32.xlu0 %v4372_v38  ;;  %v7837_v33 = vpop.f32.mrb[108].mxu1  ;;  %v4369_v29 = vsel %vm585_vm0, %v4309_v24, 0.0  ;;  %v9917_v24 = vpop.f32.mrb[101].mxu0  ;;  %v4289_v38 = vld [vmem:[%s9197_s6 + $0xd0] sm:$0xff] }
 0xe8f   :  { %v4312_v10 = vmul.f32 %v7837_v33, %v4280_v4  ;;  %4370 = vadd.xlane.f32.xlu1 %v4369_v29  ;;  %v4184_v62 = vpop.f32.mrb[109].mxu1 }
 0xe90   :  { %v4311_v42 = vmul.f32 %v4279_v40, %v4184_v62  ;;  %v9922_v62 = vpop.f32.mrb[102].mxu0 }
 0xe91   :  { %v4378_v5 = vsel %vm585_vm0, %v4312_v10, 0.0 }
 0xe92   :  { %4379 = vadd.xlane.f32.xlu0 %v4378_v5  ;;  %v7840_v57 = vpop.f32.mrb[110].mxu1  ;;  %v4375_v36 = vsel %vm585_vm0, %v4311_v42, 0.0  ;;  %v9925_v5 = vpop.f32.mrb[103].mxu0 }
 0xe93   :  { %v4314_v48 = vmul.f32 %v7840_v57, %v4282_v43  ;;  %4376 = vadd.xlane.f32.xlu1 %v4375_v36  ;;  %v4194_v49 = vpop.f32.mrb[111].mxu1  ;;  %v4292_v43 = vld [vmem:[%s9197_s6 + $0xe8] sm:$0xff]  ;;  %v4291_v57 = vld [vmem:[%s9197_s6 + $0xe0] sm:$0xff] }
 0xe94   :  { %v4313_v56 = vmul.f32 %v4281_v59, %v4194_v49 }
 0xe95   :  { %v4384_v60 = vsel %vm585_vm0, %v4314_v48, 0.0 }
 0xe96   :  { %4385 = vadd.xlane.f32.xlu0 %v4384_v60  ;;  %v7843_v0 = vpop.f32.mrb[112].mxu1  ;;  %v4381_v2 = vsel %vm585_vm0, %v4313_v56, 0.0 }
 0xe97   :  { %v4316_v32 = vmul.f32 %v7843_v0, %v4284_v20  ;;  %4382 = vadd.xlane.f32.xlu1 %v4381_v2  ;;  %v4204_v6 = vpop.f32.mrb[113].mxu1  ;;  %v9930_v20 = vpop.f32.mrb[104].mxu0 }
 0xe98   :  { %v4315_v46 = vmul.f32 %v4283_v14, %v4204_v6  ;;  %v4294_v14 = vld [vmem:[%s9197_s6 + $0xf8] sm:$0xff]  ;;  %v9933_v0 = vpop.f32.mrb[105].mxu0 }
 0xe99   :  { %v4390_v27 = vsel %vm585_vm0, %v4316_v32, 0.0  ;;  %v4293_v32 = vld [vmem:[%s9197_s6 + $0xf0] sm:$0xff] }
 0xe9a   :  { %4391 = vadd.xlane.f32.xlu0 %v4390_v27  ;;  %v7846_v50 = vpop.f32.mrb[114].mxu1  ;;  %v4387_v28 = vsel %vm585_vm0, %v4315_v46, 0.0 }
 0xe9b   :  { %v4318_v52 = vmul.f32 %v7846_v50, %v4286_v9  ;;  %4388 = vadd.xlane.f32.xlu1 %v4387_v28  ;;  %v4214_v17 = vpop.f32.mrb[115].mxu1 }
 0xe9c   :  { %v4317_v18 = vmul.f32 %v4285_v31, %v4214_v17  ;;  %v9938_v31 = vpop.f32.mrb[106].mxu0  ;;  %v4896_v17 = vld [vmem:[%s9207_s14 + $0x8] sm:$0xff] }
 0xe9d   :  { %v4396_v16 = vsel %vm585_vm0, %v4318_v52, 0.0  ;;  %v9940_v28 = vpop.f32.mrb[107].mxu0 }
 0xe9e   :  { %4397 = vadd.xlane.f32.xlu0 %v4396_v16  ;;  %v7849_v47 = vpop.f32.mrb[116].mxu1  ;;  %v4393_v61 = vsel %vm585_vm0, %v4317_v18, 0.0 }
 0xe9f   :  { %v4320_v45 = vmul.f32 %v7849_v47, %v4288_v13  ;;  %4394 = vadd.xlane.f32.xlu1 %v4393_v61  ;;  %v4224_v54 = vpop.f32.mrb[117].mxu1 }
 0xea0   :  { %v4319_v35 = vmul.f32 %v4287_v55, %v4224_v54  ;;  %v9947_v55 = vpop.f32.mrb[108].mxu0 }
 0xea1   :  { %v4402_v4 = vsel %vm585_vm0, %v4320_v45, 0.0  ;;  %v9949_v61 = vpop.f32.mrb[109].mxu0 }
 0xea2   :  { %4403 = vadd.xlane.f32.xlu0 %v4402_v4  ;;  %v7852_v40 = vpop.f32.mrb[118].mxu1  ;;  %v4399_v33 = vsel %vm585_vm0, %v4319_v35, 0.0  ;;  %v9955_v35 = vpop.f32.mrb[110].mxu0 }
 0xea3   :  { %v4322_v29 = vmul.f32 %v7852_v40, %v4290_v37  ;;  %4400 = vadd.xlane.f32.xlu1 %v4399_v33  ;;  %v4234_v10 = vpop.f32.mrb[119].mxu1  ;;  %v9957_v37 = vpop.f32.mrb[111].mxu0 }
 0xea4   :  { %v4321_v42 = vmul.f32 %v4289_v38, %v4234_v10  ;;  %v9959_v4 = vpop.f32.mrb[112].mxu0 }
 0xea5   :  { %v4408_v59 = vsel %vm585_vm0, %v4322_v29, 0.0  ;;  %v9961_v38 = vpop.f32.mrb[113].mxu0 }
 0xea6   :  { %4409 = vadd.xlane.f32.xlu0 %v4408_v59  ;;  %v7855_v36 = vpop.f32.mrb[120].mxu1  ;;  %v4405_v48 = vsel %vm585_vm0, %v4321_v42, 0.0  ;;  %v9963_v40 = vpop.f32.mrb[114].mxu0 }
 0xea7   :  { %v4324_v49 = vmul.f32 %v7855_v36, %v4292_v43  ;;  %4406 = vadd.xlane.f32.xlu1 %v4405_v48  ;;  %v4244_v56 = vpop.f32.mrb[121].mxu1  ;;  %v9965_v33 = vpop.f32.mrb[115].mxu0  ;;  %v4649_v48 = vld [vmem:[#allocation2 + $0x8] sm:$0xff] }
 0xea8   :  { %v4323_v60 = vmul.f32 %v4291_v57, %v4244_v56  ;;  %v4648_v56 = vld [vmem:[#allocation2] sm:$0xff] }
 0xea9   :  { %v4414_v2 = vsel %vm585_vm0, %v4324_v49, 0.0 }
 0xeaa   :  { %4415 = vadd.xlane.f32.xlu0 %v4414_v2  ;;  %v7858_v6 = vpop.f32.mrb[122].mxu1  ;;  %v4411_v46 = vsel %vm585_vm0, %v4323_v60, 0.0  ;;  %v4653_v60 = vmul.f32 0.0, %v4649_v48 }
 0xeab   :  { %v4326_v9 = vmul.f32 %v7858_v6, %v4294_v14  ;;  %4412 = vadd.xlane.f32.xlu1 %v4411_v46  ;;  %v4254_v27 = vpop.f32.mrb[123].mxu1  ;;  %v4651_v6 = vld [vmem:[#allocation2 + $0x18] sm:$0xff] }
 0xeac   :  { %v4325_v50 = vmul.f32 %v4293_v32, %v4254_v27  ;;  %v4652_v32 = vmul.f32 0.0, %v4648_v56  ;;  %v4650_v27 = vld [vmem:[#allocation2 + $0x10] sm:$0xff] }
 0xead   :  { %v4420_v52 = vsel %vm585_vm0, %v4326_v9, 0.0 }
 0xeae   :  { %4421 = vadd.xlane.f32.xlu0 %v4420_v52  ;;  %v9944_v18 = vpop.f32.mrb[124].mxu1  ;;  %v4417_v13 = vsel %vm585_vm0, %v4325_v50, 0.0  ;;  %v4655_v52 = vmul.f32 0.0, %v4651_v6 }
 0xeaf   :  { %v4886_v16 = vpop.f32.mrb[125].mxu1  ;;  %4418 = vadd.xlane.f32.xlu1 %v4417_v13 }
 0xeb0   :  { %v4900_v47 = vmul.f32 %v4896_v17, %v4886_v16  ;;  %v4654_v16 = vmul.f32 0.0, %v4650_v27 }
 0xeb2   :  { %v9951_v45 = vpop.f32.mrb[126].mxu1  ;;  %5009 = vmatprep.mubr.f32.mxu0 %v4900_v47 }
 0xeb3   :  { %v9953_v54 = vpop.f32.mrb[127].mxu1 }
 0xeff   :  { %v4332_v29 = vpop.xlane.xlu0 %4331 }
 0xf00   :  { %v4585_v10 = vmul.f32 %v9773_v8, %v4332_v29  ;;  %v4329_v42 = vpop.xlane.xlu1 %4328 }
 0xf01   :  { %v4584_v43 = vmul.f32 %v4329_v42, %v9776_v53  ;;  %v4669_v42 = vld [vmem:[#allocation2 + $0x28] sm:$0xff] }
 0xf02   :  { %4617 = vst.msk [vmem:[#allocation3 + $0x8] sm:$0xff] %vm807_vm3, %v4585_v10 }
 0xf03   :  { %4616 = vst.msk [vmem:[#allocation3] sm:$0xff] %vm807_vm3, %v4584_v43  ;;  %v4338_v59 = vpop.xlane.xlu0 %4337 }
 0xf04   :  { %v4587_v57 = vmul.f32 %v9858_v15, %v4338_v59  ;;  %v4335_v36 = vpop.xlane.xlu1 %4334 }
 0xf05   :  { %v4586_v49 = vmul.f32 %v4335_v36, %v9861_v34 }
 0xf06   :  { %4619 = vst.msk [vmem:[#allocation3 + $0x18] sm:$0xff] %vm807_vm3, %v4587_v57 }
 0xf07   :  { %4618 = vst.msk [vmem:[#allocation3 + $0x10] sm:$0xff] %vm807_vm3, %v4586_v49  ;;  %v4344_v8 = vpop.xlane.xlu0 %4343 }
 0xf08   :  { %v4589_v53 = vmul.f32 %v9866_v41, %v4344_v8  ;;  %v4341_v14 = vpop.xlane.xlu1 %4340 }
 0xf09   :  { %v4657_v2 = vld [vmem:[#allocation3 + $0x8] sm:$0xff]  ;;  %v4588_v46 = vmul.f32 %v4341_v14, %v9869_v25 }
 0xf0a   :  { %v4661_v15 = vadd.f32 %v4657_v2, %v4653_v60  ;;  %v4656_v9 = vld [vmem:[#allocation3] sm:$0xff]  ;;  %4621 = vst.msk [vmem:[#allocation3 + $0x28] sm:$0xff] %vm807_vm3, %v4589_v53  ;;  %v4671_v53 = vld [vmem:[#allocation2 + $0x38] sm:$0xff] }
 0xf0b   :  { %v4660_v34 = vadd.f32 %v4656_v9, %v4652_v32  ;;  %4620 = vst.msk [vmem:[#allocation3 + $0x20] sm:$0xff] %vm807_vm3, %v4588_v46  ;;  %v4350_v50 = vpop.xlane.xlu0 %4349 }
 0xf0c   :  { %4665 = vst.msk [vmem:[#allocation4 + $0x8] sm:$0xff] %vm807_vm3, %v4661_v15  ;;  %v4591_v41 = vmul.f32 %v9874_v1, %v4350_v50  ;;  %v4347_v17 = vpop.xlane.xlu1 %4346  ;;  %v4673_v59 = vmul.f32 %v4669_v42, %v4661_v15  ;;  %v4668_v1 = vld [vmem:[#allocation2 + $0x20] sm:$0xff]  ;;  %v4689_v50 = vld [vmem:[#allocation2 + $0x48] sm:$0xff]  ;;  %v4691_v42 = vld [vmem:[#allocation2 + $0x58] sm:$0xff] }
 0xf0d   :  { %4664 = vst.msk [vmem:[#allocation4] sm:$0xff] %vm807_vm3, %v4660_v34  ;;  %v4659_v13 = vld [vmem:[#allocation3 + $0x18] sm:$0xff]  ;;  %v4590_v25 = vmul.f32 %v4347_v17, %v9877_v22  ;;  %v4672_v22 = vmul.f32 %v4668_v1, %v4660_v34 }
 0xf0e   :  { %v4663_v47 = vadd.f32 %v4659_v13, %v4655_v52  ;;  %v4658_v29 = vld [vmem:[#allocation3 + $0x10] sm:$0xff]  ;;  %4623 = vst.msk [vmem:[#allocation3 + $0x38] sm:$0xff] %vm807_vm3, %v4591_v41 }
 0xf0f   :  { %v4662_v10 = vadd.f32 %v4658_v29, %v4654_v16  ;;  %4622 = vst.msk [vmem:[#allocation3 + $0x30] sm:$0xff] %vm807_vm3, %v4590_v25  ;;  %v4356_v43 = vpop.xlane.xlu0 %4355 }
 0xf10   :  { %4667 = vst.msk [vmem:[#allocation4 + $0x18] sm:$0xff] %vm807_vm3, %v4663_v47  ;;  %v4593_v57 = vmul.f32 %v9882_v3, %v4356_v43  ;;  %v4353_v36 = vpop.xlane.xlu1 %4352  ;;  %v4675_v2 = vmul.f32 %v4671_v53, %v4663_v47  ;;  %v4670_v3 = vld [vmem:[#allocation2 + $0x30] sm:$0xff] }
 0xf11   :  { %4666 = vst.msk [vmem:[#allocation4 + $0x10] sm:$0xff] %vm807_vm3, %v4662_v10  ;;  %v4677_v48 = vld [vmem:[#allocation3 + $0x28] sm:$0xff]  ;;  %v4592_v49 = vmul.f32 %v4353_v36, %v9885_v63  ;;  %v4674_v63 = vmul.f32 %v4670_v3, %v4662_v10 }
 0xf12   :  { %v4681_v56 = vadd.f32 %v4677_v48, %v4673_v59  ;;  %v4676_v8 = vld [vmem:[#allocation3 + $0x20] sm:$0xff]  ;;  %4625 = vst.msk [vmem:[#allocation3 + $0x48] sm:$0xff] %vm807_vm3, %v4593_v57 }
 0xf13   :  { %v4680_v60 = vadd.f32 %v4676_v8, %v4672_v22  ;;  %4624 = vst.msk [vmem:[#allocation3 + $0x40] sm:$0xff] %vm807_vm3, %v4592_v49  ;;  %v4362_v14 = vpop.xlane.xlu0 %4361  ;;  %v4709_v8 = vld [vmem:[#allocation2 + $0x68] sm:$0xff] }
 0xf14   :  { %4685 = vst.msk [vmem:[#allocation4 + $0x28] sm:$0xff] %vm807_vm3, %v4681_v56  ;;  %v4595_v32 = vmul.f32 %v9890_v39, %v4362_v14  ;;  %v4359_v6 = vpop.xlane.xlu1 %4358  ;;  %v4693_v41 = vmul.f32 %v4689_v50, %v4681_v56  ;;  %v4688_v39 = vld [vmem:[#allocation2 + $0x40] sm:$0xff] }
 0xf15   :  { %4684 = vst.msk [vmem:[#allocation4 + $0x20] sm:$0xff] %vm807_vm3, %v4680_v60  ;;  %v4679_v46 = vld [vmem:[#allocation3 + $0x38] sm:$0xff]  ;;  %v4594_v15 = vmul.f32 %v4359_v6, %v9893_v58  ;;  %v4692_v58 = vmul.f32 %v4688_v39, %v4680_v60 }
 0xf16   :  { %v4683_v9 = vadd.f32 %v4679_v46, %v4675_v2  ;;  %v4678_v27 = vld [vmem:[#allocation3 + $0x30] sm:$0xff]  ;;  %4627 = vst.msk [vmem:[#allocation3 + $0x58] sm:$0xff] %vm807_vm3, %v4595_v32 }
 0xf17   :  { %v4682_v34 = vadd.f32 %v4678_v27, %v4674_v63  ;;  %4626 = vst.msk [vmem:[#allocation3 + $0x50] sm:$0xff] %vm807_vm3, %v4594_v15  ;;  %v4368_v52 = vpop.xlane.xlu0 %4367  ;;  %v4711_v15 = vld [vmem:[#allocation2 + $0x78] sm:$0xff] }
 0xf18   :  { %4687 = vst.msk [vmem:[#allocation4 + $0x38] sm:$0xff] %vm807_vm3, %v4683_v9  ;;  %v4597_v17 = vmul.f32 %v9898_v23, %v4368_v52  ;;  %v4365_v13 = vpop.xlane.xlu1 %4364  ;;  %v4695_v59 = vmul.f32 %v4691_v42, %v4683_v9  ;;  %v4690_v23 = vld [vmem:[#allocation2 + $0x50] sm:$0xff] }
 0xf19   :  { %4686 = vst.msk [vmem:[#allocation4 + $0x30] sm:$0xff] %vm807_vm3, %v4682_v34  ;;  %v4697_v16 = vld [vmem:[#allocation3 + $0x48] sm:$0xff]  ;;  %v4596_v25 = vmul.f32 %v4365_v13, %v9901_v11  ;;  %v4694_v11 = vmul.f32 %v4690_v23, %v4682_v34 }
 0xf1a   :  { %v4701_v47 = vadd.f32 %v4697_v16, %v4693_v41  ;;  %v4696_v29 = vld [vmem:[#allocation3 + $0x40] sm:$0xff]  ;;  %4629 = vst.msk [vmem:[#allocation3 + $0x68] sm:$0xff] %vm807_vm3, %v4597_v17  ;;  %v4729_v16 = vld [vmem:[#allocation2 + $0x88] sm:$0xff] }
 0xf1b   :  { %v4700_v10 = vadd.f32 %v4696_v29, %v4692_v58  ;;  %4628 = vst.msk [vmem:[#allocation3 + $0x60] sm:$0xff] %vm807_vm3, %v4596_v25  ;;  %v4374_v43 = vpop.xlane.xlu0 %4373 }
 0xf1c   :  { %4705 = vst.msk [vmem:[#allocation4 + $0x48] sm:$0xff] %vm807_vm3, %v4701_v47  ;;  %v4599_v1 = vmul.f32 %v9906_v26, %v4374_v43  ;;  %v4371_v57 = vpop.xlane.xlu1 %4370  ;;  %v4713_v53 = vmul.f32 %v4709_v8, %v4701_v47  ;;  %v4708_v26 = vld [vmem:[#allocation2 + $0x60] sm:$0xff] }
 0xf1d   :  { %4704 = vst.msk [vmem:[#allocation4 + $0x40] sm:$0xff] %vm807_vm3, %v4700_v10  ;;  %v4699_v36 = vld [vmem:[#allocation3 + $0x58] sm:$0xff]  ;;  %v4598_v48 = vmul.f32 %v4371_v57, %v9909_v19  ;;  %v4712_v19 = vmul.f32 %v4708_v26, %v4700_v10 }
 0xf1e   :  { %v4703_v22 = vadd.f32 %v4699_v36, %v4695_v59  ;;  %v4698_v49 = vld [vmem:[#allocation3 + $0x50] sm:$0xff]  ;;  %4631 = vst.msk [vmem:[#allocation3 + $0x78] sm:$0xff] %vm807_vm3, %v4599_v1  ;;  %v4731_v1 = vld [vmem:[#allocation2 + $0x98] sm:$0xff] }
 0xf1f   :  { %v4702_v56 = vadd.f32 %v4698_v49, %v4694_v11  ;;  %4630 = vst.msk [vmem:[#allocation3 + $0x70] sm:$0xff] %vm807_vm3, %v4598_v48  ;;  %v4380_v60 = vpop.xlane.xlu0 %4379 }
 0xf20   :  { %4707 = vst.msk [vmem:[#allocation4 + $0x58] sm:$0xff] %vm807_vm3, %v4703_v22  ;;  %v4601_v14 = vmul.f32 %v9914_v30, %v4380_v60  ;;  %v4377_v2 = vpop.xlane.xlu1 %4376  ;;  %v4715_v27 = vmul.f32 %v4711_v15, %v4703_v22  ;;  %v4710_v30 = vld [vmem:[#allocation2 + $0x70] sm:$0xff] }
 0xf21   :  { %4706 = vst.msk [vmem:[#allocation4 + $0x50] sm:$0xff] %vm807_vm3, %v4702_v56  ;;  %v4717_v3 = vld [vmem:[#allocation3 + $0x68] sm:$0xff]  ;;  %v4600_v32 = vmul.f32 %v4377_v2, %v9917_v24  ;;  %v4714_v24 = vmul.f32 %v4710_v30, %v4702_v56  ;;  %v4903_v30 = vld [vmem:[#allocation4] sm:$0xff] }
 0xf22   :  { %v4721_v6 = vadd.f32 %v4717_v3, %v4713_v53  ;;  %v4716_v46 = vld [vmem:[#allocation3 + $0x60] sm:$0xff]  ;;  %4633 = vst.msk [vmem:[#allocation3 + $0x88] sm:$0xff] %vm807_vm3, %v4601_v14  ;;  %v4749_v53 = vld [vmem:[#allocation2 + $0xa8] sm:$0xff] }
 0xf23   :  { %v4720_v63 = vadd.f32 %v4716_v46, %v4712_v19  ;;  %4632 = vst.msk [vmem:[#allocation3 + $0x80] sm:$0xff] %vm807_vm3, %v4600_v32  ;;  %v4386_v9 = vpop.xlane.xlu0 %4385 }
 0xf24   :  { %4725 = vst.msk [vmem:[#allocation4 + $0x68] sm:$0xff] %vm807_vm3, %v4721_v6  ;;  %v4603_v34 = vmul.f32 %v9922_v62, %v4386_v9  ;;  %v4383_v50 = vpop.xlane.xlu1 %4382  ;;  %v4733_v25 = vmul.f32 %v4729_v16, %v4721_v6  ;;  %v4728_v62 = vld [vmem:[#allocation2 + $0x80] sm:$0xff] }
 0xf25   :  { %4724 = vst.msk [vmem:[#allocation4 + $0x60] sm:$0xff] %vm807_vm3, %v4720_v63  ;;  %v4719_v52 = vld [vmem:[#allocation3 + $0x78] sm:$0xff]  ;;  %v4602_v41 = vmul.f32 %v4383_v50, %v9925_v5  ;;  %v4732_v5 = vmul.f32 %v4728_v62, %v4720_v63  ;;  %v4750_v50 = vld [vmem:[#allocation2 + $0xb0] sm:$0xff] }
 0xf26   :  { %v4723_v39 = vadd.f32 %v4719_v52, %v4715_v27  ;;  %v4718_v17 = vld [vmem:[#allocation3 + $0x70] sm:$0xff]  ;;  %4635 = vst.msk [vmem:[#allocation3 + $0x98] sm:$0xff] %vm807_vm3, %v4603_v34  ;;  %v4751_v63 = vld [vmem:[#allocation2 + $0xb8] sm:$0xff]  ;;  %v4904_v34 = vld [vmem:[#allocation4 + $0x8] sm:$0xff] }
 0xf27   :  { %v4722_v13 = vadd.f32 %v4718_v17, %v4714_v24  ;;  %4634 = vst.msk [vmem:[#allocation3 + $0x90] sm:$0xff] %vm807_vm3, %v4602_v41  ;;  %v4392_v58 = vpop.xlane.xlu0 %4391  ;;  %v8244_v62 = vpack.c.bf16 %v4904_v34, %v4903_v30  ;;  %v4788_v34 = vld [vmem:[#allocation2 + $0xe0] sm:$0xff] }
 0xf28   :  { %4727 = vst.msk [vmem:[#allocation4 + $0x78] sm:$0xff] %vm807_vm3, %v4723_v39  ;;  %v4605_v47 = vmul.f32 %v9930_v20, %v4392_v58  ;;  %v4389_v29 = vpop.xlane.xlu1 %4388  ;;  %v4735_v36 = vmul.f32 %v4731_v1, %v4723_v39  ;;  %v4730_v20 = vld [vmem:[#allocation2 + $0x90] sm:$0xff] }
 0xf29   :  { %4726 = vst.msk [vmem:[#allocation4 + $0x70] sm:$0xff] %vm807_vm3, %v4722_v13  ;;  %v4737_v10 = vld [vmem:[#allocation3 + $0x88] sm:$0xff]  ;;  %v4604_v42 = vmul.f32 %v4389_v29, %v9933_v0  ;;  %v4734_v0 = vmul.f32 %v4730_v20, %v4722_v13 }
 0xf2a   :  { %v4741_v43 = vadd.f32 %v4737_v10, %v4733_v25  ;;  %v4736_v59 = vld [vmem:[#allocation3 + $0x80] sm:$0xff]  ;;  %4637 = vst.msk [vmem:[#allocation3 + $0xa8] sm:$0xff] %vm807_vm3, %v4605_v47  ;;  %v4769_v25 = vld [vmem:[#allocation2 + $0xc8] sm:$0xff]  ;;  %v4905_v10 = vld [vmem:[#allocation4 + $0x10] sm:$0xff] }
 0xf2b   :  { %v4740_v23 = vadd.f32 %v4736_v59, %v4732_v5  ;;  %4636 = vst.msk [vmem:[#allocation3 + $0xa0] sm:$0xff] %vm807_vm3, %v4604_v42  ;;  %v4398_v57 = vpop.xlane.xlu0 %4397  ;;  %v4906_v5 = vld [vmem:[#allocation4 + $0x18] sm:$0xff] }
 0xf2c   :  { %4745 = vst.msk [vmem:[#allocation4 + $0x88] sm:$0xff] %vm807_vm3, %v4741_v43  ;;  %v4607_v11 = vmul.f32 %v9938_v31, %v4398_v57  ;;  %v4395_v48 = vpop.xlane.xlu1 %4394  ;;  %v4753_v14 = vmul.f32 %v4749_v53, %v4741_v43  ;;  %v4748_v31 = vld [vmem:[#allocation2 + $0xa0] sm:$0xff] }
 0xf2d   :  { %4744 = vst.msk [vmem:[#allocation4 + $0x80] sm:$0xff] %vm807_vm3, %v4740_v23  ;;  %v4739_v22 = vld [vmem:[#allocation3 + $0x98] sm:$0xff]  ;;  %v4606_v49 = vmul.f32 %v4395_v48, %v9940_v28  ;;  %v4752_v28 = vmul.f32 %v4748_v31, %v4740_v23  ;;  %v4768_v43 = vld [vmem:[#allocation2 + $0xc0] sm:$0xff] }
 0xf2e   :  { %v4743_v56 = vadd.f32 %v4739_v22, %v4735_v36  ;;  %v4738_v8 = vld [vmem:[#allocation3 + $0x90] sm:$0xff]  ;;  %4639 = vst.msk [vmem:[#allocation3 + $0xb8] sm:$0xff] %vm807_vm3, %v4607_v11  ;;  %v4771_v22 = vld [vmem:[#allocation2 + $0xd8] sm:$0xff] }
 0xf2f   :  { %v4742_v60 = vadd.f32 %v4738_v8, %v4734_v0  ;;  %4638 = vst.msk [vmem:[#allocation3 + $0xb0] sm:$0xff] %vm807_vm3, %v4606_v49  ;;  %v4404_v26 = vpop.xlane.xlu0 %4403  ;;  %v8248_v0 = vpack.c.bf16 %v4906_v5, %v4905_v10  ;;  %v4907_v8 = vld [vmem:[#allocation4 + $0x20] sm:$0xff] }
 0xf30   :  { %4747 = vst.msk [vmem:[#allocation4 + $0x98] sm:$0xff] %vm807_vm3, %v4743_v56  ;;  %v4609_v2 = vmul.f32 %v9947_v55, %v4404_v26  ;;  %v4401_v3 = vpop.xlane.xlu1 %4400  ;;  %v4755_v55 = vmul.f32 %v4751_v63, %v4743_v56  ;;  %v4770_v26 = vld [vmem:[#allocation2 + $0xd0] sm:$0xff] }
 0xf31   :  { %4746 = vst.msk [vmem:[#allocation4 + $0x90] sm:$0xff] %vm807_vm3, %v4742_v60  ;;  %v4757_v19 = vld [vmem:[#allocation3 + $0xa8] sm:$0xff]  ;;  %v4608_v32 = vmul.f32 %v4401_v3, %v9949_v61  ;;  %v4754_v39 = vmul.f32 %v4750_v50, %v4742_v60 }
 0xf32   :  { %v4761_v6 = vadd.f32 %v4757_v19, %v4753_v14  ;;  %v4756_v46 = vld [vmem:[#allocation3 + $0xa0] sm:$0xff]  ;;  %4641 = vst.msk [vmem:[#allocation3 + $0xc8] sm:$0xff] %vm807_vm3, %v4609_v2  ;;  %v4908_v60 = vld [vmem:[#allocation4 + $0x28] sm:$0xff] }
 0xf33   :  { %v4760_v15 = vadd.f32 %v4756_v46, %v4752_v28  ;;  %4640 = vst.msk [vmem:[#allocation3 + $0xc0] sm:$0xff] %vm807_vm3, %v4608_v32  ;;  %v4410_v9 = vpop.xlane.xlu0 %4409  ;;  %v4920_v27 = vld [vmem:[#allocation4 + $0x88] sm:$0xff]  ;;  %v8252_v63 = vpack.c.bf16 %v4908_v60, %v4907_v8 }
 0xf34   :  { %4765 = vst.msk [vmem:[#allocation4 + $0xa8] sm:$0xff] %vm807_vm3, %v4761_v6  ;;  %v4611_v52 = vmul.f32 %v9955_v35, %v4410_v9  ;;  %v4407_v24 = vpop.xlane.xlu1 %4406  ;;  %v4919_v61 = vld [vmem:[#allocation4 + $0x80] sm:$0xff]  ;;  %v4773_v42 = vmul.f32 %v4769_v25, %v4761_v6  ;;  %v4789_v46 = vld [vmem:[#allocation2 + $0xe8] sm:$0xff]  ;;  %v4909_v9 = vld [vmem:[#allocation4 + $0x30] sm:$0xff] }
 0xf35   :  { %4764 = vst.msk [vmem:[#allocation4 + $0xa0] sm:$0xff] %vm807_vm3, %v4760_v15  ;;  %v4759_v41 = vld [vmem:[#allocation3 + $0xb8] sm:$0xff]  ;;  %v4610_v17 = vmul.f32 %v4407_v24, %v9957_v37  ;;  %v8242_v13 = vpack.c.bf16 %v4920_v27, %v4919_v61  ;;  %v4772_v57 = vmul.f32 %v4768_v43, %v4760_v15  ;;  %v6785_v8 = vld [vmem:[%s9397_s21 + $0x48] sm:$0xff] }
 0xf36   :  { %v4763_v16 = vadd.f32 %v4759_v41, %v4755_v55  ;;  %v4758_v58 = vld [vmem:[#allocation3 + $0xb0] sm:$0xff]  ;;  %4643 = vst.msk [vmem:[#allocation3 + $0xd8] sm:$0xff] %vm807_vm3, %v4611_v52  ;;  %v4910_v27 = vld [vmem:[#allocation4 + $0x38] sm:$0xff] }
 0xf37   :  { %v4762_v47 = vadd.f32 %v4758_v58, %v4754_v39  ;;  %4642 = vst.msk [vmem:[#allocation3 + $0xd0] sm:$0xff] %vm807_vm3, %v4610_v17  ;;  %8243 = vmatprep.subr.bf16.mxu0 %v8242_v13  ;;  %v4416_v35 = vpop.xlane.xlu0 %4415  ;;  %v4922_v29 = vld [vmem:[#allocation4 + $0x98] sm:$0xff]  ;;  %v8256_v39 = vpack.c.bf16 %v4910_v27, %v4909_v9  ;;  %v4912_v58 = vld [vmem:[#allocation4 + $0x48] sm:$0xff]  ;;  %v6788_v9 = vld [vmem:[%s9397_s21 + $0x60] sm:$0xff] }
 0xf38   :  { %4767 = vst.msk [vmem:[#allocation4 + $0xb8] sm:$0xff] %vm807_vm3, %v4763_v16  ;;  %v4613_v37 = vmul.f32 %v9959_v4, %v4416_v35  ;;  %8245 = vmatpush3.bf16.msra.mxu0 %v8244_v62  ;;  %v4413_v59 = vpop.xlane.xlu1 %4412  ;;  %v4921_v23 = vld [vmem:[#allocation4 + $0x90] sm:$0xff]  ;;  %v4775_v53 = vmul.f32 %v4771_v22, %v4763_v16  ;;  %v4791_v41 = vld [vmem:[#allocation2 + $0xf8] sm:$0xff]  ;;  %v4911_v16 = vld [vmem:[#allocation4 + $0x40] sm:$0xff] }
 0xf39   :  { %4766 = vst.msk [vmem:[#allocation4 + $0xb0] sm:$0xff] %vm807_vm3, %v4762_v47  ;;  %v4777_v1 = vld [vmem:[#allocation3 + $0xc8] sm:$0xff]  ;;  %v4612_v36 = vmul.f32 %v4413_v59, %v9961_v38  ;;  %v8246_v20 = vpack.c.bf16 %v4922_v29, %v4921_v23  ;;  %v4774_v3 = vmul.f32 %v4770_v26, %v4762_v47  ;;  %v4790_v62 = vld [vmem:[#allocation2 + $0xf0] sm:$0xff]  ;;  %v8260_v43 = vpack.c.bf16 %v4912_v58, %v4911_v16  ;;  %v4918_v26 = vld [vmem:[#allocation4 + $0x78] sm:$0xff] }
 0xf3a   :  { %v4781_v11 = vadd.f32 %v4777_v1, %v4773_v42  ;;  %v4776_v48 = vld [vmem:[#allocation3 + $0xc0] sm:$0xff]  ;;  %4645 = vst.msk [vmem:[#allocation3 + $0xe8] sm:$0xff] %vm807_vm3, %v4613_v37  ;;  %v4913_v23 = vld [vmem:[#allocation4 + $0x50] sm:$0xff]  ;;  %v4914_v1 = vld [vmem:[#allocation4 + $0x58] sm:$0xff] }
 0xf3b   :  { %v4780_v49 = vadd.f32 %v4776_v48, %v4772_v57  ;;  %4644 = vst.msk [vmem:[#allocation3 + $0xe0] sm:$0xff] %vm807_vm3, %v4612_v36  ;;  %8247 = vmatprep.subr.bf16.mxu0 %v8246_v20  ;;  %v4422_v4 = vpop.xlane.xlu0 %4421  ;;  %v4924_v56 = vld [vmem:[#allocation4 + $0xa8] sm:$0xff]  ;;  %v8264_v20 = vpack.c.bf16 %v4914_v1, %v4913_v23  ;;  %v4915_v48 = vld [vmem:[#allocation4 + $0x60] sm:$0xff] }
 0xf3c   :  { %4785 = vst.msk [vmem:[#allocation4 + $0xc8] sm:$0xff] %vm807_vm3, %v4781_v11  ;;  %v4615_v38 = vmul.f32 %v9963_v40, %v4422_v4  ;;  %8249 = vmatpush3.bf16.msra.mxu0 %v8248_v0  ;;  %v4419_v14 = vpop.xlane.xlu1 %4418  ;;  %v4923_v31 = vld [vmem:[#allocation4 + $0xa0] sm:$0xff]  ;;  %v4793_v30 = vmul.f32 %v4789_v46, %v4781_v11  ;;  %v4916_v22 = vld [vmem:[#allocation4 + $0x68] sm:$0xff] }
 0xf3d   :  { %4784 = vst.msk [vmem:[#allocation4 + $0xc0] sm:$0xff] %vm807_vm3, %v4780_v49  ;;  %v4779_v2 = vld [vmem:[#allocation3 + $0xd8] sm:$0xff]  ;;  %v4614_v19 = vmul.f32 %v4419_v14, %v9965_v33  ;;  %v8250_v28 = vpack.c.bf16 %v4924_v56, %v4923_v31  ;;  %v4792_v50 = vmul.f32 %v4788_v34, %v4780_v49  ;;  %v8268_v4 = vpack.c.bf16 %v4916_v22, %v4915_v48  ;;  %v6784_v56 = vld [vmem:[%s9397_s21 + $0x40] sm:$0xff]  ;;  %v6789_v27 = vld [vmem:[%s9397_s21 + $0x68] sm:$0xff] }
 0xf3e   :  { %v4783_v32 = vadd.f32 %v4779_v2, %v4775_v53  ;;  %v4778_v6 = vld [vmem:[#allocation3 + $0xd0] sm:$0xff]  ;;  %4647 = vst.msk [vmem:[#allocation3 + $0xf8] sm:$0xff] %vm807_vm3, %v4615_v38  ;;  %v8274_v31 = vpack.c.bf16 %v6785_v8, %v6784_v56  ;;  %v4895_v2 = vld [vmem:[%s9207_s14] sm:$0xff] }
 0xf3f   :  { %v4782_v15 = vadd.f32 %v4778_v6, %v4774_v3  ;;  %4646 = vst.msk [vmem:[#allocation3 + $0xf0] sm:$0xff] %vm807_vm3, %v4614_v19  ;;  %8251 = vmatprep.subr.bf16.mxu0 %v8250_v28  ;;  %v4926_v40 = vld [vmem:[#allocation4 + $0xb8] sm:$0xff]  ;;  %v4917_v53 = vld [vmem:[#allocation4 + $0x70] sm:$0xff]  ;;  %v4899_v28 = vmul.f32 %v4895_v2, %v9944_v18  ;;  %v8282_v18 = vpack.c.bf16 %v6789_v27, %v6788_v9  ;;  %v5261_v2 = vld [vmem:[%s10101_s11 + $0x8] sm:$0xff] }
 0xf40   :  { %4787 = vst.msk [vmem:[#allocation4 + $0xd8] sm:$0xff] %vm807_vm3, %v4783_v32  ;;  %8253 = vmatpush3.bf16.msra.mxu0 %v8252_v63  ;;  %v4925_v33 = vld [vmem:[#allocation4 + $0xb0] sm:$0xff]  ;;  %v4795_v25 = vmul.f32 %v4791_v41, %v4783_v32  ;;  %v8272_v3 = vpack.c.bf16 %v4918_v26, %v4917_v53  ;;  %v4898_v19 = vld [vmem:[%s9207_s14 + $0x18] sm:$0xff] }
 0xf41   :  { %4786 = vst.msk [vmem:[#allocation4 + $0xd0] sm:$0xff] %vm807_vm3, %v4782_v15  ;;  %v4797_v55 = vld [vmem:[#allocation3 + $0xe8] sm:$0xff]  ;;  %v8254_v52 = vpack.c.bf16 %v4926_v40, %v4925_v33  ;;  %v4794_v29 = vmul.f32 %v4790_v62, %v4782_v15  ;;  %v4897_v32 = vld [vmem:[%s9207_s14 + $0x10] sm:$0xff]  ;;  %v4902_v6 = vmul.f32 %v4898_v19, %v9953_v54  ;;  %v6787_v15 = vld [vmem:[%s9397_s21 + $0x58] sm:$0xff]  ;;  %v5020_v33 = vand.u32 2147483647, %v9453_v7 }
 0xf42   :  { %v4801_v24 = vadd.f32 %v4797_v55, %v4793_v30  ;;  %v4796_v61 = vld [vmem:[#allocation3 + $0xe0] sm:$0xff]  ;;  %v4901_v46 = vmul.f32 %v4897_v32, %v9951_v45  ;;  %v6786_v63 = vld [vmem:[%s9397_s21 + $0x50] sm:$0xff]  ;;  %v6791_v54 = vld [vmem:[%s9397_s21 + $0x78] sm:$0xff]  ;;  %v5021_v45 = vand.u32 2147483647, %v9451_v12 }
 0xf43   :  { %v4800_v17 = vadd.f32 %v4796_v61, %v4792_v50  ;;  %8255 = vmatprep.subr.bf16.mxu0 %v8254_v52  ;;  %v4928_v13 = vld [vmem:[#allocation4 + $0xc8] sm:$0xff]  ;;  %v8278_v40 = vpack.c.bf16 %v6787_v15, %v6786_v63  ;;  %v6790_v30 = vld [vmem:[%s9397_s21 + $0x70] sm:$0xff]  ;;  %v5022_v55 = vsub.f32 0.0, %v5020_v33 }
 0xf44   :  { %4805 = vst.msk [vmem:[#allocation4 + $0xe8] sm:$0xff] %vm807_vm3, %v4801_v24  ;;  %8257 = vmatpush3.bf16.msra.mxu0 %v8256_v39  ;;  %v4927_v47 = vld [vmem:[#allocation4 + $0xc0] sm:$0xff]  ;;  %v8286_v34 = vpack.c.bf16 %v6791_v54, %v6790_v30  ;;  %v5023_v50 = vsub.f32 0.0, %v5021_v45 }
 0xf45   :  { %4804 = vst.msk [vmem:[#allocation4 + $0xe0] sm:$0xff] %vm807_vm3, %v4800_v17  ;;  %v4799_v35 = vld [vmem:[#allocation3 + $0xf8] sm:$0xff]  ;;  %v8258_v10 = vpack.c.bf16 %v4928_v13, %v4927_v47  ;;  %v5024_v52 = vmul.f32 1.442695, %v5022_v55 }
 0xf46   :  { %v4803_v5 = vadd.f32 %v4799_v35, %v4795_v25  ;;  %v4798_v42 = vld [vmem:[#allocation3 + $0xf0] sm:$0xff]  ;;  %v5026_v24 = vmul.f32 1.442695, %v5023_v50  ;;  %v6783_v25 = vld [vmem:[%s9420_s28 + $0x1] ss:$0 sm:$0xff] }
 0xf47   :  { %v4802_v37 = vadd.f32 %v4798_v42, %v4794_v29  ;;  %8259 = vmatprep.subr.bf16.mxu0 %v8258_v10  ;;  %v4930_v59 = vld [vmem:[#allocation4 + $0xd8] sm:$0xff]  ;;  %8597 = vpow2.f32 %v5024_v52  ;;  %v4943_v10 = vmul.f32 %v6783_v25, %v9497_v44 }
 0xf48   :  { %4807 = vst.msk [vmem:[#allocation4 + $0xf8] sm:$0xff] %vm807_vm3, %v4803_v5  ;;  %8261 = vmatpush3.bf16.msra.mxu0 %v8260_v43  ;;  %v4929_v57 = vld [vmem:[#allocation4 + $0xd0] sm:$0xff]  ;;  %8599 = vpow2.f32 %v5026_v24 }
 0xf49   :  { %4806 = vst.msk [vmem:[#allocation4 + $0xf0] sm:$0xff] %vm807_vm3, %v4802_v37  ;;  %v8262_v36 = vpack.c.bf16 %v4930_v59, %v4929_v57  ;;  %v4944_v57 = vmul.f32 %v6783_v25, %v9499_v51  ;;  %v6841_v25 = vld [vmem:[%s10118_s4 + $0xe] sm:$0x3] }
 0xf4b   :  { %8263 = vmatprep.subr.bf16.mxu0 %v8262_v36  ;;  %v4932_v11 = vld [vmem:[#allocation4 + $0xe8] sm:$0xff] }
 0xf4c   :  { %8265 = vmatpush3.bf16.msra.mxu0 %v8264_v20  ;;  %v4931_v0 = vld [vmem:[#allocation4 + $0xe0] sm:$0xff] }
 0xf4d   :  { %v8266_v49 = vpack.c.bf16 %v4932_v11, %v4931_v0 }
 0xf4f   :  { %8267 = vmatprep.subr.bf16.mxu0 %v8266_v49  ;;  %v4934_v60 = vld [vmem:[#allocation4 + $0xf8] sm:$0xff] }
 0xf50   :  { %8269 = vmatpush3.bf16.msra.mxu0 %v8268_v4  ;;  %v4933_v38 = vld [vmem:[#allocation4 + $0xf0] sm:$0xff] }
 0xf51   :  { %v8270_v14 = vpack.c.bf16 %v4934_v60, %v4933_v38  ;;  %v8598_v61 = vpop.eup %8597 }
 0xf52   :  { %v5028_v41 = vadd.f32 1.0, %v8598_v61  ;;  %v8600_v39 = vpop.eup %8599  ;;  %v5186_v61 = vld [vmem:[%s10118_s4] sm:$0x3] }
 0xf53   :  { %8271 = vmatprep.subr.bf16.mxu0 %v8270_v14  ;;  %v5029_v17 = vadd.f32 1.0, %v8600_v39  ;;  %v8636_v14 = vmov 0.0|0.0   ;;  %v6806_v39 = vld [vmem:[%s10118_s4 + $0x4] sm:$0x3] }
 0xf54   :  { %8273 = vmatpush3.bf16.msra.mxu0 %v8272_v3  ;;  %8601 = vrcp.f32 %v5028_v41  ;;  %8290 = vmatprep.subr.bf16.mxu1 %v8636_v14  ;;  %v5262_v3 = vld [vmem:[%s10101_s11 + $0x10] sm:$0xff]  ;;  %v6799_v41 = vld [vmem:[%s10118_s4 + $0x2] sm:$0x3] }
 0xf55   :  { %8275 = vmatprep.subr.bf16.mxu0 %v8274_v31  ;;  %8603 = vrcp.f32 %v5029_v17  ;;  %v6813_v17 = vld [vmem:[%s10118_s4 + $0x6] sm:$0x3] }
 0xf57   :  { %5010 = vmatmul.mubr.f32.vlgmr.msra.gmra.mrb[116].mxu0 %v4899_v28  ;;  %v5263_v28 = vld [vmem:[%s10101_s11 + $0x18] sm:$0xff] }
 0xf58   :  { %5014 = vmatprep.mubr.f32.mxu0 %v4902_v6  ;;  %8277 = vmatpush3.bf16.msra.mxu0 %v8274_v31  ;;  %v5260_v31 = vld [vmem:[%s10101_s11] sm:$0xff]  ;;  %v8297_v32 = vpack.c.bf16 %v5263_v28, %v5262_v3  ;;  %v6824_v3 = vld [vmem:[%s10101_s11 + $0x90] sm:$0xff] }
 0xf59   :  { %8279 = vmatprep.subr.bf16.mxu0 %v8278_v40  ;;  %v8294_v19 = vpack.c.bf16 %v5261_v2, %v5260_v31 }
 0xf5b   :  { %5015 = vmatmul.mubr.f32.gmra.mrb[118].mxu0 %v4901_v46 }
 0xf5c   :  { %8281 = vmatpush3.bf16.msra.mxu0 %v8278_v40 }
 0xf5d   :  { %8283 = vmatprep.subr.bf16.mxu0 %v8282_v18 }
 0xf5e   :  { %v8602_v13 = vpop.eup %8601 }
 0xf5f   :  { %v5036_v16 = vsub.f32 1.0, %v8602_v13  ;;  %v8604_v58 = vpop.eup %8603 }
 0xf60   :  { %8285 = vmatpush3.bf16.msra.mxu0 %v8282_v18  ;;  %v5037_v47 = vsub.f32 1.0, %v8604_v58  ;;  %v6794_v18 = vld [vmem:[%s6445_s27] ss:$0 sm:$0xff] }
 0xf61   :  { %8287 = vmatprep.subr.bf16.mxu0 %v8286_v34  ;;  %v5038_v35 = vsel %vm5034_vm8, %v8602_v13, %v5036_v16  ;;  %v6820_v13 = vld [vmem:[%s10118_s4 + $0x8] sm:$0x3]  ;;  %v6827_v16 = vld [vmem:[%s10118_s4 + $0xa] sm:$0x3] }
 0xf62   :  { %v5040_v42 = vmul.f32 %v5038_v35, %v9453_v7  ;;  %v5039_v59 = vsel %vm5035_vm9, %v8604_v58, %v5037_v47  ;;  %v6834_v58 = vld [vmem:[%s10118_s4 + $0xc] sm:$0x3] }
 0xf63   :  { %v5041_v20 = vmul.f32 %v9451_v12, %v5039_v59  ;;  %v6802_v47 = vld [vmem:[%s10101_s11 + $0x28] sm:$0xff] }
 0xf64   :  { %8289 = vmatpush3.bf16.msra.mxu0 %v8286_v34  ;;  %v6795_v34 = vld [vmem:[%s6446_s18] ss:$0 sm:$0xff]  ;;  %v6809_v59 = vld [vmem:[%s10101_s11 + $0x48] sm:$0xff] }
 0xf65   :  { %8293 = vmatprep.subr.bf16.mxu0 %v8636_v14 }
0x102a   :  { %v7244_v62 = vpop.f32.mrb[116].mxu0 }
0x102b   :  { %v7245_v29 = vpop.f32.mrb[117].mxu0 }
0x102c   :  { %v7246_v5 = vadd.f32 %v7245_v29, %v7244_v62  ;;  %v6801_v62 = vld [vmem:[%s10101_s11 + $0x20] sm:$0xff]  ;;  %v6803_v29 = vld [vmem:[%s10101_s11 + $0x30] sm:$0xff] }
0x102d   :  { %v8303_v35 = vpack.c.bf16 %v6802_v47, %v6801_v62 }
0x102e   :  { %v5012_v43 = vadd.f32 %v7246_v5, %v4943_v10  ;;  %v7247_v37 = vpop.f32.mrb[118].mxu0  ;;  %v6804_v10 = vld [vmem:[%s10101_s11 + $0x38] sm:$0xff] }
0x102f   :  { %v7248_v23 = vpop.f32.mrb[119].mxu0 }
0x1030   :  { %v5042_v1 = vmul.f32 %v5040_v42, %v5012_v43  ;;  %v7249_v36 = vadd.f32 %v7248_v23, %v7247_v37  ;;  %v8306_v43 = vpack.c.bf16 %v6804_v10, %v6803_v29  ;;  %v6808_v37 = vld [vmem:[%s10101_s11 + $0x40] sm:$0xff] }
0x1032   :  { %v5017_v11 = vadd.f32 %v7249_v36, %v4944_v57  ;;  %7875 = vmatprep.mubr.msk.f32.mxu0 %vm807_vm3, %v5042_v1  ;;  %v8312_v57 = vpack.c.bf16 %v6809_v59, %v6808_v37  ;;  %v6810_v36 = vld [vmem:[%s10101_s11 + $0x50] sm:$0xff] }
0x1034   :  { %v5043_v48 = vmul.f32 %v5041_v20, %v5017_v11  ;;  %v6811_v20 = vld [vmem:[%s10101_s11 + $0x58] sm:$0xff] }
0x1036   :  { %7876 = vmatmul.mubr.msk.f32.vlgmr.msra.gmra.mrb[120].mxu0 %vm807_vm3, %v5043_v48 }
0x1037   :  { %7893 = vmatprep.mubr.msk.f32.mxu0 %vm8637_vm10, %v8617_v21  ;;  %8295 = vmatpush3.bf16.msra.mxu0 %v8294_v19  ;;  %v6825_v19 = vld [vmem:[%s10101_s11 + $0x98] sm:$0xff] }
0x1038   :  { %8296 = vmatprep.subr.bf16.mxu0 %v8636_v14 }
0x103b   :  { %8298 = vmatpush3.bf16.msra.mxu0 %v8297_v32 }
0x103c   :  { %8302 = vmatprep.subr.bf16.mxu0 %v8636_v14 }
0x1109   :  { %v7877_v44 = vpop.f32.mrb[120].mxu0 }
0x110a   :  { %v5125_v22 = vpop.f32.mrb[121].mxu0  ;;  %v5137_v7 = vsel %vm367_vm15, %v7877_v44, 0.0 }
0x110b   :  { %5138 = vadd.xlane.f32.xlu0 %v5137_v7  ;;  %v5134_v0 = vsel %vm367_vm15, %v5125_v22, 0.0  ;;  %v6816_v7 = vld [vmem:[%s10101_s11 + $0x68] sm:$0xff] }
0x110c   :  { %5135 = vadd.xlane.f32.xlu1 %v5134_v0 }
0x1198   :  { %v5139_v49 = vpop.xlane.xlu0 %5138 }
0x1199   :  { %v5141_v4 = vmul.f32 0.03125, %v5139_v49  ;;  %v5136_v51 = vpop.xlane.xlu1 %5135 }
0x119a   :  { %v5140_v56 = vmul.f32 0.03125, %v5136_v51  ;;  %v6817_v51 = vld [vmem:[%s10101_s11 + $0x70] sm:$0xff] }
0x119b   :  { %v5143_v8 = vsub.f32 %v7877_v44, %v5141_v4  ;;  %v8315_v44 = vpack.c.bf16 %v6811_v20, %v6810_v36 }
0x119c   :  { %v5142_v12 = vsub.f32 %v5125_v22, %v5140_v56  ;;  %v6815_v22 = vld [vmem:[%s10101_s11 + $0x60] sm:$0xff]  ;;  %v6818_v56 = vld [vmem:[%s10101_s11 + $0x78] sm:$0xff] }
0x119d   :  { %v5145_v60 = vmul.f32 %v5143_v8, %v5143_v8  ;;  %v8321_v4 = vpack.c.bf16 %v6816_v7, %v6815_v22 }
0x119e   :  { %v5144_v53 = vmul.f32 %v5142_v12, %v5142_v12 }
0x119f   :  { %v5149_v26 = vsel %vm367_vm15, %v5145_v60, 0.0  ;;  %v8324_v60 = vpack.c.bf16 %v6818_v56, %v6817_v51 }
0x11a0   :  { %5150 = vadd.xlane.f32.xlu0 %v5149_v26  ;;  %v5146_v38 = vsel %vm367_vm15, %v5144_v53, 0.0  ;;  %v6822_v53 = vld [vmem:[%s10101_s11 + $0x80] sm:$0xff]  ;;  %v6823_v26 = vld [vmem:[%s10101_s11 + $0x88] sm:$0xff] }
0x11a1   :  { %5147 = vadd.xlane.f32.xlu1 %v5146_v38  ;;  %v8330_v2 = vpack.c.bf16 %v6823_v26, %v6822_v53 }
0x122d   :  { %v5151_v6 = vpop.xlane.xlu0 %5150 }
0x122e   :  { %v5153_v46 = vmul.f32 0.03125, %v5151_v6  ;;  %v5148_v63 = vpop.xlane.xlu1 %5147  ;;  %v8333_v6 = vpack.c.bf16 %v6825_v19, %v6824_v3 }
0x122f   :  { %v5152_v15 = vmul.f32 0.03125, %v5148_v63  ;;  %v6830_v63 = vld [vmem:[%s10101_s11 + $0xa8] sm:$0xff] }
0x1230   :  { %v5155_v40 = vadd.f32 1e-05, %v5153_v46  ;;  %v6829_v46 = vld [vmem:[%s10101_s11 + $0xa0] sm:$0xff] }
0x1231   :  { %v5154_v9 = vadd.f32 1e-05, %v5152_v15 }
0x1232   :  { %8605 = vrsqrt.f32 %v5155_v40 }
0x1233   :  { %8607 = vrsqrt.f32 %v5154_v9  ;;  %v8339_v9 = vpack.c.bf16 %v6830_v63, %v6829_v46 }
0x123c   :  { %v8606_v27 = vpop.eup %8605 }
0x123d   :  { %v8608_v30 = vpop.eup %8607  ;;  %v5159_v54 = vmul.f32 %v8606_v27, %v5143_v8  ;;  %v6831_v27 = vld [vmem:[%s10101_s11 + $0xb0] sm:$0xff] }
0x123e   :  { %v5158_v33 = vmul.f32 %v8608_v30, %v5142_v12 }
0x123f   :  { %v5168_v45 = vmul.f32 %v6794_v18, %v5159_v54  ;;  %v6836_v54 = vld [vmem:[%s10101_s11 + $0xc0] sm:$0xff] }
0x1240   :  { %v5167_v55 = vmul.f32 %v6794_v18, %v5158_v33  ;;  %v6832_v18 = vld [vmem:[%s10101_s11 + $0xb8] sm:$0xff] }
0x1241   :  { %v5177_v50 = vadd.f32 %v6795_v34, %v5168_v45  ;;  %v8342_v30 = vpack.c.bf16 %v6832_v18, %v6831_v27  ;;  %v6838_v45 = vld [vmem:[%s10101_s11 + $0xd0] sm:$0xff] }
0x1242   :  { %v5176_v52 = vadd.f32 %v6795_v34, %v5167_v55  ;;  %v6837_v34 = vld [vmem:[%s10101_s11 + $0xc8] sm:$0xff]  ;;  %v6839_v55 = vld [vmem:[%s10101_s11 + $0xd8] sm:$0xff] }
0x1243   :  { %v8348_v33 = vpack.c.bf16 %v6837_v34, %v6836_v54 }
0x1244   :  { %v8291_v24 = vpack.c.bf16 %v5177_v50, %v5176_v52  ;;  %v8351_v50 = vpack.c.bf16 %v6839_v55, %v6838_v45  ;;  %v6843_v52 = vld [vmem:[%s10101_s11 + $0xe0] sm:$0xff] }
0x1246   :  { %8292 = vmatpush3.bf16.msra.mxu1 %v8291_v24 }
0x1247   :  { %8299 = vmatprep.subr.bf16.mxu1 %v8636_v14 }
0x1249   :  { %7883 = vmatmul.mubr.msk.f32.vlgmr.msra.gmra.mrb[128].mxu1 %vm585_vm0, %v5186_v61 }
0x124a   :  { %8301 = vmatpush3.bf16.msra.mxu1 %v8291_v24  ;;  %7900 = vmatprep.mubr.msk.f32.mxu1 %vm8637_vm10, %v8617_v21 }
0x124b   :  { %8308 = vmatprep.subr.bf16.mxu1 %v8636_v14 }
0x124d   :  { %7901 = vmatmul.mubr.msk.f32.vlgmr.msra.gmra.mrb[130].mxu1 %vm585_vm0, %v6799_v41  ;;  %v6845_v41 = vld [vmem:[%s10101_s11 + $0xf0] sm:$0xff] }
0x124e   :  { %8310 = vmatpush3.bf16.msra.mxu1 %v8291_v24  ;;  %7918 = vmatprep.mubr.msk.f32.mxu1 %vm8637_vm10, %v8617_v21 }
0x124f   :  { %8317 = vmatprep.subr.bf16.mxu1 %v8636_v14 }
0x1251   :  { %7919 = vmatmul.mubr.msk.f32.vlgmr.msra.gmra.mrb[132].mxu1 %vm585_vm0, %v6806_v39  ;;  %v6846_v39 = vld [vmem:[%s10101_s11 + $0xf8] sm:$0xff] }
0x1252   :  { %8319 = vmatpush3.bf16.msra.mxu1 %v8291_v24  ;;  %7936 = vmatprep.mubr.msk.f32.mxu1 %vm8637_vm10, %v8617_v21 }
0x1253   :  { %8326 = vmatprep.subr.bf16.mxu1 %v8636_v14 }
0x1255   :  { %7937 = vmatmul.mubr.msk.f32.vlgmr.msra.gmra.mrb[134].mxu1 %vm585_vm0, %v6813_v17  ;;  %v8360_v17 = vpack.c.bf16 %v6846_v39, %v6845_v41 }
0x1256   :  { %8328 = vmatpush3.bf16.msra.mxu1 %v8291_v24  ;;  %7954 = vmatprep.mubr.msk.f32.mxu1 %vm8637_vm10, %v8617_v21 }
0x1257   :  { %8335 = vmatprep.subr.bf16.mxu1 %v8636_v14 }
0x1259   :  { %7955 = vmatmul.mubr.msk.f32.vlgmr.msra.gmra.mrb[136].mxu1 %vm585_vm0, %v6820_v13  ;;  %v6796_v13 = vld [vmem:[%s6448_s10] ss:$0 sm:$0xff] }
0x125a   :  { %8337 = vmatpush3.bf16.msra.mxu1 %v8291_v24  ;;  %7972 = vmatprep.mubr.msk.f32.mxu1 %vm8637_vm10, %v8617_v21 }
0x125b   :  { %8344 = vmatprep.subr.bf16.mxu1 %v8636_v14 }
0x125d   :  { %7973 = vmatmul.mubr.msk.f32.vlgmr.msra.gmra.mrb[138].mxu1 %vm585_vm0, %v6827_v16 }
0x125e   :  { %8346 = vmatpush3.bf16.msra.mxu1 %v8291_v24  ;;  %7990 = vmatprep.mubr.msk.f32.mxu1 %vm8637_vm10, %v8617_v21 }
0x125f   :  { %8353 = vmatprep.subr.bf16.mxu1 %v8636_v14 }
0x1261   :  { %7991 = vmatmul.mubr.msk.f32.vlgmr.msra.gmra.mrb[140].mxu1 %vm585_vm0, %v6834_v58 }
0x1262   :  { %8355 = vmatpush3.bf16.msra.mxu1 %v8291_v24  ;;  %8008 = vmatprep.mubr.msk.f32.mxu1 %vm8637_vm10, %v8617_v21  ;;  %v6844_v24 = vld [vmem:[%s10101_s11 + $0xe8] sm:$0xff] }
0x1263   :  { %v8357_v61 = vpack.c.bf16 %v6844_v24, %v6843_v52 }
0x1265   :  { %8009 = vmatmul.mubr.msk.f32.vlgmr.msra.gmra.mrb[142].mxu1 %vm585_vm0, %v6841_v25 }
0x131c   :  { %v5256_v5 = vpop.f32.mrb[128].mxu1 }
0x131d   :  { %7894 = vmatmul.mubr.msk.f32.vlgmr.msra.gmra.mrb[122].mxu0 %vm367_vm15, %v5256_v5  ;;  %v7884_v42 = vpop.f32.mrb[129].mxu1 }
0x131e   :  { %8304 = vmatpush3.bf16.msra.mxu0 %v8303_v35  ;;  %7911 = vmatprep.mubr.msk.f32.mxu0 %vm8637_vm10, %v8617_v21 }
0x131f   :  { %8305 = vmatprep.subr.bf16.mxu0 %v8636_v14 }
0x1320   :  { %v5409_v23 = vpop.f32.mrb[130].mxu1 }
0x1321   :  { %v7902_v1 = vpop.f32.mrb[131].mxu1 }
0x1322   :  { %8307 = vmatpush3.bf16.msra.mxu0 %v8306_v43 }
0x1323   :  { %8311 = vmatprep.subr.bf16.mxu0 %v8636_v14 }
0x1324   :  { %v5563_v11 = vpop.f32.mrb[132].mxu1 }
0x1325   :  { %7912 = vmatmul.mubr.msk.f32.vlgmr.msra.gmra.mrb[122].mxu0 %vm367_vm15, %v5409_v23  ;;  %v7920_v48 = vpop.f32.mrb[133].mxu1 }
0x1326   :  { %8313 = vmatpush3.bf16.msra.mxu0 %v8312_v57  ;;  %7929 = vmatprep.mubr.msk.f32.mxu0 %vm8637_vm10, %v8617_v21 }
0x1327   :  { %8314 = vmatprep.subr.bf16.mxu0 %v8636_v14 }
0x1328   :  { %v5717_v0 = vpop.f32.mrb[134].mxu1 }
0x1329   :  { %v7938_v49 = vpop.f32.mrb[135].mxu1 }
0x132a   :  { %8316 = vmatpush3.bf16.msra.mxu0 %v8315_v44 }
0x132b   :  { %8320 = vmatprep.subr.bf16.mxu0 %v8636_v14 }
0x132c   :  { %v5871_v8 = vpop.f32.mrb[136].mxu1 }
0x132d   :  { %7930 = vmatmul.mubr.msk.f32.vlgmr.msra.gmra.mrb[122].mxu0 %vm367_vm15, %v5563_v11  ;;  %v7956_v12 = vpop.f32.mrb[137].mxu1 }
0x132e   :  { %8322 = vmatpush3.bf16.msra.mxu0 %v8321_v4  ;;  %7947 = vmatprep.mubr.msk.f32.mxu0 %vm8637_vm10, %v8617_v21 }
0x132f   :  { %8323 = vmatprep.subr.bf16.mxu0 %v8636_v14 }
0x1330   :  { %v6025_v38 = vpop.f32.mrb[138].mxu1 }
0x1331   :  { %v7974_v31 = vpop.f32.mrb[139].mxu1 }
0x1332   :  { %8325 = vmatpush3.bf16.msra.mxu0 %v8324_v60 }
0x1333   :  { %8329 = vmatprep.subr.bf16.mxu0 %v8636_v14 }
0x1334   :  { %v6179_v28 = vpop.f32.mrb[140].mxu1 }
0x1335   :  { %7948 = vmatmul.mubr.msk.f32.vlgmr.msra.gmra.mrb[122].mxu0 %vm367_vm15, %v5717_v0  ;;  %v7992_v32 = vpop.f32.mrb[141].mxu1 }
0x1336   :  { %8331 = vmatpush3.bf16.msra.mxu0 %v8330_v2  ;;  %7965 = vmatprep.mubr.msk.f32.mxu0 %vm8637_vm10, %v8617_v21 }
0x1337   :  { %8332 = vmatprep.subr.bf16.mxu0 %v8636_v14 }
0x1338   :  { %v6333_v15 = vpop.f32.mrb[142].mxu1 }
0x1339   :  { %v8010_v40 = vpop.f32.mrb[143].mxu1 }
0x133a   :  { %8334 = vmatpush3.bf16.msra.mxu0 %v8333_v6 }
0x133b   :  { %8338 = vmatprep.subr.bf16.mxu0 %v8636_v14 }
0x133d   :  { %7966 = vmatmul.mubr.msk.f32.vlgmr.msra.gmra.mrb[122].mxu0 %vm367_vm15, %v5871_v8 }
0x133e   :  { %8340 = vmatpush3.bf16.msra.mxu0 %v8339_v9  ;;  %7983 = vmatprep.mubr.msk.f32.mxu0 %vm8637_vm10, %v8617_v21 }
0x133f   :  { %8341 = vmatprep.subr.bf16.mxu0 %v8636_v14 }
0x1342   :  { %8343 = vmatpush3.bf16.msra.mxu0 %v8342_v30 }
0x1343   :  { %8347 = vmatprep.subr.bf16.mxu0 %v8636_v14 }
0x1345   :  { %7984 = vmatmul.mubr.msk.f32.vlgmr.msra.gmra.mrb[122].mxu0 %vm367_vm15, %v6025_v38 }
0x1346   :  { %8349 = vmatpush3.bf16.msra.mxu0 %v8348_v33  ;;  %8001 = vmatprep.mubr.msk.f32.mxu0 %vm8637_vm10, %v8617_v21 }
0x1347   :  { %8350 = vmatprep.subr.bf16.mxu0 %v8636_v14 }
0x134a   :  { %8352 = vmatpush3.bf16.msra.mxu0 %v8351_v50 }
0x134b   :  { %8356 = vmatprep.subr.bf16.mxu0 %v8636_v14 }
0x134d   :  { %8002 = vmatmul.mubr.msk.f32.vlgmr.msra.gmra.mrb[122].mxu0 %vm367_vm15, %v6179_v28 }
0x134e   :  { %8358 = vmatpush3.bf16.msra.mxu0 %v8357_v61  ;;  %8019 = vmatprep.mubr.msk.f32.mxu0 %vm8637_vm10, %v8617_v21 }
0x134f   :  { %8359 = vmatprep.subr.bf16.mxu0 %v8636_v14 }
0x1352   :  { %8361 = vmatpush3.bf16.msra.mxu0 %v8360_v17 }
0x1355   :  { %8020 = vmatmul.mubr.msk.f32.vlgmr.msra.gmra.mrb[122].mxu0 %vm367_vm15, %v6333_v15 }
0x1428   :  { %v6411_v16 = vpop.f32.mrb[122].mxu0 }
0x1429   :  { %v8362_v58 = vadd.f32 %v6796_v13, %v6411_v16  ;;  %v8021_v25 = vpop.f32.mrb[123].mxu0 }
0x142b   :  { %6416 = vst [vmem:[%s6449_s17] sm:$0x3] %v8362_v58 }

</bundles_post_ra>
